<compile_context>
chip_gen: v7x
topology: tpu7x:2x2x1
jax: 0.10.0
libtpu: 0.0.40
codegen_flags: <defaults>
</compile_context>

<pallas_src>
import functools

import jax
import jax.numpy as jnp
from jax.experimental import pallas as pl
from jax.experimental.pallas import tpu as pltpu


# ------------------------------- helpers ----------------------------------- #

def _round_up(x, m):
    return (x + m - 1) // m * m


def _cdiv(a, b):
    return (a + b - 1) // b


def _vmem_limit_bytes():
    """Generation-aware scoped-VMEM limit (per perf review)."""
    try:
        kind = jax.devices()[0].device_kind.lower()
    except Exception:
        return None
    if any(t in kind for t in ("v4", "v5", "v6")):
        return 96 * 1024 * 1024          # 128 MiB physical VMEM
    if "v7" in kind:
        return 32 * 1024 * 1024          # 64 MiB physical VMEM -> stay safe
    return None                           # unknown chip: compiler default


# ----------------------------- Pallas kernels ------------------------------ #

def _conv_bn_stats_kernel(edge_ref, w_ref, scale_ref, shift_ref, x_hbm,
                          y_ref, st_ref, *scratch,
                          taps, halo_pad, tm, cin, input_affine, needs_xw,
                          compute_dtype):
    """One lane-dense M-tile of a 3x3x3 / pad=1 / stride=1 conv.

    - DMAs the halo'd input window from HBM into VMEM (issued+awaited in-step,
      so the grid axis stays megacore-parallel safe).
    - Optionally applies a fused input affine+ReLU (BN1 folded into conv2).
    - Builds the folded (27*Cin, tm) im2col block in VMEM from 27 statically
      shifted slices, masking invalid taps with precomputed edge-mask rows.
    - One (Cout, 27*Cin) @ (27*Cin, tm) matmul, plus packed per-tile BN
      partial statistics (sum, sumsq) over valid columns only.
    """
    if needs_xw:
        win_ref, xw_ref, cols_ref, sem = scratch
    else:
        win_ref, cols_ref, sem = scratch
        xw_ref = None

    wlen = win_ref.shape[1]
    start = pl.multiple_of(pl.program_id(0) * tm, 128)
    cp = pltpu.make_async_copy(x_hbm.at[:, pl.ds(start, wlen)], win_ref, sem)
    cp.start()
    cp.wait()

    if needs_xw:
        xin = win_ref[...]
        if input_affine:
            # BN1 affine + ReLU fused into conv2's input path (halo included).
            xin = jnp.maximum(xin * scale_ref[...] + shift_ref[...], 0.0)
        xw_ref[...] = xin.astype(compute_dtype)
        src = xw_ref
    else:
        src = win_ref

    # Build the folded im2col block: tap-major, channel-minor rows.
    for k, (off, rows) in enumerate(taps):
        sl = src[:, pl.ds(halo_pad + off, tm)]
        m = None
        for r in rows:                       # 0..5: w/h/d boundary validity rows
            e = edge_ref[r:r + 1, :]
            m = e if m is None else m * e
        if m is not None:
            sl = sl * m.astype(sl.dtype)
        cols_ref[pl.ds(k * cin, cin), :] = sl

    y = jnp.dot(w_ref[...], cols_ref[...], preferred_element_type=jnp.float32)
    y_ref[...] = y.astype(y_ref.dtype)

    # Packed BN partial stats over valid (column < M) lanes only.
    valid = edge_ref[6:7, :]                 # (1, tm) in {0, 1}
    yv = y * valid
    s1 = jnp.sum(yv, axis=1, keepdims=True)          # (Cout, 1)
    s2 = jnp.sum(yv * y, axis=1, keepdims=True)      # (Cout, 1)
    st_ref[...] = jnp.concatenate([s1, s2], axis=0)[None]   # (1, 2*Cout, 1)


def _affine_add_relu_kernel(y_ref, r_ref, scale_ref, shift_ref, o_ref):
    """relu(y*scale + shift + residual) — lane-dense elementwise pass."""
    o_ref[...] = jnp.maximum(
        y_ref[...] * scale_ref[...] + shift_ref[...] + r_ref[...],
        0.0).astype(o_ref.dtype)


# ------------------------------ kernel wrappers ----------------------------- #

def _conv3x3x3_bn(x_halo, w_oidhw, edge, *, spatial, tm, m_pad, halo_pad,
                  in_scale=None, in_shift=None, compute_dtype=jnp.float32,
                  vmem_limit=None):
    """x_halo: (Cin, halo_pad + m_pad + halo_pad), zero-padded flat activation.
    Returns y (Cout, m_pad) f32 and packed per-tile BN partials
    (n_tiles, 2*Cout, 1)."""
    Cin = x_halo.shape[0]
    Cout = w_oidhw.shape[0]
    D, H, W = spatial
    K = 27 * Cin
    n_tiles = m_pad // tm
    wlen = tm + 2 * halo_pad

    # Fold all 27 taps into the contraction: (kd,kh,kw)-major, channel-minor —
    # must match the in-kernel cols build order.
    w_t = jnp.transpose(w_oidhw, (0, 2, 3, 4, 1)).reshape(Cout, K)
    w_t = w_t.astype(compute_dtype)

    input_affine = in_scale is not None
    if input_affine:
        in_scale = in_scale.reshape(Cin, 1).astype(jnp.float32)
        in_shift = in_shift.reshape(Cin, 1).astype(jnp.float32)
    else:
        in_scale = jnp.ones((Cin, 1), jnp.float32)
        in_shift = jnp.zeros((Cin, 1), jnp.float32)

    needs_xw = input_affine or (x_halo.dtype != compute_dtype)

    # Static per-tap flat offset and edge-mask rows (see _edge_masks order).
    taps = []
    for dd in (-1, 0, 1):
        for dh in (-1, 0, 1):
            for dw in (-1, 0, 1):
                rows = []
                if dd < 0:
                    rows.append(4)
                elif dd > 0:
                    rows.append(5)
                if dh < 0:
                    rows.append(2)
                elif dh > 0:
                    rows.append(3)
                if dw < 0:
                    rows.append(0)
                elif dw > 0:
                    rows.append(1)
                taps.append((dd * H * W + dh * W + dw, tuple(rows)))

    kernel = functools.partial(
        _conv_bn_stats_kernel, taps=tuple(taps), halo_pad=halo_pad, tm=tm,
        cin=Cin, input_affine=input_affine, needs_xw=needs_xw,
        compute_dtype=compute_dtype)

    scratch = [pltpu.VMEM((Cin, wlen), x_halo.dtype)]        # raw halo window
    if needs_xw:
        scratch.append(pltpu.VMEM((Cin, wlen), compute_dtype))  # affine/cast win
    scratch += [pltpu.VMEM((K, tm), compute_dtype),          # folded im2col block
                pltpu.SemaphoreType.DMA]

    return pl.pallas_call(
        kernel,
        out_shape=(
            jax.ShapeDtypeStruct((Cout, m_pad), jnp.float32),
            jax.ShapeDtypeStruct((n_tiles, 2 * Cout, 1), jnp.float32),
        ),
        grid_spec=pltpu.PrefetchScalarGridSpec(
            num_scalar_prefetch=0,
            grid=(n_tiles,),
            in_specs=[
                pl.BlockSpec((8, tm), lambda i: (0, i)),      # edge masks (pipelined)
                pl.BlockSpec((Cout, K), lambda i: (0, 0)),    # folded weight (resident)
                pl.BlockSpec((Cin, 1), lambda i: (0, 0)),     # fused input scale
                pl.BlockSpec((Cin, 1), lambda i: (0, 0)),     # fused input shift
                pl.BlockSpec(memory_space=pl.ANY),            # activation stays in HBM
            ],
            out_specs=(
                pl.BlockSpec((Cout, tm), lambda i: (0, i)),           # lane-dense y
                pl.BlockSpec((1, 2 * Cout, 1), lambda i: (i, 0, 0)),  # packed stats
            ),
            scratch_shapes=scratch,
        ),
        compiler_params=pltpu.CompilerParams(
            dimension_semantics=("parallel",),
            vmem_limit_bytes=vmem_limit),
    )(edge, w_t, in_scale, in_shift, x_halo)


def _bn_affine_add_relu(y, res, scale, shift, *, tm, vmem_limit=None):
    """Tiled, pipelined relu(y*scale + shift + residual) over (C, m_pad)."""
    C, m_pad = y.shape
    n_tiles = m_pad // tm
    tile = pl.BlockSpec((C, tm), lambda i: (0, i))
    vec = pl.BlockSpec((C, 1), lambda i: (0, 0))
    return pl.pallas_call(
        _affine_add_relu_kernel,
        out_shape=jax.ShapeDtypeStruct((C, m_pad), jnp.float32),
        grid_spec=pltpu.PrefetchScalarGridSpec(
            num_scalar_prefetch=0,
            grid=(n_tiles,),
            in_specs=[tile, tile, vec, vec],
            out_specs=tile),
        compiler_params=pltpu.CompilerParams(
            dimension_semantics=("parallel",),
            vmem_limit_bytes=vmem_limit),
    )(y, res, scale, shift)


# ------------------------------- JAX glue ---------------------------------- #

def _edge_masks(D, H, W, M, m_pad):
    """Per-flat-position boundary-validity rows, computed once and shared by
    both convs.  Row order must match the `rows` indices built in the wrapper:
      0: w>=1 (dw=-1 valid)   1: w<=W-2 (dw=+1)
      2: h>=1 (dh=-1)         3: h<=H-2 (dh=+1)
      4: d>=1 (dd=-1)         5: d<=D-2 (dd=+1)
      6: column < M (stats validity)   7: unused (ones, keeps 8 sublanes)"""
    m = jnp.arange(m_pad, dtype=jnp.int32)
    w = m % W
    h = (m // W) % H
    d = (m // (H * W)) % D
    rows = jnp.stack([
        w >= 1, w <= W - 2,
        h >= 1, h <= H - 2,
        d >= 1, d <= D - 2,
        m < M,
        jnp.ones_like(m, dtype=bool),
    ], axis=0)
    return rows.astype(jnp.float32)


def _bn_fold_affine(st, m_valid, gamma, beta, eps):
    """Fold packed per-tile (sum, sumsq) partials into per-channel scale/shift
    (PyTorch training-mode BN: biased variance over all N*D*H*W positions)."""
    C = gamma.shape[0]
    s = jnp.sum(st[:, :, 0], axis=0)                    # (2C,)
    mean = s[:C] / m_valid
    # TODO(synk): single-pass E[x^2]-E[x]^2 in f32; fine here (conv outputs are
    # near zero-mean) — switch to a mean-shifted fold for extreme input scales.
    var = jnp.maximum(s[C:] / m_valid - mean * mean, 0.0)
    scale = gamma.astype(jnp.float32) * jax.lax.rsqrt(var + eps)
    shift = beta.astype(jnp.float32) - mean * scale
    return scale.reshape(C, 1), shift.reshape(C, 1)


def residual3d_forward(x_ncdhw, params, *, tm=8192, tm_affine=32768, eps=1e-5,
                       compute_dtype=jnp.float32):
    N, C, D, H, W = x_ncdhw.shape
    Cout = params["w1"].shape[0]
    assert Cout == C, "no-1x1-conv residual requires Cin == Cout"
    # Note: conv biases b1/b2 are intentionally unused — they cancel exactly in
    # batch-statistics BatchNorm, so the output is identical without them.

    M = N * D * H * W
    halo = H * W + W + 1                     # max |flat offset| of a 3x3x3 tap
    halo_pad = _round_up(halo, 128)

    # Conv tile: as large as requested (generation-tuned default 8192), clamped
    # to the problem size, and at least ~2*halo so the halo re-read stays small.
    tm_c = max(128, _round_up(tm, 128))
    tm_c = max(tm_c, _round_up(2 * halo, 128))
    tm_c = min(tm_c, _round_up(M, 128))
    # Decoupled (much larger) tile for the elementwise pass; must divide m_pad.
    n_aff = max(1, min(max(1, tm_affine // tm_c), _cdiv(M, tm_c)))
    tm_a = tm_c * n_aff
    m_pad = _round_up(M, tm_a)
    vmem_limit = _vmem_limit_bytes()

    # Lane-dense "CM" layout; only cheap (C, M)-sized pads are ever made.
    x_t = jnp.transpose(x_ncdhw, (1, 0, 2, 3, 4)).astype(jnp.float32)
    x_t = x_t.reshape(C, M)
    x_halo = jnp.pad(x_t, ((0, 0), (halo_pad, halo_pad + m_pad - M)))
    edge = _edge_masks(D, H, W, M, m_pad)
    spatial = (D, H, W)

    # ---- conv1 + fused BN1 partial stats ----
    y1, st1 = _conv3x3x3_bn(x_halo, params["w1"], edge, spatial=spatial,
                            tm=tm_c, m_pad=m_pad, halo_pad=halo_pad,
                            compute_dtype=compute_dtype, vmem_limit=vmem_limit)
    scale1, shift1 = _bn_fold_affine(st1, M, params["g1"], params["beta1"], eps)

    # ---- conv2 with BN1 affine + ReLU fused into its input path ----
    y1_halo = jnp.pad(y1, ((0, 0), (halo_pad, halo_pad)))
    y2, st2 = _conv3x3x3_bn(y1_halo, params["w2"], edge, spatial=spatial,
                            tm=tm_c, m_pad=m_pad, halo_pad=halo_pad,
                            in_scale=scale1, in_shift=shift1,
                            compute_dtype=compute_dtype, vmem_limit=vmem_limit)
    scale2, shift2 = _bn_fold_affine(st2, M, params["g2"], params["beta2"], eps)

    # ---- out = relu(bn2(conv2) + x), big lane-dense tiles ----
    x_res = jnp.pad(x_t, ((0, 0), (0, m_pad - M)))
    out = _bn_affine_add_relu(y2, x_res, scale2, shift2, tm=tm_a,
                              vmem_limit=vmem_limit)

    out = out[:, :M].reshape(C, N, D, H, W)
    return jnp.transpose(out, (1, 0, 2, 3, 4))               # NCDHW


# --------------------------- pure-JAX reference ----------------------------- #

def _reference_forward(x, p, eps=1e-5):
    dn = ("NCDHW", "OIDHW", "NCDHW")

    def conv(z, w, b):
        y = jax.lax.conv_general_dilated(z, w, (1, 1, 1),
                                         ((1, 1), (1, 1), (1, 1)),
                                         dimension_numbers=dn)
        return y + b.reshape(1, -1, 1, 1, 1)

    def bn(y, g, bt):
        m = jnp.mean(y, axis=(0, 2, 3, 4), keepdims=True)
        v = jnp.mean((y - m) ** 2, axis=(0, 2, 3, 4), keepdims=True)
        return (y - m) / jnp.sqrt(v + eps) * g.reshape(1, -1, 1, 1, 1) \
            + bt.reshape(1, -1, 1, 1, 1)

    y = jax.nn.relu(bn(conv(x, p["w1"], p["b1"]), p["g1"], p["beta1"]))
    y = bn(conv(y, p["w2"], p["b2"]), p["g2"], p["beta2"])
    return jax.nn.relu(y + x)


# ----------------------------------- main ----------------------------------- #

if __name__ == "__main__":
    def make_case(key, N, C, D, H, W):
        ks = jax.random.split(key, 9)
        x = jax.random.normal(ks[0], (N, C, D, H, W), jnp.float32)
        params = dict(
            w1=0.1 * jax.random.normal(ks[1], (C, C, 3, 3, 3), jnp.float32),
            b1=0.1 * jax.random.normal(ks[2], (C,), jnp.float32),
            w2=0.1 * jax.random.normal(ks[3], (C, C, 3, 3, 3), jnp.float32),
            b2=0.1 * jax.random.normal(ks[4], (C,), jnp.float32),
            g1=1.0 + 0.1 * jax.random.normal(ks[5], (C,), jnp.float32),
            beta1=0.1 * jax.random.normal(ks[6], (C,), jnp.float32),
            g2=1.0 + 0.1 * jax.random.normal(ks[7], (C,), jnp.float32),
            beta2=0.1 * jax.random.normal(ks[8], (C,), jnp.float32),
        )
        return x, params

    fwd = jax.jit(residual3d_forward, static_argnames=("tm", "tm_affine"))
    key = jax.random.PRNGKey(0)

    # case 1: M=1024, tm=256 -> 4 conv tiles; halo windows cross tile boundaries
    # case 2: M=420 (ragged, non-pow2 H/W) -> padded to 512, masked statistics
    # case 3: M=65536, tm=4096 -> 16 conv tiles, 2 decoupled 32768-lane affine tiles
    cases = [((2, 8, 8, 8, 8), 256),
             ((2, 8, 5, 6, 7), 2048),
             ((4, 8, 16, 32, 32), 4096)]

    for shape, tm in cases:
        key, sub = jax.random.split(key)
        x, params = make_case(sub, *shape)
        out = jax.block_until_ready(fwd(x, params, tm=tm))
        ref = _reference_forward(x, params)
        assert out.shape == x.shape
        max_err = float(jnp.max(jnp.abs(out - ref)))
        assert jnp.allclose(out, ref, atol=1e-3, rtol=1e-3), \
            f"shape={shape} max_err={max_err}"

    print("KERNEL_OK")
</pallas_src>

<mosaic_0001>
module attributes {stable_mosaic.version = 11 : i64} {
  func.func @_conv_bn_stats_kernel(%arg0: i32, %arg1: memref<8x256xf32, #tpu.memory_space<vmem>>, %arg2: memref<8x216xf32, #tpu.memory_space<vmem>>, %arg3: memref<8x1xf32, #tpu.memory_space<vmem>>, %arg4: memref<8x1xf32, #tpu.memory_space<vmem>>, %arg5: memref<8x1280xf32, #tpu.memory_space<any>>, %arg6: memref<8x256xf32, #tpu.memory_space<vmem>>, %arg7: memref<1x16x1xf32, #tpu.memory_space<vmem>>, %arg8: memref<8x512xf32, #tpu.memory_space<vmem>>, %arg9: memref<216x256xf32, #tpu.memory_space<vmem>>, %arg10: memref<!tpu.dma_semaphore, #tpu.memory_space<semaphore_mem>>) attributes {dimension_semantics = [#tpu.dimension_semantics<parallel>], iteration_bounds = array<i64: 4>, scalar_prefetch = 0 : i64, scratch_operands = 3 : i64, tpu.core_type = #tpu.core_type<tc>, window_params = [{transform_indices = @transform_0, window_bounds = array<i64: 8, 256>}, {pipeline_mode = #tpu.pipeline_mode<synchronous>, transform_indices = @transform_1, window_bounds = array<i64: 8, 216>}, {pipeline_mode = #tpu.pipeline_mode<synchronous>, transform_indices = @transform_2, window_bounds = array<i64: 8, 1>}, {pipeline_mode = #tpu.pipeline_mode<synchronous>, transform_indices = @transform_3, window_bounds = array<i64: 8, 1>}, {}, {transform_indices = @transform_5, window_bounds = array<i64: 8, 256>}, {transform_indices = @transform_6, window_bounds = array<i64: 1, 16, 1>}]} {
    %c256_i32 = arith.constant 256 : i32
    %0 = arith.muli %arg0, %c256_i32 : i32
    %1 = tpu.assume_multiple %0, 128 : i32
    %c0_i32 = arith.constant 0 : i32
    %2 = tpu.memref_slice %arg5[%c0_i32, %1] : memref<8x1280xf32, #tpu.memory_space<any>> -> memref<8x512xf32, #tpu.memory_space<any>>
    tpu.enqueue_dma source(%2 : memref<8x512xf32, #tpu.memory_space<any>>) target(%arg8 : memref<8x512xf32, #tpu.memory_space<vmem>>) target_semaphore(%arg10 : memref<!tpu.dma_semaphore, #tpu.memory_space<semaphore_mem>>)
    %c0_i32_0 = arith.constant 0 : i32
    %3 = tpu.memref_slice %arg5[%c0_i32_0, %1] : memref<8x1280xf32, #tpu.memory_space<any>> -> memref<8x512xf32, #tpu.memory_space<any>>
    tpu.wait_dma2 semaphore(%arg10 : memref<!tpu.dma_semaphore, #tpu.memory_space<semaphore_mem>>) src(%3 : memref<8x512xf32, #tpu.memory_space<any>>) dst(%arg8 : memref<8x512xf32, #tpu.memory_space<vmem>>)
    %c0 = arith.constant 0 : index
    %c55 = arith.constant 55 : index
    %4 = vector.load %arg8[%c0, %c55] : memref<8x512xf32, #tpu.memory_space<vmem>>, vector<8x256xf32>
    %c4 = arith.constant 4 : index
    %c0_1 = arith.constant 0 : index
    %5 = vector.load %arg1[%c4, %c0_1] : memref<8x256xf32, #tpu.memory_space<vmem>>, vector<1x256xf32>
    %c2 = arith.constant 2 : index
    %c0_2 = arith.constant 0 : index
    %6 = vector.load %arg1[%c2, %c0_2] : memref<8x256xf32, #tpu.memory_space<vmem>>, vector<1x256xf32>
    %7 = arith.mulf %5, %6 : vector<1x256xf32>
    %c0_3 = arith.constant 0 : index
    %c0_4 = arith.constant 0 : index
    %8 = vector.load %arg1[%c0_3, %c0_4] : memref<8x256xf32, #tpu.memory_space<vmem>>, vector<1x256xf32>
    %9 = arith.mulf %7, %8 : vector<1x256xf32>
    %10 = vector.broadcast %9 : vector<1x256xf32> to vector<8x256xf32>
    %11 = arith.mulf %4, %10 : vector<8x256xf32>
    %c0_5 = arith.constant 0 : index
    %c0_6 = arith.constant 0 : index
    %12 = vector.load %arg9[%c0_5, %c0_6] : memref<216x256xf32, #tpu.memory_space<vmem>>, vector<8x256xf32>
    tpu.vector_store %arg9[%c0_5, %c0_6], %11 {strides = array<i32>} : memref<216x256xf32, #tpu.memory_space<vmem>>, vector<8x256xf32>,
    %c0_7 = arith.constant 0 : index
    %c56 = arith.constant 56 : index
    %13 = vector.load %arg8[%c0_7, %c56] : memref<8x512xf32, #tpu.memory_space<vmem>>, vector<8x256xf32>
    %c4_8 = arith.constant 4 : index
    %c0_9 = arith.constant 0 : index
    %14 = vector.load %arg1[%c4_8, %c0_9] : memref<8x256xf32, #tpu.memory_space<vmem>>, vector<1x256xf32>
    %c2_10 = arith.constant 2 : index
    %c0_11 = arith.constant 0 : index
    %15 = vector.load %arg1[%c2_10, %c0_11] : memref<8x256xf32, #tpu.memory_space<vmem>>, vector<1x256xf32>
    %16 = arith.mulf %14, %15 : vector<1x256xf32>
    %17 = vector.broadcast %16 : vector<1x256xf32> to vector<8x256xf32>
    %18 = arith.mulf %13, %17 : vector<8x256xf32>
    %c8 = arith.constant 8 : index
    %c0_12 = arith.constant 0 : index
    %19 = vector.load %arg9[%c8, %c0_12] : memref<216x256xf32, #tpu.memory_space<vmem>>, vector<8x256xf32>
    tpu.vector_store %arg9[%c8, %c0_12], %18 {strides = array<i32>} : memref<216x256xf32, #tpu.memory_space<vmem>>, vector<8x256xf32>,
    %c0_13 = arith.constant 0 : index
    %c57 = arith.constant 57 : index
    %20 = vector.load %arg8[%c0_13, %c57] : memref<8x512xf32, #tpu.memory_space<vmem>>, vector<8x256xf32>
    %c4_14 = arith.constant 4 : index
    %c0_15 = arith.constant 0 : index
    %21 = vector.load %arg1[%c4_14, %c0_15] : memref<8x256xf32, #tpu.memory_space<vmem>>, vector<1x256xf32>
    %c2_16 = arith.constant 2 : index
    %c0_17 = arith.constant 0 : index
    %22 = vector.load %arg1[%c2_16, %c0_17] : memref<8x256xf32, #tpu.memory_space<vmem>>, vector<1x256xf32>
    %23 = arith.mulf %21, %22 : vector<1x256xf32>
    %c1 = arith.constant 1 : index
    %c0_18 = arith.constant 0 : index
    %24 = vector.load %arg1[%c1, %c0_18] : memref<8x256xf32, #tpu.memory_space<vmem>>, vector<1x256xf32>
    %25 = arith.mulf %23, %24 : vector<1x256xf32>
    %26 = vector.broadcast %25 : vector<1x256xf32> to vector<8x256xf32>
    %27 = arith.mulf %20, %26 : vector<8x256xf32>
    %c16 = arith.constant 16 : index
    %c0_19 = arith.constant 0 : index
    %28 = vector.load %arg9[%c16, %c0_19] : memref<216x256xf32, #tpu.memory_space<vmem>>, vector<8x256xf32>
    tpu.vector_store %arg9[%c16, %c0_19], %27 {strides = array<i32>} : memref<216x256xf32, #tpu.memory_space<vmem>>, vector<8x256xf32>,
    %c0_20 = arith.constant 0 : index
    %c63 = arith.constant 63 : index
    %29 = vector.load %arg8[%c0_20, %c63] : memref<8x512xf32, #tpu.memory_space<vmem>>, vector<8x256xf32>
    %c4_21 = arith.constant 4 : index
    %c0_22 = arith.constant 0 : index
    %30 = vector.load %arg1[%c4_21, %c0_22] : memref<8x256xf32, #tpu.memory_space<vmem>>, vector<1x256xf32>
    %c0_23 = arith.constant 0 : index
    %c0_24 = arith.constant 0 : index
    %31 = vector.load %arg1[%c0_23, %c0_24] : memref<8x256xf32, #tpu.memory_space<vmem>>, vector<1x256xf32>
    %32 = arith.mulf %30, %31 : vector<1x256xf32>
    %33 = vector.broadcast %32 : vector<1x256xf32> to vector<8x256xf32>
    %34 = arith.mulf %29, %33 : vector<8x256xf32>
    %c24 = arith.constant 24 : index
    %c0_25 = arith.constant 0 : index
    %35 = vector.load %arg9[%c24, %c0_25] : memref<216x256xf32, #tpu.memory_space<vmem>>, vector<8x256xf32>
    tpu.vector_store %arg9[%c24, %c0_25], %34 {strides = array<i32>} : memref<216x256xf32, #tpu.memory_space<vmem>>, vector<8x256xf32>,
    %c0_26 = arith.constant 0 : index
    %c64 = arith.constant 64 : index
    %36 = vector.load %arg8[%c0_26, %c64] : memref<8x512xf32, #tpu.memory_space<vmem>>, vector<8x256xf32>
    %c4_27 = arith.constant 4 : index
    %c0_28 = arith.constant 0 : index
    %37 = vector.load %arg1[%c4_27, %c0_28] : memref<8x256xf32, #tpu.memory_space<vmem>>, vector<1x256xf32>
    %38 = vector.broadcast %37 : vector<1x256xf32> to vector<8x256xf32>
    %39 = arith.mulf %36, %38 : vector<8x256xf32>
    %c32 = arith.constant 32 : index
    %c0_29 = arith.constant 0 : index
    %40 = vector.load %arg9[%c32, %c0_29] : memref<216x256xf32, #tpu.memory_space<vmem>>, vector<8x256xf32>
    tpu.vector_store %arg9[%c32, %c0_29], %39 {strides = array<i32>} : memref<216x256xf32, #tpu.memory_space<vmem>>, vector<8x256xf32>,
    %c0_30 = arith.constant 0 : index
    %c65 = arith.constant 65 : index
    %41 = vector.load %arg8[%c0_30, %c65] : memref<8x512xf32, #tpu.memory_space<vmem>>, vector<8x256xf32>
    %c4_31 = arith.constant 4 : index
    %c0_32 = arith.constant 0 : index
    %42 = vector.load %arg1[%c4_31, %c0_32] : memref<8x256xf32, #tpu.memory_space<vmem>>, vector<1x256xf32>
    %c1_33 = arith.constant 1 : index
    %c0_34 = arith.constant 0 : index
    %43 = vector.load %arg1[%c1_33, %c0_34] : memref<8x256xf32, #tpu.memory_space<vmem>>, vector<1x256xf32>
    %44 = arith.mulf %42, %43 : vector<1x256xf32>
    %45 = vector.broadcast %44 : vector<1x256xf32> to vector<8x256xf32>
    %46 = arith.mulf %41, %45 : vector<8x256xf32>
    %c40 = arith.constant 40 : index
    %c0_35 = arith.constant 0 : index
    %47 = vector.load %arg9[%c40, %c0_35] : memref<216x256xf32, #tpu.memory_space<vmem>>, vector<8x256xf32>
    tpu.vector_store %arg9[%c40, %c0_35], %46 {strides = array<i32>} : memref<216x256xf32, #tpu.memory_space<vmem>>, vector<8x256xf32>,
    %c0_36 = arith.constant 0 : index
    %c71 = arith.constant 71 : index
    %48 = vector.load %arg8[%c0_36, %c71] : memref<8x512xf32, #tpu.memory_space<vmem>>, vector<8x256xf32>
    %c4_37 = arith.constant 4 : index
    %c0_38 = arith.constant 0 : index
    %49 = vector.load %arg1[%c4_37, %c0_38] : memref<8x256xf32, #tpu.memory_space<vmem>>, vector<1x256xf32>
    %c3 = arith.constant 3 : index
    %c0_39 = arith.constant 0 : index
    %50 = vector.load %arg1[%c3, %c0_39] : memref<8x256xf32, #tpu.memory_space<vmem>>, vector<1x256xf32>
    %51 = arith.mulf %49, %50 : vector<1x256xf32>
    %c0_40 = arith.constant 0 : index
    %c0_41 = arith.constant 0 : index
    %52 = vector.load %arg1[%c0_40, %c0_41] : memref<8x256xf32, #tpu.memory_space<vmem>>, vector<1x256xf32>
    %53 = arith.mulf %51, %52 : vector<1x256xf32>
    %54 = vector.broadcast %53 : vector<1x256xf32> to vector<8x256xf32>
    %55 = arith.mulf %48, %54 : vector<8x256xf32>
    %c48 = arith.constant 48 : index
    %c0_42 = arith.constant 0 : index
    %56 = vector.load %arg9[%c48, %c0_42] : memref<216x256xf32, #tpu.memory_space<vmem>>, vector<8x256xf32>
    tpu.vector_store %arg9[%c48, %c0_42], %55 {strides = array<i32>} : memref<216x256xf32, #tpu.memory_space<vmem>>, vector<8x256xf32>,
    %c0_43 = arith.constant 0 : index
    %c72 = arith.constant 72 : index
    %57 = vector.load %arg8[%c0_43, %c72] : memref<8x512xf32, #tpu.memory_space<vmem>>, vector<8x256xf32>
    %c4_44 = arith.constant 4 : index
    %c0_45 = arith.constant 0 : index
    %58 = vector.load %arg1[%c4_44, %c0_45] : memref<8x256xf32, #tpu.memory_space<vmem>>, vector<1x256xf32>
    %c3_46 = arith.constant 3 : index
    %c0_47 = arith.constant 0 : index
    %59 = vector.load %arg1[%c3_46, %c0_47] : memref<8x256xf32, #tpu.memory_space<vmem>>, vector<1x256xf32>
    %60 = arith.mulf %58, %59 : vector<1x256xf32>
    %61 = vector.broadcast %60 : vector<1x256xf32> to vector<8x256xf32>
    %62 = arith.mulf %57, %61 : vector<8x256xf32>
    %c56_48 = arith.constant 56 : index
    %c0_49 = arith.constant 0 : index
    %63 = vector.load %arg9[%c56_48, %c0_49] : memref<216x256xf32, #tpu.memory_space<vmem>>, vector<8x256xf32>
    tpu.vector_store %arg9[%c56_48, %c0_49], %62 {strides = array<i32>} : memref<216x256xf32, #tpu.memory_space<vmem>>, vector<8x256xf32>,
    %c0_50 = arith.constant 0 : index
    %c73 = arith.constant 73 : index
    %64 = vector.load %arg8[%c0_50, %c73] : memref<8x512xf32, #tpu.memory_space<vmem>>, vector<8x256xf32>
    %c4_51 = arith.constant 4 : index
    %c0_52 = arith.constant 0 : index
    %65 = vector.load %arg1[%c4_51, %c0_52] : memref<8x256xf32, #tpu.memory_space<vmem>>, vector<1x256xf32>
    %c3_53 = arith.constant 3 : index
    %c0_54 = arith.constant 0 : index
    %66 = vector.load %arg1[%c3_53, %c0_54] : memref<8x256xf32, #tpu.memory_space<vmem>>, vector<1x256xf32>
    %67 = arith.mulf %65, %66 : vector<1x256xf32>
    %c1_55 = arith.constant 1 : index
    %c0_56 = arith.constant 0 : index
    %68 = vector.load %arg1[%c1_55, %c0_56] : memref<8x256xf32, #tpu.memory_space<vmem>>, vector<1x256xf32>
    %69 = arith.mulf %67, %68 : vector<1x256xf32>
    %70 = vector.broadcast %69 : vector<1x256xf32> to vector<8x256xf32>
    %71 = arith.mulf %64, %70 : vector<8x256xf32>
    %c64_57 = arith.constant 64 : index
    %c0_58 = arith.constant 0 : index
    %72 = vector.load %arg9[%c64_57, %c0_58] : memref<216x256xf32, #tpu.memory_space<vmem>>, vector<8x256xf32>
    tpu.vector_store %arg9[%c64_57, %c0_58], %71 {strides = array<i32>} : memref<216x256xf32, #tpu.memory_space<vmem>>, vector<8x256xf32>,
    %c0_59 = arith.constant 0 : index
    %c119 = arith.constant 119 : index
    %73 = vector.load %arg8[%c0_59, %c119] : memref<8x512xf32, #tpu.memory_space<vmem>>, vector<8x256xf32>
    %c2_60 = arith.constant 2 : index
    %c0_61 = arith.constant 0 : index
    %74 = vector.load %arg1[%c2_60, %c0_61] : memref<8x256xf32, #tpu.memory_space<vmem>>, vector<1x256xf32>
    %c0_62 = arith.constant 0 : index
    %c0_63 = arith.constant 0 : index
    %75 = vector.load %arg1[%c0_62, %c0_63] : memref<8x256xf32, #tpu.memory_space<vmem>>, vector<1x256xf32>
    %76 = arith.mulf %74, %75 : vector<1x256xf32>
    %77 = vector.broadcast %76 : vector<1x256xf32> to vector<8x256xf32>
    %78 = arith.mulf %73, %77 : vector<8x256xf32>
    %c72_64 = arith.constant 72 : index
    %c0_65 = arith.constant 0 : index
    %79 = vector.load %arg9[%c72_64, %c0_65] : memref<216x256xf32, #tpu.memory_space<vmem>>, vector<8x256xf32>
    tpu.vector_store %arg9[%c72_64, %c0_65], %78 {strides = array<i32>} : memref<216x256xf32, #tpu.memory_space<vmem>>, vector<8x256xf32>,
    %c0_66 = arith.constant 0 : index
    %c120 = arith.constant 120 : index
    %80 = vector.load %arg8[%c0_66, %c120] : memref<8x512xf32, #tpu.memory_space<vmem>>, vector<8x256xf32>
    %c2_67 = arith.constant 2 : index
    %c0_68 = arith.constant 0 : index
    %81 = vector.load %arg1[%c2_67, %c0_68] : memref<8x256xf32, #tpu.memory_space<vmem>>, vector<1x256xf32>
    %82 = vector.broadcast %81 : vector<1x256xf32> to vector<8x256xf32>
    %83 = arith.mulf %80, %82 : vector<8x256xf32>
    %c80 = arith.constant 80 : index
    %c0_69 = arith.constant 0 : index
    %84 = vector.load %arg9[%c80, %c0_69] : memref<216x256xf32, #tpu.memory_space<vmem>>, vector<8x256xf32>
    tpu.vector_store %arg9[%c80, %c0_69], %83 {strides = array<i32>} : memref<216x256xf32, #tpu.memory_space<vmem>>, vector<8x256xf32>,
    %c0_70 = arith.constant 0 : index
    %c121 = arith.constant 121 : index
    %85 = vector.load %arg8[%c0_70, %c121] : memref<8x512xf32, #tpu.memory_space<vmem>>, vector<8x256xf32>
    %c2_71 = arith.constant 2 : index
    %c0_72 = arith.constant 0 : index
    %86 = vector.load %arg1[%c2_71, %c0_72] : memref<8x256xf32, #tpu.memory_space<vmem>>, vector<1x256xf32>
    %c1_73 = arith.constant 1 : index
    %c0_74 = arith.constant 0 : index
    %87 = vector.load %arg1[%c1_73, %c0_74] : memref<8x256xf32, #tpu.memory_space<vmem>>, vector<1x256xf32>
    %88 = arith.mulf %86, %87 : vector<1x256xf32>
    %89 = vector.broadcast %88 : vector<1x256xf32> to vector<8x256xf32>
    %90 = arith.mulf %85, %89 : vector<8x256xf32>
    %c88 = arith.constant 88 : index
    %c0_75 = arith.constant 0 : index
    %91 = vector.load %arg9[%c88, %c0_75] : memref<216x256xf32, #tpu.memory_space<vmem>>, vector<8x256xf32>
    tpu.vector_store %arg9[%c88, %c0_75], %90 {strides = array<i32>} : memref<216x256xf32, #tpu.memory_space<vmem>>, vector<8x256xf32>,
    %c0_76 = arith.constant 0 : index
    %c127 = arith.constant 127 : index
    %92 = vector.load %arg8[%c0_76, %c127] : memref<8x512xf32, #tpu.memory_space<vmem>>, vector<8x256xf32>
    %c0_77 = arith.constant 0 : index
    %c0_78 = arith.constant 0 : index
    %93 = vector.load %arg1[%c0_77, %c0_78] : memref<8x256xf32, #tpu.memory_space<vmem>>, vector<1x256xf32>
    %94 = vector.broadcast %93 : vector<1x256xf32> to vector<8x256xf32>
    %95 = arith.mulf %92, %94 : vector<8x256xf32>
    %c96 = arith.constant 96 : index
    %c0_79 = arith.constant 0 : index
    %96 = vector.load %arg9[%c96, %c0_79] : memref<216x256xf32, #tpu.memory_space<vmem>>, vector<8x256xf32>
    tpu.vector_store %arg9[%c96, %c0_79], %95 {strides = array<i32>} : memref<216x256xf32, #tpu.memory_space<vmem>>, vector<8x256xf32>,
    %c0_80 = arith.constant 0 : index
    %c128 = arith.constant 128 : index
    %97 = vector.load %arg8[%c0_80, %c128] : memref<8x512xf32, #tpu.memory_space<vmem>>, vector<8x256xf32>
    %c104 = arith.constant 104 : index
    %c0_81 = arith.constant 0 : index
    %98 = vector.load %arg9[%c104, %c0_81] : memref<216x256xf32, #tpu.memory_space<vmem>>, vector<8x256xf32>
    tpu.vector_store %arg9[%c104, %c0_81], %97 {strides = array<i32>} : memref<216x256xf32, #tpu.memory_space<vmem>>, vector<8x256xf32>,
    %c0_82 = arith.constant 0 : index
    %c129 = arith.constant 129 : index
    %99 = vector.load %arg8[%c0_82, %c129] : memref<8x512xf32, #tpu.memory_space<vmem>>, vector<8x256xf32>
    %c1_83 = arith.constant 1 : index
    %c0_84 = arith.constant 0 : index
    %100 = vector.load %arg1[%c1_83, %c0_84] : memref<8x256xf32, #tpu.memory_space<vmem>>, vector<1x256xf32>
    %101 = vector.broadcast %100 : vector<1x256xf32> to vector<8x256xf32>
    %102 = arith.mulf %99, %101 : vector<8x256xf32>
    %c112 = arith.constant 112 : index
    %c0_85 = arith.constant 0 : index
    %103 = vector.load %arg9[%c112, %c0_85] : memref<216x256xf32, #tpu.memory_space<vmem>>, vector<8x256xf32>
    tpu.vector_store %arg9[%c112, %c0_85], %102 {strides = array<i32>} : memref<216x256xf32, #tpu.memory_space<vmem>>, vector<8x256xf32>,
    %c0_86 = arith.constant 0 : index
    %c135 = arith.constant 135 : index
    %104 = vector.load %arg8[%c0_86, %c135] : memref<8x512xf32, #tpu.memory_space<vmem>>, vector<8x256xf32>
    %c3_87 = arith.constant 3 : index
    %c0_88 = arith.constant 0 : index
    %105 = vector.load %arg1[%c3_87, %c0_88] : memref<8x256xf32, #tpu.memory_space<vmem>>, vector<1x256xf32>
    %c0_89 = arith.constant 0 : index
    %c0_90 = arith.constant 0 : index
    %106 = vector.load %arg1[%c0_89, %c0_90] : memref<8x256xf32, #tpu.memory_space<vmem>>, vector<1x256xf32>
    %107 = arith.mulf %105, %106 : vector<1x256xf32>
    %108 = vector.broadcast %107 : vector<1x256xf32> to vector<8x256xf32>
    %109 = arith.mulf %104, %108 : vector<8x256xf32>
    %c120_91 = arith.constant 120 : index
    %c0_92 = arith.constant 0 : index
    %110 = vector.load %arg9[%c120_91, %c0_92] : memref<216x256xf32, #tpu.memory_space<vmem>>, vector<8x256xf32>
    tpu.vector_store %arg9[%c120_91, %c0_92], %109 {strides = array<i32>} : memref<216x256xf32, #tpu.memory_space<vmem>>, vector<8x256xf32>,
    %c0_93 = arith.constant 0 : index
    %c136 = arith.constant 136 : index
    %111 = vector.load %arg8[%c0_93, %c136] : memref<8x512xf32, #tpu.memory_space<vmem>>, vector<8x256xf32>
    %c3_94 = arith.constant 3 : index
    %c0_95 = arith.constant 0 : index
    %112 = vector.load %arg1[%c3_94, %c0_95] : memref<8x256xf32, #tpu.memory_space<vmem>>, vector<1x256xf32>
    %113 = vector.broadcast %112 : vector<1x256xf32> to vector<8x256xf32>
    %114 = arith.mulf %111, %113 : vector<8x256xf32>
    %c128_96 = arith.constant 128 : index
    %c0_97 = arith.constant 0 : index
    %115 = vector.load %arg9[%c128_96, %c0_97] : memref<216x256xf32, #tpu.memory_space<vmem>>, vector<8x256xf32>
    tpu.vector_store %arg9[%c128_96, %c0_97], %114 {strides = array<i32>} : memref<216x256xf32, #tpu.memory_space<vmem>>, vector<8x256xf32>,
    %c0_98 = arith.constant 0 : index
    %c137 = arith.constant 137 : index
    %116 = vector.load %arg8[%c0_98, %c137] : memref<8x512xf32, #tpu.memory_space<vmem>>, vector<8x256xf32>
    %c3_99 = arith.constant 3 : index
    %c0_100 = arith.constant 0 : index
    %117 = vector.load %arg1[%c3_99, %c0_100] : memref<8x256xf32, #tpu.memory_space<vmem>>, vector<1x256xf32>
    %c1_101 = arith.constant 1 : index
    %c0_102 = arith.constant 0 : index
    %118 = vector.load %arg1[%c1_101, %c0_102] : memref<8x256xf32, #tpu.memory_space<vmem>>, vector<1x256xf32>
    %119 = arith.mulf %117, %118 : vector<1x256xf32>
    %120 = vector.broadcast %119 : vector<1x256xf32> to vector<8x256xf32>
    %121 = arith.mulf %116, %120 : vector<8x256xf32>
    %c136_103 = arith.constant 136 : index
    %c0_104 = arith.constant 0 : index
    %122 = vector.load %arg9[%c136_103, %c0_104] : memref<216x256xf32, #tpu.memory_space<vmem>>, vector<8x256xf32>
    tpu.vector_store %arg9[%c136_103, %c0_104], %121 {strides = array<i32>} : memref<216x256xf32, #tpu.memory_space<vmem>>, vector<8x256xf32>,
    %c0_105 = arith.constant 0 : index
    %c183 = arith.constant 183 : index
    %123 = vector.load %arg8[%c0_105, %c183] : memref<8x512xf32, #tpu.memory_space<vmem>>, vector<8x256xf32>
    %c5 = arith.constant 5 : index
    %c0_106 = arith.constant 0 : index
    %124 = vector.load %arg1[%c5, %c0_106] : memref<8x256xf32, #tpu.memory_space<vmem>>, vector<1x256xf32>
    %c2_107 = arith.constant 2 : index
    %c0_108 = arith.constant 0 : index
    %125 = vector.load %arg1[%c2_107, %c0_108] : memref<8x256xf32, #tpu.memory_space<vmem>>, vector<1x256xf32>
    %126 = arith.mulf %124, %125 : vector<1x256xf32>
    %c0_109 = arith.constant 0 : index
    %c0_110 = arith.constant 0 : index
    %127 = vector.load %arg1[%c0_109, %c0_110] : memref<8x256xf32, #tpu.memory_space<vmem>>, vector<1x256xf32>
    %128 = arith.mulf %126, %127 : vector<1x256xf32>
    %129 = vector.broadcast %128 : vector<1x256xf32> to vector<8x256xf32>
    %130 = arith.mulf %123, %129 : vector<8x256xf32>
    %c144 = arith.constant 144 : index
    %c0_111 = arith.constant 0 : index
    %131 = vector.load %arg9[%c144, %c0_111] : memref<216x256xf32, #tpu.memory_space<vmem>>, vector<8x256xf32>
    tpu.vector_store %arg9[%c144, %c0_111], %130 {strides = array<i32>} : memref<216x256xf32, #tpu.memory_space<vmem>>, vector<8x256xf32>,
    %c0_112 = arith.constant 0 : index
    %c184 = arith.constant 184 : index
    %132 = vector.load %arg8[%c0_112, %c184] : memref<8x512xf32, #tpu.memory_space<vmem>>, vector<8x256xf32>
    %c5_113 = arith.constant 5 : index
    %c0_114 = arith.constant 0 : index
    %133 = vector.load %arg1[%c5_113, %c0_114] : memref<8x256xf32, #tpu.memory_space<vmem>>, vector<1x256xf32>
    %c2_115 = arith.constant 2 : index
    %c0_116 = arith.constant 0 : index
    %134 = vector.load %arg1[%c2_115, %c0_116] : memref<8x256xf32, #tpu.memory_space<vmem>>, vector<1x256xf32>
    %135 = arith.mulf %133, %134 : vector<1x256xf32>
    %136 = vector.broadcast %135 : vector<1x256xf32> to vector<8x256xf32>
    %137 = arith.mulf %132, %136 : vector<8x256xf32>
    %c152 = arith.constant 152 : index
    %c0_117 = arith.constant 0 : index
    %138 = vector.load %arg9[%c152, %c0_117] : memref<216x256xf32, #tpu.memory_space<vmem>>, vector<8x256xf32>
    tpu.vector_store %arg9[%c152, %c0_117], %137 {strides = array<i32>} : memref<216x256xf32, #tpu.memory_space<vmem>>, vector<8x256xf32>,
    %c0_118 = arith.constant 0 : index
    %c185 = arith.constant 185 : index
    %139 = vector.load %arg8[%c0_118, %c185] : memref<8x512xf32, #tpu.memory_space<vmem>>, vector<8x256xf32>
    %c5_119 = arith.constant 5 : index
    %c0_120 = arith.constant 0 : index
    %140 = vector.load %arg1[%c5_119, %c0_120] : memref<8x256xf32, #tpu.memory_space<vmem>>, vector<1x256xf32>
    %c2_121 = arith.constant 2 : index
    %c0_122 = arith.constant 0 : index
    %141 = vector.load %arg1[%c2_121, %c0_122] : memref<8x256xf32, #tpu.memory_space<vmem>>, vector<1x256xf32>
    %142 = arith.mulf %140, %141 : vector<1x256xf32>
    %c1_123 = arith.constant 1 : index
    %c0_124 = arith.constant 0 : index
    %143 = vector.load %arg1[%c1_123, %c0_124] : memref<8x256xf32, #tpu.memory_space<vmem>>, vector<1x256xf32>
    %144 = arith.mulf %142, %143 : vector<1x256xf32>
    %145 = vector.broadcast %144 : vector<1x256xf32> to vector<8x256xf32>
    %146 = arith.mulf %139, %145 : vector<8x256xf32>
    %c160 = arith.constant 160 : index
    %c0_125 = arith.constant 0 : index
    %147 = vector.load %arg9[%c160, %c0_125] : memref<216x256xf32, #tpu.memory_space<vmem>>, vector<8x256xf32>
    tpu.vector_store %arg9[%c160, %c0_125], %146 {strides = array<i32>} : memref<216x256xf32, #tpu.memory_space<vmem>>, vector<8x256xf32>,
    %c0_126 = arith.constant 0 : index
    %c191 = arith.constant 191 : index
    %148 = vector.load %arg8[%c0_126, %c191] : memref<8x512xf32, #tpu.memory_space<vmem>>, vector<8x256xf32>
    %c5_127 = arith.constant 5 : index
    %c0_128 = arith.constant 0 : index
    %149 = vector.load %arg1[%c5_127, %c0_128] : memref<8x256xf32, #tpu.memory_space<vmem>>, vector<1x256xf32>
    %c0_129 = arith.constant 0 : index
    %c0_130 = arith.constant 0 : index
    %150 = vector.load %arg1[%c0_129, %c0_130] : memref<8x256xf32, #tpu.memory_space<vmem>>, vector<1x256xf32>
    %151 = arith.mulf %149, %150 : vector<1x256xf32>
    %152 = vector.broadcast %151 : vector<1x256xf32> to vector<8x256xf32>
    %153 = arith.mulf %148, %152 : vector<8x256xf32>
    %c168 = arith.constant 168 : index
    %c0_131 = arith.constant 0 : index
    %154 = vector.load %arg9[%c168, %c0_131] : memref<216x256xf32, #tpu.memory_space<vmem>>, vector<8x256xf32>
    tpu.vector_store %arg9[%c168, %c0_131], %153 {strides = array<i32>} : memref<216x256xf32, #tpu.memory_space<vmem>>, vector<8x256xf32>,
    %c0_132 = arith.constant 0 : index
    %c192 = arith.constant 192 : index
    %155 = vector.load %arg8[%c0_132, %c192] : memref<8x512xf32, #tpu.memory_space<vmem>>, vector<8x256xf32>
    %c5_133 = arith.constant 5 : index
    %c0_134 = arith.constant 0 : index
    %156 = vector.load %arg1[%c5_133, %c0_134] : memref<8x256xf32, #tpu.memory_space<vmem>>, vector<1x256xf32>
    %157 = vector.broadcast %156 : vector<1x256xf32> to vector<8x256xf32>
    %158 = arith.mulf %155, %157 : vector<8x256xf32>
    %c176 = arith.constant 176 : index
    %c0_135 = arith.constant 0 : index
    %159 = vector.load %arg9[%c176, %c0_135] : memref<216x256xf32, #tpu.memory_space<vmem>>, vector<8x256xf32>
    tpu.vector_store %arg9[%c176, %c0_135], %158 {strides = array<i32>} : memref<216x256xf32, #tpu.memory_space<vmem>>, vector<8x256xf32>,
    %c0_136 = arith.constant 0 : index
    %c193 = arith.constant 193 : index
    %160 = vector.load %arg8[%c0_136, %c193] : memref<8x512xf32, #tpu.memory_space<vmem>>, vector<8x256xf32>
    %c5_137 = arith.constant 5 : index
    %c0_138 = arith.constant 0 : index
    %161 = vector.load %arg1[%c5_137, %c0_138] : memref<8x256xf32, #tpu.memory_space<vmem>>, vector<1x256xf32>
    %c1_139 = arith.constant 1 : index
    %c0_140 = arith.constant 0 : index
    %162 = vector.load %arg1[%c1_139, %c0_140] : memref<8x256xf32, #tpu.memory_space<vmem>>, vector<1x256xf32>
    %163 = arith.mulf %161, %162 : vector<1x256xf32>
    %164 = vector.broadcast %163 : vector<1x256xf32> to vector<8x256xf32>
    %165 = arith.mulf %160, %164 : vector<8x256xf32>
    %c184_141 = arith.constant 184 : index
    %c0_142 = arith.constant 0 : index
    %166 = vector.load %arg9[%c184_141, %c0_142] : memref<216x256xf32, #tpu.memory_space<vmem>>, vector<8x256xf32>
    tpu.vector_store %arg9[%c184_141, %c0_142], %165 {strides = array<i32>} : memref<216x256xf32, #tpu.memory_space<vmem>>, vector<8x256xf32>,
    %c0_143 = arith.constant 0 : index
    %c199 = arith.constant 199 : index
    %167 = vector.load %arg8[%c0_143, %c199] : memref<8x512xf32, #tpu.memory_space<vmem>>, vector<8x256xf32>
    %c5_144 = arith.constant 5 : index
    %c0_145 = arith.constant 0 : index
    %168 = vector.load %arg1[%c5_144, %c0_145] : memref<8x256xf32, #tpu.memory_space<vmem>>, vector<1x256xf32>
    %c3_146 = arith.constant 3 : index
    %c0_147 = arith.constant 0 : index
    %169 = vector.load %arg1[%c3_146, %c0_147] : memref<8x256xf32, #tpu.memory_space<vmem>>, vector<1x256xf32>
    %170 = arith.mulf %168, %169 : vector<1x256xf32>
    %c0_148 = arith.constant 0 : index
    %c0_149 = arith.constant 0 : index
    %171 = vector.load %arg1[%c0_148, %c0_149] : memref<8x256xf32, #tpu.memory_space<vmem>>, vector<1x256xf32>
    %172 = arith.mulf %170, %171 : vector<1x256xf32>
    %173 = vector.broadcast %172 : vector<1x256xf32> to vector<8x256xf32>
    %174 = arith.mulf %167, %173 : vector<8x256xf32>
    %c192_150 = arith.constant 192 : index
    %c0_151 = arith.constant 0 : index
    %175 = vector.load %arg9[%c192_150, %c0_151] : memref<216x256xf32, #tpu.memory_space<vmem>>, vector<8x256xf32>
    tpu.vector_store %arg9[%c192_150, %c0_151], %174 {strides = array<i32>} : memref<216x256xf32, #tpu.memory_space<vmem>>, vector<8x256xf32>,
    %c0_152 = arith.constant 0 : index
    %c200 = arith.constant 200 : index
    %176 = vector.load %arg8[%c0_152, %c200] : memref<8x512xf32, #tpu.memory_space<vmem>>, vector<8x256xf32>
    %c5_153 = arith.constant 5 : index
    %c0_154 = arith.constant 0 : index
    %177 = vector.load %arg1[%c5_153, %c0_154] : memref<8x256xf32, #tpu.memory_space<vmem>>, vector<1x256xf32>
    %c3_155 = arith.constant 3 : index
    %c0_156 = arith.constant 0 : index
    %178 = vector.load %arg1[%c3_155, %c0_156] : memref<8x256xf32, #tpu.memory_space<vmem>>, vector<1x256xf32>
    %179 = arith.mulf %177, %178 : vector<1x256xf32>
    %180 = vector.broadcast %179 : vector<1x256xf32> to vector<8x256xf32>
    %181 = arith.mulf %176, %180 : vector<8x256xf32>
    %c200_157 = arith.constant 200 : index
    %c0_158 = arith.constant 0 : index
    %182 = vector.load %arg9[%c200_157, %c0_158] : memref<216x256xf32, #tpu.memory_space<vmem>>, vector<8x256xf32>
    tpu.vector_store %arg9[%c200_157, %c0_158], %181 {strides = array<i32>} : memref<216x256xf32, #tpu.memory_space<vmem>>, vector<8x256xf32>,
    %c0_159 = arith.constant 0 : index
    %c201 = arith.constant 201 : index
    %183 = vector.load %arg8[%c0_159, %c201] : memref<8x512xf32, #tpu.memory_space<vmem>>, vector<8x256xf32>
    %c5_160 = arith.constant 5 : index
    %c0_161 = arith.constant 0 : index
    %184 = vector.load %arg1[%c5_160, %c0_161] : memref<8x256xf32, #tpu.memory_space<vmem>>, vector<1x256xf32>
    %c3_162 = arith.constant 3 : index
    %c0_163 = arith.constant 0 : index
    %185 = vector.load %arg1[%c3_162, %c0_163] : memref<8x256xf32, #tpu.memory_space<vmem>>, vector<1x256xf32>
    %186 = arith.mulf %184, %185 : vector<1x256xf32>
    %c1_164 = arith.constant 1 : index
    %c0_165 = arith.constant 0 : index
    %187 = vector.load %arg1[%c1_164, %c0_165] : memref<8x256xf32, #tpu.memory_space<vmem>>, vector<1x256xf32>
    %188 = arith.mulf %186, %187 : vector<1x256xf32>
    %189 = vector.broadcast %188 : vector<1x256xf32> to vector<8x256xf32>
    %190 = arith.mulf %183, %189 : vector<8x256xf32>
    %c208 = arith.constant 208 : index
    %c0_166 = arith.constant 0 : index
    %191 = vector.load %arg9[%c208, %c0_166] : memref<216x256xf32, #tpu.memory_space<vmem>>, vector<8x256xf32>
    tpu.vector_store %arg9[%c208, %c0_166], %190 {strides = array<i32>} : memref<216x256xf32, #tpu.memory_space<vmem>>, vector<8x256xf32>,
    %c0_167 = arith.constant 0 : index
    %c0_168 = arith.constant 0 : index
    %192 = vector.load %arg2[%c0_167, %c0_168] : memref<8x216xf32, #tpu.memory_space<vmem>>, vector<8x216xf32>
    %c0_169 = arith.constant 0 : index
    %c0_170 = arith.constant 0 : index
    %193 = vector.load %arg9[%c0_169, %c0_170] : memref<216x256xf32, #tpu.memory_space<vmem>>, vector<216x256xf32>
    %cst = arith.constant dense<0.000000e+00> : vector<8x256xf32>
    %194 = tpu.matmul %192, %193, %cst {dimension_numbers = #tpu.dot_dimension_numbers<[1], [0], [0], [1], [0, 0, 1, 1], [], []>} : vector<8x216xf32>, vector<216x256xf32>, vector<8x256xf32> -> vector<8x256xf32>
    %c0_171 = arith.constant 0 : index
    %c0_172 = arith.constant 0 : index
    %195 = vector.load %arg6[%c0_171, %c0_172] : memref<8x256xf32, #tpu.memory_space<vmem>>, vector<8x256xf32>
    tpu.vector_store %arg6[%c0_171, %c0_172], %194 {strides = array<i32>} : memref<8x256xf32, #tpu.memory_space<vmem>>, vector<8x256xf32>,
    %c6 = arith.constant 6 : index
    %c0_173 = arith.constant 0 : index
    %196 = vector.load %arg1[%c6, %c0_173] : memref<8x256xf32, #tpu.memory_space<vmem>>, vector<1x256xf32>
    %197 = vector.broadcast %196 : vector<1x256xf32> to vector<8x256xf32>
    %198 = arith.mulf %194, %197 : vector<8x256xf32>
    %cst_174 = arith.constant dense<0.000000e+00> : vector<8xf32>
    %199 = vector.multi_reduction <add>, %198, %cst_174 [1] : vector<8x256xf32> to vector<8xf32>
    %200 = vector.shape_cast %199 : vector<8xf32> to vector<8x1xf32>
    %201 = arith.mulf %198, %194 : vector<8x256xf32>
    %cst_175 = arith.constant dense<0.000000e+00> : vector<8xf32>
    %202 = vector.multi_reduction <add>, %201, %cst_175 [1] : vector<8x256xf32> to vector<8xf32>
    %203 = vector.shape_cast %202 : vector<8xf32> to vector<8x1xf32>
    %204 = tpu.concatenate %200, %203 in 0 : vector<8x1xf32>, vector<8x1xf32> -> vector<16x1xf32>
    %205 = vector.shape_cast %204 : vector<16x1xf32> to vector<1x16x1xf32>
    %c0_176 = arith.constant 0 : index
    %c0_177 = arith.constant 0 : index
    %c0_178 = arith.constant 0 : index
    %206 = vector.load %arg7[%c0_176, %c0_177, %c0_178] : memref<1x16x1xf32, #tpu.memory_space<vmem>>, vector<1x16x1xf32>
    tpu.vector_store %arg7[%c0_176, %c0_177, %c0_178], %205 {strides = array<i32>} : memref<1x16x1xf32, #tpu.memory_space<vmem>>, vector<1x16x1xf32>,
    return
  }
  func.func @transform_0(%arg0: i32) -> (i32, i32) {
    %c0_i32 = arith.constant 0 : i32
    %c0_i32_0 = arith.constant 0 : i32
    return %c0_i32, %arg0 : i32, i32
  }
  func.func @transform_1(%arg0: i32) -> (i32, i32) {
    %c0_i32 = arith.constant 0 : i32
    %c0_i32_0 = arith.constant 0 : i32
    %c0_i32_1 = arith.constant 0 : i32
    return %c0_i32, %c0_i32_0 : i32, i32
  }
  func.func @transform_2(%arg0: i32) -> (i32, i32) {
    %c0_i32 = arith.constant 0 : i32
    %c0_i32_0 = arith.constant 0 : i32
    %c0_i32_1 = arith.constant 0 : i32
    return %c0_i32, %c0_i32_0 : i32, i32
  }
  func.func @transform_3(%arg0: i32) -> (i32, i32) {
    %c0_i32 = arith.constant 0 : i32
    %c0_i32_0 = arith.constant 0 : i32
    %c0_i32_1 = arith.constant 0 : i32
    return %c0_i32, %c0_i32_0 : i32, i32
  }
  func.func @transform_5(%arg0: i32) -> (i32, i32) {
    %c0_i32 = arith.constant 0 : i32
    %c0_i32_0 = arith.constant 0 : i32
    return %c0_i32, %arg0 : i32, i32
  }
  func.func @transform_6(%arg0: i32) -> (i32, i32, i32) {
    %c0_i32 = arith.constant 0 : i32
    %c0_i32_0 = arith.constant 0 : i32
    %c0_i32_1 = arith.constant 0 : i32
    return %arg0, %c0_i32, %c0_i32_0 : i32, i32, i32
  }
}

module attributes {stable_mosaic.version = 11 : i64} {
  func.func @_affine_add_relu_kernel(%arg0: i32, %arg1: memref<8x1024xf32, #tpu.memory_space<vmem>>, %arg2: memref<8x1024xf32, #tpu.memory_space<vmem>>, %arg3: memref<8x1xf32, #tpu.memory_space<vmem>>, %arg4: memref<8x1xf32, #tpu.memory_space<vmem>>, %arg5: memref<8x1024xf32, #tpu.memory_space<vmem>>) attributes {dimension_semantics = [#tpu.dimension_semantics<parallel>], iteration_bounds = array<i64: 1>, scalar_prefetch = 0 : i64, scratch_operands = 0 : i64, tpu.core_type = #tpu.core_type<tc>, window_params = [{transform_indices = @transform_0, window_bounds = array<i64: 8, 1024>}, {transform_indices = @transform_1, window_bounds = array<i64: 8, 1024>}, {pipeline_mode = #tpu.pipeline_mode<synchronous>, transform_indices = @transform_2, window_bounds = array<i64: 8, 1>}, {pipeline_mode = #tpu.pipeline_mode<synchronous>, transform_indices = @transform_3, window_bounds = array<i64: 8, 1>}, {transform_indices = @transform_4, window_bounds = array<i64: 8, 1024>}]} {
    %c0 = arith.constant 0 : index
    %c0_0 = arith.constant 0 : index
    %0 = vector.load %arg1[%c0, %c0_0] : memref<8x1024xf32, #tpu.memory_space<vmem>>, vector<8x1024xf32>
    %c0_1 = arith.constant 0 : index
    %c0_2 = arith.constant 0 : index
    %1 = vector.load %arg3[%c0_1, %c0_2] : memref<8x1xf32, #tpu.memory_space<vmem>>, vector<8x1xf32>
    %2 = vector.broadcast %1 : vector<8x1xf32> to vector<8x1024xf32>
    %3 = arith.mulf %0, %2 : vector<8x1024xf32>
    %c0_3 = arith.constant 0 : index
    %c0_4 = arith.constant 0 : index
    %4 = vector.load %arg4[%c0_3, %c0_4] : memref<8x1xf32, #tpu.memory_space<vmem>>, vector<8x1xf32>
    %5 = vector.broadcast %4 : vector<8x1xf32> to vector<8x1024xf32>
    %6 = arith.addf %3, %5 : vector<8x1024xf32>
    %c0_5 = arith.constant 0 : index
    %c0_6 = arith.constant 0 : index
    %7 = vector.load %arg2[%c0_5, %c0_6] : memref<8x1024xf32, #tpu.memory_space<vmem>>, vector<8x1024xf32>
    %8 = arith.addf %6, %7 : vector<8x1024xf32>
    %cst = arith.constant 0.000000e+00 : f32
    %9 = vector.broadcast %cst : f32 to vector<8x1024xf32>
    %10 = arith.maximumf %8, %9 : vector<8x1024xf32>
    %c0_7 = arith.constant 0 : index
    %c0_8 = arith.constant 0 : index
    %11 = vector.load %arg5[%c0_7, %c0_8] : memref<8x1024xf32, #tpu.memory_space<vmem>>, vector<8x1024xf32>
    tpu.vector_store %arg5[%c0_7, %c0_8], %10 {strides = array<i32>} : memref<8x1024xf32, #tpu.memory_space<vmem>>, vector<8x1024xf32>,
    return
  }
  func.func @transform_0(%arg0: i32) -> (i32, i32) {
    %c0_i32 = arith.constant 0 : i32
    %c0_i32_0 = arith.constant 0 : i32
    return %c0_i32, %arg0 : i32, i32
  }
  func.func @transform_1(%arg0: i32) -> (i32, i32) {
    %c0_i32 = arith.constant 0 : i32
    %c0_i32_0 = arith.constant 0 : i32
    return %c0_i32, %arg0 : i32, i32
  }
  func.func @transform_2(%arg0: i32) -> (i32, i32) {
    %c0_i32 = arith.constant 0 : i32
    %c0_i32_0 = arith.constant 0 : i32
    %c0_i32_1 = arith.constant 0 : i32
    return %c0_i32, %c0_i32_0 : i32, i32
  }
  func.func @transform_3(%arg0: i32) -> (i32, i32) {
    %c0_i32 = arith.constant 0 : i32
    %c0_i32_0 = arith.constant 0 : i32
    %c0_i32_1 = arith.constant 0 : i32
    return %c0_i32, %c0_i32_0 : i32, i32
  }
  func.func @transform_4(%arg0: i32) -> (i32, i32) {
    %c0_i32 = arith.constant 0 : i32
    %c0_i32_0 = arith.constant 0 : i32
    return %c0_i32, %arg0 : i32, i32
  }
}

module attributes {stable_mosaic.version = 11 : i64} {
  func.func @_conv_bn_stats_kernel(%arg0: i32, %arg1: memref<8x256xf32, #tpu.memory_space<vmem>>, %arg2: memref<8x216xf32, #tpu.memory_space<vmem>>, %arg3: memref<8x1xf32, #tpu.memory_space<vmem>>, %arg4: memref<8x1xf32, #tpu.memory_space<vmem>>, %arg5: memref<8x1280xf32, #tpu.memory_space<any>>, %arg6: memref<8x256xf32, #tpu.memory_space<vmem>>, %arg7: memref<1x16x1xf32, #tpu.memory_space<vmem>>, %arg8: memref<8x512xf32, #tpu.memory_space<vmem>>, %arg9: memref<8x512xf32, #tpu.memory_space<vmem>>, %arg10: memref<216x256xf32, #tpu.memory_space<vmem>>, %arg11: memref<!tpu.dma_semaphore, #tpu.memory_space<semaphore_mem>>) attributes {dimension_semantics = [#tpu.dimension_semantics<parallel>], iteration_bounds = array<i64: 4>, scalar_prefetch = 0 : i64, scratch_operands = 4 : i64, tpu.core_type = #tpu.core_type<tc>, window_params = [{transform_indices = @transform_0, window_bounds = array<i64: 8, 256>}, {pipeline_mode = #tpu.pipeline_mode<synchronous>, transform_indices = @transform_1, window_bounds = array<i64: 8, 216>}, {pipeline_mode = #tpu.pipeline_mode<synchronous>, transform_indices = @transform_2, window_bounds = array<i64: 8, 1>}, {pipeline_mode = #tpu.pipeline_mode<synchronous>, transform_indices = @transform_3, window_bounds = array<i64: 8, 1>}, {}, {transform_indices = @transform_5, window_bounds = array<i64: 8, 256>}, {transform_indices = @transform_6, window_bounds = array<i64: 1, 16, 1>}]} {
    %c256_i32 = arith.constant 256 : i32
    %0 = arith.muli %arg0, %c256_i32 : i32
    %1 = tpu.assume_multiple %0, 128 : i32
    %c0_i32 = arith.constant 0 : i32
    %2 = tpu.memref_slice %arg5[%c0_i32, %1] : memref<8x1280xf32, #tpu.memory_space<any>> -> memref<8x512xf32, #tpu.memory_space<any>>
    tpu.enqueue_dma source(%2 : memref<8x512xf32, #tpu.memory_space<any>>) target(%arg8 : memref<8x512xf32, #tpu.memory_space<vmem>>) target_semaphore(%arg11 : memref<!tpu.dma_semaphore, #tpu.memory_space<semaphore_mem>>)
    %c0_i32_0 = arith.constant 0 : i32
    %3 = tpu.memref_slice %arg5[%c0_i32_0, %1] : memref<8x1280xf32, #tpu.memory_space<any>> -> memref<8x512xf32, #tpu.memory_space<any>>
    tpu.wait_dma2 semaphore(%arg11 : memref<!tpu.dma_semaphore, #tpu.memory_space<semaphore_mem>>) src(%3 : memref<8x512xf32, #tpu.memory_space<any>>) dst(%arg8 : memref<8x512xf32, #tpu.memory_space<vmem>>)
    %c0 = arith.constant 0 : index
    %c0_1 = arith.constant 0 : index
    %4 = vector.load %arg8[%c0, %c0_1] : memref<8x512xf32, #tpu.memory_space<vmem>>, vector<8x512xf32>
    %c0_2 = arith.constant 0 : index
    %c0_3 = arith.constant 0 : index
    %5 = vector.load %arg3[%c0_2, %c0_3] : memref<8x1xf32, #tpu.memory_space<vmem>>, vector<8x1xf32>
    %6 = vector.broadcast %5 : vector<8x1xf32> to vector<8x512xf32>
    %7 = arith.mulf %4, %6 : vector<8x512xf32>
    %c0_4 = arith.constant 0 : index
    %c0_5 = arith.constant 0 : index
    %8 = vector.load %arg4[%c0_4, %c0_5] : memref<8x1xf32, #tpu.memory_space<vmem>>, vector<8x1xf32>
    %9 = vector.broadcast %8 : vector<8x1xf32> to vector<8x512xf32>
    %10 = arith.addf %7, %9 : vector<8x512xf32>
    %cst = arith.constant 0.000000e+00 : f32
    %11 = vector.broadcast %cst : f32 to vector<8x512xf32>
    %12 = arith.maximumf %10, %11 : vector<8x512xf32>
    %c0_6 = arith.constant 0 : index
    %c0_7 = arith.constant 0 : index
    %13 = vector.load %arg9[%c0_6, %c0_7] : memref<8x512xf32, #tpu.memory_space<vmem>>, vector<8x512xf32>
    tpu.vector_store %arg9[%c0_6, %c0_7], %12 {strides = array<i32>} : memref<8x512xf32, #tpu.memory_space<vmem>>, vector<8x512xf32>,
    %c0_8 = arith.constant 0 : index
    %c55 = arith.constant 55 : index
    %14 = vector.load %arg9[%c0_8, %c55] : memref<8x512xf32, #tpu.memory_space<vmem>>, vector<8x256xf32>
    %c4 = arith.constant 4 : index
    %c0_9 = arith.constant 0 : index
    %15 = vector.load %arg1[%c4, %c0_9] : memref<8x256xf32, #tpu.memory_space<vmem>>, vector<1x256xf32>
    %c2 = arith.constant 2 : index
    %c0_10 = arith.constant 0 : index
    %16 = vector.load %arg1[%c2, %c0_10] : memref<8x256xf32, #tpu.memory_space<vmem>>, vector<1x256xf32>
    %17 = arith.mulf %15, %16 : vector<1x256xf32>
    %c0_11 = arith.constant 0 : index
    %c0_12 = arith.constant 0 : index
    %18 = vector.load %arg1[%c0_11, %c0_12] : memref<8x256xf32, #tpu.memory_space<vmem>>, vector<1x256xf32>
    %19 = arith.mulf %17, %18 : vector<1x256xf32>
    %20 = vector.broadcast %19 : vector<1x256xf32> to vector<8x256xf32>
    %21 = arith.mulf %14, %20 : vector<8x256xf32>
    %c0_13 = arith.constant 0 : index
    %c0_14 = arith.constant 0 : index
    %22 = vector.load %arg10[%c0_13, %c0_14] : memref<216x256xf32, #tpu.memory_space<vmem>>, vector<8x256xf32>
    tpu.vector_store %arg10[%c0_13, %c0_14], %21 {strides = array<i32>} : memref<216x256xf32, #tpu.memory_space<vmem>>, vector<8x256xf32>,
    %c0_15 = arith.constant 0 : index
    %c56 = arith.constant 56 : index
    %23 = vector.load %arg9[%c0_15, %c56] : memref<8x512xf32, #tpu.memory_space<vmem>>, vector<8x256xf32>
    %c4_16 = arith.constant 4 : index
    %c0_17 = arith.constant 0 : index
    %24 = vector.load %arg1[%c4_16, %c0_17] : memref<8x256xf32, #tpu.memory_space<vmem>>, vector<1x256xf32>
    %c2_18 = arith.constant 2 : index
    %c0_19 = arith.constant 0 : index
    %25 = vector.load %arg1[%c2_18, %c0_19] : memref<8x256xf32, #tpu.memory_space<vmem>>, vector<1x256xf32>
    %26 = arith.mulf %24, %25 : vector<1x256xf32>
    %27 = vector.broadcast %26 : vector<1x256xf32> to vector<8x256xf32>
    %28 = arith.mulf %23, %27 : vector<8x256xf32>
    %c8 = arith.constant 8 : index
    %c0_20 = arith.constant 0 : index
    %29 = vector.load %arg10[%c8, %c0_20] : memref<216x256xf32, #tpu.memory_space<vmem>>, vector<8x256xf32>
    tpu.vector_store %arg10[%c8, %c0_20], %28 {strides = array<i32>} : memref<216x256xf32, #tpu.memory_space<vmem>>, vector<8x256xf32>,
    %c0_21 = arith.constant 0 : index
    %c57 = arith.constant 57 : index
    %30 = vector.load %arg9[%c0_21, %c57] : memref<8x512xf32, #tpu.memory_space<vmem>>, vector<8x256xf32>
    %c4_22 = arith.constant 4 : index
    %c0_23 = arith.constant 0 : index
    %31 = vector.load %arg1[%c4_22, %c0_23] : memref<8x256xf32, #tpu.memory_space<vmem>>, vector<1x256xf32>
    %c2_24 = arith.constant 2 : index
    %c0_25 = arith.constant 0 : index
    %32 = vector.load %arg1[%c2_24, %c0_25] : memref<8x256xf32, #tpu.memory_space<vmem>>, vector<1x256xf32>
    %33 = arith.mulf %31, %32 : vector<1x256xf32>
    %c1 = arith.constant 1 : index
    %c0_26 = arith.constant 0 : index
    %34 = vector.load %arg1[%c1, %c0_26] : memref<8x256xf32, #tpu.memory_space<vmem>>, vector<1x256xf32>
    %35 = arith.mulf %33, %34 : vector<1x256xf32>
    %36 = vector.broadcast %35 : vector<1x256xf32> to vector<8x256xf32>
    %37 = arith.mulf %30, %36 : vector<8x256xf32>
    %c16 = arith.constant 16 : index
    %c0_27 = arith.constant 0 : index
    %38 = vector.load %arg10[%c16, %c0_27] : memref<216x256xf32, #tpu.memory_space<vmem>>, vector<8x256xf32>
    tpu.vector_store %arg10[%c16, %c0_27], %37 {strides = array<i32>} : memref<216x256xf32, #tpu.memory_space<vmem>>, vector<8x256xf32>,
    %c0_28 = arith.constant 0 : index
    %c63 = arith.constant 63 : index
    %39 = vector.load %arg9[%c0_28, %c63] : memref<8x512xf32, #tpu.memory_space<vmem>>, vector<8x256xf32>
    %c4_29 = arith.constant 4 : index
    %c0_30 = arith.constant 0 : index
    %40 = vector.load %arg1[%c4_29, %c0_30] : memref<8x256xf32, #tpu.memory_space<vmem>>, vector<1x256xf32>
    %c0_31 = arith.constant 0 : index
    %c0_32 = arith.constant 0 : index
    %41 = vector.load %arg1[%c0_31, %c0_32] : memref<8x256xf32, #tpu.memory_space<vmem>>, vector<1x256xf32>
    %42 = arith.mulf %40, %41 : vector<1x256xf32>
    %43 = vector.broadcast %42 : vector<1x256xf32> to vector<8x256xf32>
    %44 = arith.mulf %39, %43 : vector<8x256xf32>
    %c24 = arith.constant 24 : index
    %c0_33 = arith.constant 0 : index
    %45 = vector.load %arg10[%c24, %c0_33] : memref<216x256xf32, #tpu.memory_space<vmem>>, vector<8x256xf32>
    tpu.vector_store %arg10[%c24, %c0_33], %44 {strides = array<i32>} : memref<216x256xf32, #tpu.memory_space<vmem>>, vector<8x256xf32>,
    %c0_34 = arith.constant 0 : index
    %c64 = arith.constant 64 : index
    %46 = vector.load %arg9[%c0_34, %c64] : memref<8x512xf32, #tpu.memory_space<vmem>>, vector<8x256xf32>
    %c4_35 = arith.constant 4 : index
    %c0_36 = arith.constant 0 : index
    %47 = vector.load %arg1[%c4_35, %c0_36] : memref<8x256xf32, #tpu.memory_space<vmem>>, vector<1x256xf32>
    %48 = vector.broadcast %47 : vector<1x256xf32> to vector<8x256xf32>
    %49 = arith.mulf %46, %48 : vector<8x256xf32>
    %c32 = arith.constant 32 : index
    %c0_37 = arith.constant 0 : index
    %50 = vector.load %arg10[%c32, %c0_37] : memref<216x256xf32, #tpu.memory_space<vmem>>, vector<8x256xf32>
    tpu.vector_store %arg10[%c32, %c0_37], %49 {strides = array<i32>} : memref<216x256xf32, #tpu.memory_space<vmem>>, vector<8x256xf32>,
    %c0_38 = arith.constant 0 : index
    %c65 = arith.constant 65 : index
    %51 = vector.load %arg9[%c0_38, %c65] : memref<8x512xf32, #tpu.memory_space<vmem>>, vector<8x256xf32>
    %c4_39 = arith.constant 4 : index
    %c0_40 = arith.constant 0 : index
    %52 = vector.load %arg1[%c4_39, %c0_40] : memref<8x256xf32, #tpu.memory_space<vmem>>, vector<1x256xf32>
    %c1_41 = arith.constant 1 : index
    %c0_42 = arith.constant 0 : index
    %53 = vector.load %arg1[%c1_41, %c0_42] : memref<8x256xf32, #tpu.memory_space<vmem>>, vector<1x256xf32>
    %54 = arith.mulf %52, %53 : vector<1x256xf32>
    %55 = vector.broadcast %54 : vector<1x256xf32> to vector<8x256xf32>
    %56 = arith.mulf %51, %55 : vector<8x256xf32>
    %c40 = arith.constant 40 : index
    %c0_43 = arith.constant 0 : index
    %57 = vector.load %arg10[%c40, %c0_43] : memref<216x256xf32, #tpu.memory_space<vmem>>, vector<8x256xf32>
    tpu.vector_store %arg10[%c40, %c0_43], %56 {strides = array<i32>} : memref<216x256xf32, #tpu.memory_space<vmem>>, vector<8x256xf32>,
    %c0_44 = arith.constant 0 : index
    %c71 = arith.constant 71 : index
    %58 = vector.load %arg9[%c0_44, %c71] : memref<8x512xf32, #tpu.memory_space<vmem>>, vector<8x256xf32>
    %c4_45 = arith.constant 4 : index
    %c0_46 = arith.constant 0 : index
    %59 = vector.load %arg1[%c4_45, %c0_46] : memref<8x256xf32, #tpu.memory_space<vmem>>, vector<1x256xf32>
    %c3 = arith.constant 3 : index
    %c0_47 = arith.constant 0 : index
    %60 = vector.load %arg1[%c3, %c0_47] : memref<8x256xf32, #tpu.memory_space<vmem>>, vector<1x256xf32>
    %61 = arith.mulf %59, %60 : vector<1x256xf32>
    %c0_48 = arith.constant 0 : index
    %c0_49 = arith.constant 0 : index
    %62 = vector.load %arg1[%c0_48, %c0_49] : memref<8x256xf32, #tpu.memory_space<vmem>>, vector<1x256xf32>
    %63 = arith.mulf %61, %62 : vector<1x256xf32>
    %64 = vector.broadcast %63 : vector<1x256xf32> to vector<8x256xf32>
    %65 = arith.mulf %58, %64 : vector<8x256xf32>
    %c48 = arith.constant 48 : index
    %c0_50 = arith.constant 0 : index
    %66 = vector.load %arg10[%c48, %c0_50] : memref<216x256xf32, #tpu.memory_space<vmem>>, vector<8x256xf32>
    tpu.vector_store %arg10[%c48, %c0_50], %65 {strides = array<i32>} : memref<216x256xf32, #tpu.memory_space<vmem>>, vector<8x256xf32>,
    %c0_51 = arith.constant 0 : index
    %c72 = arith.constant 72 : index
    %67 = vector.load %arg9[%c0_51, %c72] : memref<8x512xf32, #tpu.memory_space<vmem>>, vector<8x256xf32>
    %c4_52 = arith.constant 4 : index
    %c0_53 = arith.constant 0 : index
    %68 = vector.load %arg1[%c4_52, %c0_53] : memref<8x256xf32, #tpu.memory_space<vmem>>, vector<1x256xf32>
    %c3_54 = arith.constant 3 : index
    %c0_55 = arith.constant 0 : index
    %69 = vector.load %arg1[%c3_54, %c0_55] : memref<8x256xf32, #tpu.memory_space<vmem>>, vector<1x256xf32>
    %70 = arith.mulf %68, %69 : vector<1x256xf32>
    %71 = vector.broadcast %70 : vector<1x256xf32> to vector<8x256xf32>
    %72 = arith.mulf %67, %71 : vector<8x256xf32>
    %c56_56 = arith.constant 56 : index
    %c0_57 = arith.constant 0 : index
    %73 = vector.load %arg10[%c56_56, %c0_57] : memref<216x256xf32, #tpu.memory_space<vmem>>, vector<8x256xf32>
    tpu.vector_store %arg10[%c56_56, %c0_57], %72 {strides = array<i32>} : memref<216x256xf32, #tpu.memory_space<vmem>>, vector<8x256xf32>,
    %c0_58 = arith.constant 0 : index
    %c73 = arith.constant 73 : index
    %74 = vector.load %arg9[%c0_58, %c73] : memref<8x512xf32, #tpu.memory_space<vmem>>, vector<8x256xf32>
    %c4_59 = arith.constant 4 : index
    %c0_60 = arith.constant 0 : index
    %75 = vector.load %arg1[%c4_59, %c0_60] : memref<8x256xf32, #tpu.memory_space<vmem>>, vector<1x256xf32>
    %c3_61 = arith.constant 3 : index
    %c0_62 = arith.constant 0 : index
    %76 = vector.load %arg1[%c3_61, %c0_62] : memref<8x256xf32, #tpu.memory_space<vmem>>, vector<1x256xf32>
    %77 = arith.mulf %75, %76 : vector<1x256xf32>
    %c1_63 = arith.constant 1 : index
    %c0_64 = arith.constant 0 : index
    %78 = vector.load %arg1[%c1_63, %c0_64] : memref<8x256xf32, #tpu.memory_space<vmem>>, vector<1x256xf32>
    %79 = arith.mulf %77, %78 : vector<1x256xf32>
    %80 = vector.broadcast %79 : vector<1x256xf32> to vector<8x256xf32>
    %81 = arith.mulf %74, %80 : vector<8x256xf32>
    %c64_65 = arith.constant 64 : index
    %c0_66 = arith.constant 0 : index
    %82 = vector.load %arg10[%c64_65, %c0_66] : memref<216x256xf32, #tpu.memory_space<vmem>>, vector<8x256xf32>
    tpu.vector_store %arg10[%c64_65, %c0_66], %81 {strides = array<i32>} : memref<216x256xf32, #tpu.memory_space<vmem>>, vector<8x256xf32>,
    %c0_67 = arith.constant 0 : index
    %c119 = arith.constant 119 : index
    %83 = vector.load %arg9[%c0_67, %c119] : memref<8x512xf32, #tpu.memory_space<vmem>>, vector<8x256xf32>
    %c2_68 = arith.constant 2 : index
    %c0_69 = arith.constant 0 : index
    %84 = vector.load %arg1[%c2_68, %c0_69] : memref<8x256xf32, #tpu.memory_space<vmem>>, vector<1x256xf32>
    %c0_70 = arith.constant 0 : index
    %c0_71 = arith.constant 0 : index
    %85 = vector.load %arg1[%c0_70, %c0_71] : memref<8x256xf32, #tpu.memory_space<vmem>>, vector<1x256xf32>
    %86 = arith.mulf %84, %85 : vector<1x256xf32>
    %87 = vector.broadcast %86 : vector<1x256xf32> to vector<8x256xf32>
    %88 = arith.mulf %83, %87 : vector<8x256xf32>
    %c72_72 = arith.constant 72 : index
    %c0_73 = arith.constant 0 : index
    %89 = vector.load %arg10[%c72_72, %c0_73] : memref<216x256xf32, #tpu.memory_space<vmem>>, vector<8x256xf32>
    tpu.vector_store %arg10[%c72_72, %c0_73], %88 {strides = array<i32>} : memref<216x256xf32, #tpu.memory_space<vmem>>, vector<8x256xf32>,
    %c0_74 = arith.constant 0 : index
    %c120 = arith.constant 120 : index
    %90 = vector.load %arg9[%c0_74, %c120] : memref<8x512xf32, #tpu.memory_space<vmem>>, vector<8x256xf32>
    %c2_75 = arith.constant 2 : index
    %c0_76 = arith.constant 0 : index
    %91 = vector.load %arg1[%c2_75, %c0_76] : memref<8x256xf32, #tpu.memory_space<vmem>>, vector<1x256xf32>
    %92 = vector.broadcast %91 : vector<1x256xf32> to vector<8x256xf32>
    %93 = arith.mulf %90, %92 : vector<8x256xf32>
    %c80 = arith.constant 80 : index
    %c0_77 = arith.constant 0 : index
    %94 = vector.load %arg10[%c80, %c0_77] : memref<216x256xf32, #tpu.memory_space<vmem>>, vector<8x256xf32>
    tpu.vector_store %arg10[%c80, %c0_77], %93 {strides = array<i32>} : memref<216x256xf32, #tpu.memory_space<vmem>>, vector<8x256xf32>,
    %c0_78 = arith.constant 0 : index
    %c121 = arith.constant 121 : index
    %95 = vector.load %arg9[%c0_78, %c121] : memref<8x512xf32, #tpu.memory_space<vmem>>, vector<8x256xf32>
    %c2_79 = arith.constant 2 : index
    %c0_80 = arith.constant 0 : index
    %96 = vector.load %arg1[%c2_79, %c0_80] : memref<8x256xf32, #tpu.memory_space<vmem>>, vector<1x256xf32>
    %c1_81 = arith.constant 1 : index
    %c0_82 = arith.constant 0 : index
    %97 = vector.load %arg1[%c1_81, %c0_82] : memref<8x256xf32, #tpu.memory_space<vmem>>, vector<1x256xf32>
    %98 = arith.mulf %96, %97 : vector<1x256xf32>
    %99 = vector.broadcast %98 : vector<1x256xf32> to vector<8x256xf32>
    %100 = arith.mulf %95, %99 : vector<8x256xf32>
    %c88 = arith.constant 88 : index
    %c0_83 = arith.constant 0 : index
    %101 = vector.load %arg10[%c88, %c0_83] : memref<216x256xf32, #tpu.memory_space<vmem>>, vector<8x256xf32>
    tpu.vector_store %arg10[%c88, %c0_83], %100 {strides = array<i32>} : memref<216x256xf32, #tpu.memory_space<vmem>>, vector<8x256xf32>,
    %c0_84 = arith.constant 0 : index
    %c127 = arith.constant 127 : index
    %102 = vector.load %arg9[%c0_84, %c127] : memref<8x512xf32, #tpu.memory_space<vmem>>, vector<8x256xf32>
    %c0_85 = arith.constant 0 : index
    %c0_86 = arith.constant 0 : index
    %103 = vector.load %arg1[%c0_85, %c0_86] : memref<8x256xf32, #tpu.memory_space<vmem>>, vector<1x256xf32>
    %104 = vector.broadcast %103 : vector<1x256xf32> to vector<8x256xf32>
    %105 = arith.mulf %102, %104 : vector<8x256xf32>
    %c96 = arith.constant 96 : index
    %c0_87 = arith.constant 0 : index
    %106 = vector.load %arg10[%c96, %c0_87] : memref<216x256xf32, #tpu.memory_space<vmem>>, vector<8x256xf32>
    tpu.vector_store %arg10[%c96, %c0_87], %105 {strides = array<i32>} : memref<216x256xf32, #tpu.memory_space<vmem>>, vector<8x256xf32>,
    %c0_88 = arith.constant 0 : index
    %c128 = arith.constant 128 : index
    %107 = vector.load %arg9[%c0_88, %c128] : memref<8x512xf32, #tpu.memory_space<vmem>>, vector<8x256xf32>
    %c104 = arith.constant 104 : index
    %c0_89 = arith.constant 0 : index
    %108 = vector.load %arg10[%c104, %c0_89] : memref<216x256xf32, #tpu.memory_space<vmem>>, vector<8x256xf32>
    tpu.vector_store %arg10[%c104, %c0_89], %107 {strides = array<i32>} : memref<216x256xf32, #tpu.memory_space<vmem>>, vector<8x256xf32>,
    %c0_90 = arith.constant 0 : index
    %c129 = arith.constant 129 : index
    %109 = vector.load %arg9[%c0_90, %c129] : memref<8x512xf32, #tpu.memory_space<vmem>>, vector<8x256xf32>
    %c1_91 = arith.constant 1 : index
    %c0_92 = arith.constant 0 : index
    %110 = vector.load %arg1[%c1_91, %c0_92] : memref<8x256xf32, #tpu.memory_space<vmem>>, vector<1x256xf32>
    %111 = vector.broadcast %110 : vector<1x256xf32> to vector<8x256xf32>
    %112 = arith.mulf %109, %111 : vector<8x256xf32>
    %c112 = arith.constant 112 : index
    %c0_93 = arith.constant 0 : index
    %113 = vector.load %arg10[%c112, %c0_93] : memref<216x256xf32, #tpu.memory_space<vmem>>, vector<8x256xf32>
    tpu.vector_store %arg10[%c112, %c0_93], %112 {strides = array<i32>} : memref<216x256xf32, #tpu.memory_space<vmem>>, vector<8x256xf32>,
    %c0_94 = arith.constant 0 : index
    %c135 = arith.constant 135 : index
    %114 = vector.load %arg9[%c0_94, %c135] : memref<8x512xf32, #tpu.memory_space<vmem>>, vector<8x256xf32>
    %c3_95 = arith.constant 3 : index
    %c0_96 = arith.constant 0 : index
    %115 = vector.load %arg1[%c3_95, %c0_96] : memref<8x256xf32, #tpu.memory_space<vmem>>, vector<1x256xf32>
    %c0_97 = arith.constant 0 : index
    %c0_98 = arith.constant 0 : index
    %116 = vector.load %arg1[%c0_97, %c0_98] : memref<8x256xf32, #tpu.memory_space<vmem>>, vector<1x256xf32>
    %117 = arith.mulf %115, %116 : vector<1x256xf32>
    %118 = vector.broadcast %117 : vector<1x256xf32> to vector<8x256xf32>
    %119 = arith.mulf %114, %118 : vector<8x256xf32>
    %c120_99 = arith.constant 120 : index
    %c0_100 = arith.constant 0 : index
    %120 = vector.load %arg10[%c120_99, %c0_100] : memref<216x256xf32, #tpu.memory_space<vmem>>, vector<8x256xf32>
    tpu.vector_store %arg10[%c120_99, %c0_100], %119 {strides = array<i32>} : memref<216x256xf32, #tpu.memory_space<vmem>>, vector<8x256xf32>,
    %c0_101 = arith.constant 0 : index
    %c136 = arith.constant 136 : index
    %121 = vector.load %arg9[%c0_101, %c136] : memref<8x512xf32, #tpu.memory_space<vmem>>, vector<8x256xf32>
    %c3_102 = arith.constant 3 : index
    %c0_103 = arith.constant 0 : index
    %122 = vector.load %arg1[%c3_102, %c0_103] : memref<8x256xf32, #tpu.memory_space<vmem>>, vector<1x256xf32>
    %123 = vector.broadcast %122 : vector<1x256xf32> to vector<8x256xf32>
    %124 = arith.mulf %121, %123 : vector<8x256xf32>
    %c128_104 = arith.constant 128 : index
    %c0_105 = arith.constant 0 : index
    %125 = vector.load %arg10[%c128_104, %c0_105] : memref<216x256xf32, #tpu.memory_space<vmem>>, vector<8x256xf32>
    tpu.vector_store %arg10[%c128_104, %c0_105], %124 {strides = array<i32>} : memref<216x256xf32, #tpu.memory_space<vmem>>, vector<8x256xf32>,
    %c0_106 = arith.constant 0 : index
    %c137 = arith.constant 137 : index
    %126 = vector.load %arg9[%c0_106, %c137] : memref<8x512xf32, #tpu.memory_space<vmem>>, vector<8x256xf32>
    %c3_107 = arith.constant 3 : index
    %c0_108 = arith.constant 0 : index
    %127 = vector.load %arg1[%c3_107, %c0_108] : memref<8x256xf32, #tpu.memory_space<vmem>>, vector<1x256xf32>
    %c1_109 = arith.constant 1 : index
    %c0_110 = arith.constant 0 : index
    %128 = vector.load %arg1[%c1_109, %c0_110] : memref<8x256xf32, #tpu.memory_space<vmem>>, vector<1x256xf32>
    %129 = arith.mulf %127, %128 : vector<1x256xf32>
    %130 = vector.broadcast %129 : vector<1x256xf32> to vector<8x256xf32>
    %131 = arith.mulf %126, %130 : vector<8x256xf32>
    %c136_111 = arith.constant 136 : index
    %c0_112 = arith.constant 0 : index
    %132 = vector.load %arg10[%c136_111, %c0_112] : memref<216x256xf32, #tpu.memory_space<vmem>>, vector<8x256xf32>
    tpu.vector_store %arg10[%c136_111, %c0_112], %131 {strides = array<i32>} : memref<216x256xf32, #tpu.memory_space<vmem>>, vector<8x256xf32>,
    %c0_113 = arith.constant 0 : index
    %c183 = arith.constant 183 : index
    %133 = vector.load %arg9[%c0_113, %c183] : memref<8x512xf32, #tpu.memory_space<vmem>>, vector<8x256xf32>
    %c5 = arith.constant 5 : index
    %c0_114 = arith.constant 0 : index
    %134 = vector.load %arg1[%c5, %c0_114] : memref<8x256xf32, #tpu.memory_space<vmem>>, vector<1x256xf32>
    %c2_115 = arith.constant 2 : index
    %c0_116 = arith.constant 0 : index
    %135 = vector.load %arg1[%c2_115, %c0_116] : memref<8x256xf32, #tpu.memory_space<vmem>>, vector<1x256xf32>
    %136 = arith.mulf %134, %135 : vector<1x256xf32>
    %c0_117 = arith.constant 0 : index
    %c0_118 = arith.constant 0 : index
    %137 = vector.load %arg1[%c0_117, %c0_118] : memref<8x256xf32, #tpu.memory_space<vmem>>, vector<1x256xf32>
    %138 = arith.mulf %136, %137 : vector<1x256xf32>
    %139 = vector.broadcast %138 : vector<1x256xf32> to vector<8x256xf32>
    %140 = arith.mulf %133, %139 : vector<8x256xf32>
    %c144 = arith.constant 144 : index
    %c0_119 = arith.constant 0 : index
    %141 = vector.load %arg10[%c144, %c0_119] : memref<216x256xf32, #tpu.memory_space<vmem>>, vector<8x256xf32>
    tpu.vector_store %arg10[%c144, %c0_119], %140 {strides = array<i32>} : memref<216x256xf32, #tpu.memory_space<vmem>>, vector<8x256xf32>,
    %c0_120 = arith.constant 0 : index
    %c184 = arith.constant 184 : index
    %142 = vector.load %arg9[%c0_120, %c184] : memref<8x512xf32, #tpu.memory_space<vmem>>, vector<8x256xf32>
    %c5_121 = arith.constant 5 : index
    %c0_122 = arith.constant 0 : index
    %143 = vector.load %arg1[%c5_121, %c0_122] : memref<8x256xf32, #tpu.memory_space<vmem>>, vector<1x256xf32>
    %c2_123 = arith.constant 2 : index
    %c0_124 = arith.constant 0 : index
    %144 = vector.load %arg1[%c2_123, %c0_124] : memref<8x256xf32, #tpu.memory_space<vmem>>, vector<1x256xf32>
    %145 = arith.mulf %143, %144 : vector<1x256xf32>
    %146 = vector.broadcast %145 : vector<1x256xf32> to vector<8x256xf32>
    %147 = arith.mulf %142, %146 : vector<8x256xf32>
    %c152 = arith.constant 152 : index
    %c0_125 = arith.constant 0 : index
    %148 = vector.load %arg10[%c152, %c0_125] : memref<216x256xf32, #tpu.memory_space<vmem>>, vector<8x256xf32>
    tpu.vector_store %arg10[%c152, %c0_125], %147 {strides = array<i32>} : memref<216x256xf32, #tpu.memory_space<vmem>>, vector<8x256xf32>,
    %c0_126 = arith.constant 0 : index
    %c185 = arith.constant 185 : index
    %149 = vector.load %arg9[%c0_126, %c185] : memref<8x512xf32, #tpu.memory_space<vmem>>, vector<8x256xf32>
    %c5_127 = arith.constant 5 : index
    %c0_128 = arith.constant 0 : index
    %150 = vector.load %arg1[%c5_127, %c0_128] : memref<8x256xf32, #tpu.memory_space<vmem>>, vector<1x256xf32>
    %c2_129 = arith.constant 2 : index
    %c0_130 = arith.constant 0 : index
    %151 = vector.load %arg1[%c2_129, %c0_130] : memref<8x256xf32, #tpu.memory_space<vmem>>, vector<1x256xf32>
    %152 = arith.mulf %150, %151 : vector<1x256xf32>
    %c1_131 = arith.constant 1 : index
    %c0_132 = arith.constant 0 : index
    %153 = vector.load %arg1[%c1_131, %c0_132] : memref<8x256xf32, #tpu.memory_space<vmem>>, vector<1x256xf32>
    %154 = arith.mulf %152, %153 : vector<1x256xf32>
    %155 = vector.broadcast %154 : vector<1x256xf32> to vector<8x256xf32>
    %156 = arith.mulf %149, %155 : vector<8x256xf32>
    %c160 = arith.constant 160 : index
    %c0_133 = arith.constant 0 : index
    %157 = vector.load %arg10[%c160, %c0_133] : memref<216x256xf32, #tpu.memory_space<vmem>>, vector<8x256xf32>
    tpu.vector_store %arg10[%c160, %c0_133], %156 {strides = array<i32>} : memref<216x256xf32, #tpu.memory_space<vmem>>, vector<8x256xf32>,
    %c0_134 = arith.constant 0 : index
    %c191 = arith.constant 191 : index
    %158 = vector.load %arg9[%c0_134, %c191] : memref<8x512xf32, #tpu.memory_space<vmem>>, vector<8x256xf32>
    %c5_135 = arith.constant 5 : index
    %c0_136 = arith.constant 0 : index
    %159 = vector.load %arg1[%c5_135, %c0_136] : memref<8x256xf32, #tpu.memory_space<vmem>>, vector<1x256xf32>
    %c0_137 = arith.constant 0 : index
    %c0_138 = arith.constant 0 : index
    %160 = vector.load %arg1[%c0_137, %c0_138] : memref<8x256xf32, #tpu.memory_space<vmem>>, vector<1x256xf32>
    %161 = arith.mulf %159, %160 : vector<1x256xf32>
    %162 = vector.broadcast %161 : vector<1x256xf32> to vector<8x256xf32>
    %163 = arith.mulf %158, %162 : vector<8x256xf32>
    %c168 = arith.constant 168 : index
    %c0_139 = arith.constant 0 : index
    %164 = vector.load %arg10[%c168, %c0_139] : memref<216x256xf32, #tpu.memory_space<vmem>>, vector<8x256xf32>
    tpu.vector_store %arg10[%c168, %c0_139], %163 {strides = array<i32>} : memref<216x256xf32, #tpu.memory_space<vmem>>, vector<8x256xf32>,
    %c0_140 = arith.constant 0 : index
    %c192 = arith.constant 192 : index
    %165 = vector.load %arg9[%c0_140, %c192] : memref<8x512xf32, #tpu.memory_space<vmem>>, vector<8x256xf32>
    %c5_141 = arith.constant 5 : index
    %c0_142 = arith.constant 0 : index
    %166 = vector.load %arg1[%c5_141, %c0_142] : memref<8x256xf32, #tpu.memory_space<vmem>>, vector<1x256xf32>
    %167 = vector.broadcast %166 : vector<1x256xf32> to vector<8x256xf32>
    %168 = arith.mulf %165, %167 : vector<8x256xf32>
    %c176 = arith.constant 176 : index
    %c0_143 = arith.constant 0 : index
    %169 = vector.load %arg10[%c176, %c0_143] : memref<216x256xf32, #tpu.memory_space<vmem>>, vector<8x256xf32>
    tpu.vector_store %arg10[%c176, %c0_143], %168 {strides = array<i32>} : memref<216x256xf32, #tpu.memory_space<vmem>>, vector<8x256xf32>,
    %c0_144 = arith.constant 0 : index
    %c193 = arith.constant 193 : index
    %170 = vector.load %arg9[%c0_144, %c193] : memref<8x512xf32, #tpu.memory_space<vmem>>, vector<8x256xf32>
    %c5_145 = arith.constant 5 : index
    %c0_146 = arith.constant 0 : index
    %171 = vector.load %arg1[%c5_145, %c0_146] : memref<8x256xf32, #tpu.memory_space<vmem>>, vector<1x256xf32>
    %c1_147 = arith.constant 1 : index
    %c0_148 = arith.constant 0 : index
    %172 = vector.load %arg1[%c1_147, %c0_148] : memref<8x256xf32, #tpu.memory_space<vmem>>, vector<1x256xf32>
    %173 = arith.mulf %171, %172 : vector<1x256xf32>
    %174 = vector.broadcast %173 : vector<1x256xf32> to vector<8x256xf32>
    %175 = arith.mulf %170, %174 : vector<8x256xf32>
    %c184_149 = arith.constant 184 : index
    %c0_150 = arith.constant 0 : index
    %176 = vector.load %arg10[%c184_149, %c0_150] : memref<216x256xf32, #tpu.memory_space<vmem>>, vector<8x256xf32>
    tpu.vector_store %arg10[%c184_149, %c0_150], %175 {strides = array<i32>} : memref<216x256xf32, #tpu.memory_space<vmem>>, vector<8x256xf32>,
    %c0_151 = arith.constant 0 : index
    %c199 = arith.constant 199 : index
    %177 = vector.load %arg9[%c0_151, %c199] : memref<8x512xf32, #tpu.memory_space<vmem>>, vector<8x256xf32>
    %c5_152 = arith.constant 5 : index
    %c0_153 = arith.constant 0 : index
    %178 = vector.load %arg1[%c5_152, %c0_153] : memref<8x256xf32, #tpu.memory_space<vmem>>, vector<1x256xf32>
    %c3_154 = arith.constant 3 : index
    %c0_155 = arith.constant 0 : index
    %179 = vector.load %arg1[%c3_154, %c0_155] : memref<8x256xf32, #tpu.memory_space<vmem>>, vector<1x256xf32>
    %180 = arith.mulf %178, %179 : vector<1x256xf32>
    %c0_156 = arith.constant 0 : index
    %c0_157 = arith.constant 0 : index
    %181 = vector.load %arg1[%c0_156, %c0_157] : memref<8x256xf32, #tpu.memory_space<vmem>>, vector<1x256xf32>
    %182 = arith.mulf %180, %181 : vector<1x256xf32>
    %183 = vector.broadcast %182 : vector<1x256xf32> to vector<8x256xf32>
    %184 = arith.mulf %177, %183 : vector<8x256xf32>
    %c192_158 = arith.constant 192 : index
    %c0_159 = arith.constant 0 : index
    %185 = vector.load %arg10[%c192_158, %c0_159] : memref<216x256xf32, #tpu.memory_space<vmem>>, vector<8x256xf32>
    tpu.vector_store %arg10[%c192_158, %c0_159], %184 {strides = array<i32>} : memref<216x256xf32, #tpu.memory_space<vmem>>, vector<8x256xf32>,
    %c0_160 = arith.constant 0 : index
    %c200 = arith.constant 200 : index
    %186 = vector.load %arg9[%c0_160, %c200] : memref<8x512xf32, #tpu.memory_space<vmem>>, vector<8x256xf32>
    %c5_161 = arith.constant 5 : index
    %c0_162 = arith.constant 0 : index
    %187 = vector.load %arg1[%c5_161, %c0_162] : memref<8x256xf32, #tpu.memory_space<vmem>>, vector<1x256xf32>
    %c3_163 = arith.constant 3 : index
    %c0_164 = arith.constant 0 : index
    %188 = vector.load %arg1[%c3_163, %c0_164] : memref<8x256xf32, #tpu.memory_space<vmem>>, vector<1x256xf32>
    %189 = arith.mulf %187, %188 : vector<1x256xf32>
    %190 = vector.broadcast %189 : vector<1x256xf32> to vector<8x256xf32>
    %191 = arith.mulf %186, %190 : vector<8x256xf32>
    %c200_165 = arith.constant 200 : index
    %c0_166 = arith.constant 0 : index
    %192 = vector.load %arg10[%c200_165, %c0_166] : memref<216x256xf32, #tpu.memory_space<vmem>>, vector<8x256xf32>
    tpu.vector_store %arg10[%c200_165, %c0_166], %191 {strides = array<i32>} : memref<216x256xf32, #tpu.memory_space<vmem>>, vector<8x256xf32>,
    %c0_167 = arith.constant 0 : index
    %c201 = arith.constant 201 : index
    %193 = vector.load %arg9[%c0_167, %c201] : memref<8x512xf32, #tpu.memory_space<vmem>>, vector<8x256xf32>
    %c5_168 = arith.constant 5 : index
    %c0_169 = arith.constant 0 : index
    %194 = vector.load %arg1[%c5_168, %c0_169] : memref<8x256xf32, #tpu.memory_space<vmem>>, vector<1x256xf32>
    %c3_170 = arith.constant 3 : index
    %c0_171 = arith.constant 0 : index
    %195 = vector.load %arg1[%c3_170, %c0_171] : memref<8x256xf32, #tpu.memory_space<vmem>>, vector<1x256xf32>
    %196 = arith.mulf %194, %195 : vector<1x256xf32>
    %c1_172 = arith.constant 1 : index
    %c0_173 = arith.constant 0 : index
    %197 = vector.load %arg1[%c1_172, %c0_173] : memref<8x256xf32, #tpu.memory_space<vmem>>, vector<1x256xf32>
    %198 = arith.mulf %196, %197 : vector<1x256xf32>
    %199 = vector.broadcast %198 : vector<1x256xf32> to vector<8x256xf32>
    %200 = arith.mulf %193, %199 : vector<8x256xf32>
    %c208 = arith.constant 208 : index
    %c0_174 = arith.constant 0 : index
    %201 = vector.load %arg10[%c208, %c0_174] : memref<216x256xf32, #tpu.memory_space<vmem>>, vector<8x256xf32>
    tpu.vector_store %arg10[%c208, %c0_174], %200 {strides = array<i32>} : memref<216x256xf32, #tpu.memory_space<vmem>>, vector<8x256xf32>,
    %c0_175 = arith.constant 0 : index
    %c0_176 = arith.constant 0 : index
    %202 = vector.load %arg2[%c0_175, %c0_176] : memref<8x216xf32, #tpu.memory_space<vmem>>, vector<8x216xf32>
    %c0_177 = arith.constant 0 : index
    %c0_178 = arith.constant 0 : index
    %203 = vector.load %arg10[%c0_177, %c0_178] : memref<216x256xf32, #tpu.memory_space<vmem>>, vector<216x256xf32>
    %cst_179 = arith.constant dense<0.000000e+00> : vector<8x256xf32>
    %204 = tpu.matmul %202, %203, %cst_179 {dimension_numbers = #tpu.dot_dimension_numbers<[1], [0], [0], [1], [0, 0, 1, 1], [], []>} : vector<8x216xf32>, vector<216x256xf32>, vector<8x256xf32> -> vector<8x256xf32>
    %c0_180 = arith.constant 0 : index
    %c0_181 = arith.constant 0 : index
    %205 = vector.load %arg6[%c0_180, %c0_181] : memref<8x256xf32, #tpu.memory_space<vmem>>, vector<8x256xf32>
    tpu.vector_store %arg6[%c0_180, %c0_181], %204 {strides = array<i32>} : memref<8x256xf32, #tpu.memory_space<vmem>>, vector<8x256xf32>,
    %c6 = arith.constant 6 : index
    %c0_182 = arith.constant 0 : index
    %206 = vector.load %arg1[%c6, %c0_182] : memref<8x256xf32, #tpu.memory_space<vmem>>, vector<1x256xf32>
    %207 = vector.broadcast %206 : vector<1x256xf32> to vector<8x256xf32>
    %208 = arith.mulf %204, %207 : vector<8x256xf32>
    %cst_183 = arith.constant dense<0.000000e+00> : vector<8xf32>
    %209 = vector.multi_reduction <add>, %208, %cst_183 [1] : vector<8x256xf32> to vector<8xf32>
    %210 = vector.shape_cast %209 : vector<8xf32> to vector<8x1xf32>
    %211 = arith.mulf %208, %204 : vector<8x256xf32>
    %cst_184 = arith.constant dense<0.000000e+00> : vector<8xf32>
    %212 = vector.multi_reduction <add>, %211, %cst_184 [1] : vector<8x256xf32> to vector<8xf32>
    %213 = vector.shape_cast %212 : vector<8xf32> to vector<8x1xf32>
    %214 = tpu.concatenate %210, %213 in 0 : vector<8x1xf32>, vector<8x1xf32> -> vector<16x1xf32>
    %215 = vector.shape_cast %214 : vector<16x1xf32> to vector<1x16x1xf32>
    %c0_185 = arith.constant 0 : index
    %c0_186 = arith.constant 0 : index
    %c0_187 = arith.constant 0 : index
    %216 = vector.load %arg7[%c0_185, %c0_186, %c0_187] : memref<1x16x1xf32, #tpu.memory_space<vmem>>, vector<1x16x1xf32>
    tpu.vector_store %arg7[%c0_185, %c0_186, %c0_187], %215 {strides = array<i32>} : memref<1x16x1xf32, #tpu.memory_space<vmem>>, vector<1x16x1xf32>,
    return
  }
  func.func @transform_0(%arg0: i32) -> (i32, i32) {
    %c0_i32 = arith.constant 0 : i32
    %c0_i32_0 = arith.constant 0 : i32
    return %c0_i32, %arg0 : i32, i32
  }
  func.func @transform_1(%arg0: i32) -> (i32, i32) {
    %c0_i32 = arith.constant 0 : i32
    %c0_i32_0 = arith.constant 0 : i32
    %c0_i32_1 = arith.constant 0 : i32
    return %c0_i32, %c0_i32_0 : i32, i32
  }
  func.func @transform_2(%arg0: i32) -> (i32, i32) {
    %c0_i32 = arith.constant 0 : i32
    %c0_i32_0 = arith.constant 0 : i32
    %c0_i32_1 = arith.constant 0 : i32
    return %c0_i32, %c0_i32_0 : i32, i32
  }
  func.func @transform_3(%arg0: i32) -> (i32, i32) {
    %c0_i32 = arith.constant 0 : i32
    %c0_i32_0 = arith.constant 0 : i32
    %c0_i32_1 = arith.constant 0 : i32
    return %c0_i32, %c0_i32_0 : i32, i32
  }
  func.func @transform_5(%arg0: i32) -> (i32, i32) {
    %c0_i32 = arith.constant 0 : i32
    %c0_i32_0 = arith.constant 0 : i32
    return %c0_i32, %arg0 : i32, i32
  }
  func.func @transform_6(%arg0: i32) -> (i32, i32, i32) {
    %c0_i32 = arith.constant 0 : i32
    %c0_i32_0 = arith.constant 0 : i32
    %c0_i32_1 = arith.constant 0 : i32
    return %arg0, %c0_i32, %c0_i32_0 : i32, i32, i32
  }
}

</mosaic_0001>

<bundles_post_ra>
// kernel: residual3d_forward.5
= control target key start
LH: loop header
LB: loop body
LE: loop exit
PB: predicated region body
PF: predicated region fallthrough
CT: control target
= control target key end

     0   :  { %v91_v0 = vmov 0   ;;  %s195_s2 = inlined_call_operand.vmem [shape: f32[8,1], index: 2, kind: input, shape index: {}]   ;;  %s196_s3 = inlined_call_operand.vmem [shape: f32[8,1], index: 3, kind: input, shape index: {}]   ;;  %s197_s0 = inlined_call_operand.vmem [shape: f32[8,1024], index: 0, kind: input, shape index: {}]   ;;  %s198_s1 = inlined_call_operand.vmem [shape: f32[8,1024], index: 1, kind: input, shape index: {}]   ;;  %s199_s4 = inlined_call_operand.vmem [shape: f32[8,1024], index: 4, kind: output, shape index: {}]  }
   0x1   :  { %90 = vset.pattern.permute.xlu0 %v91_v0  ;;  %v25_v1 = vld [vmem:[%s195_s2] sm:$0xff]  ;;  %v18_v4 = vld [vmem:[%s197_s0 + $0x8] sm:$0xff]  ;;  %v19_v6 = vld [vmem:[%s197_s0 + $0x10] sm:$0xff] }
   0x2   :  { %28 = vperm.xlu0 %90, %v25_v1   ;;  %v39_v2 = vld [vmem:[%s196_s3] sm:$0xff]  ;;  %v20_v7 = vld [vmem:[%s197_s0 + $0x18] sm:$0xff]  ;;  %v22_v9 = vld [vmem:[%s197_s0 + $0x28] sm:$0xff] }
   0x3   :  { %v17_v3 = vld [vmem:[%s197_s0] sm:$0xff]  ;;  %v23_v10 = vld [vmem:[%s197_s0 + $0x30] sm:$0xff]  ;;  %v24_v11 = vld [vmem:[%s197_s0 + $0x38] sm:$0xff] }
   0x4   :  { %v21_v8 = vld [vmem:[%s197_s0 + $0x20] sm:$0xff]  ;;  %v54_v17 = vld [vmem:[%s198_s1 + $0x8] sm:$0xff]  ;;  %v55_v23 = vld [vmem:[%s198_s1 + $0x10] sm:$0xff] }
   0x5   :  { %v53_v16 = vld [vmem:[%s198_s1] sm:$0xff]  ;;  %v56_v24 = vld [vmem:[%s198_s1 + $0x18] sm:$0xff]  ;;  %v58_v30 = vld [vmem:[%s198_s1 + $0x28] sm:$0xff] }
   0x6   :  { %42 = vperm.xlu0 %90, %v39_v2   ;;  %v57_v25 = vld [vmem:[%s198_s1 + $0x20] sm:$0xff]  ;;  %v59_v31 = vld [vmem:[%s198_s1 + $0x30] sm:$0xff]  ;;  %v60_v32 = vld [vmem:[%s198_s1 + $0x38] sm:$0xff] }
  0x81   :  { %v29_v5 = vpop.permute.xlu0 %28 }
  0x82   :  { %v31_v12 = vmul.f32 %v29_v5, %v17_v3  ;;  %v32_v13 = vmul.f32 %v29_v5, %v18_v4  ;;  %v33_v14 = vmul.f32 %v29_v5, %v19_v6  ;;  %v34_v15 = vmul.f32 %v29_v5, %v20_v7 }
  0x83   :  { %v35_v19 = vmul.f32 %v29_v5, %v21_v8  ;;  %v36_v20 = vmul.f32 %v29_v5, %v22_v9  ;;  %v37_v21 = vmul.f32 %v29_v5, %v23_v10  ;;  %v38_v22 = vmul.f32 %v29_v5, %v24_v11 }
  0x85   :  { %v43_v18 = vpop.permute.xlu0 %42 }
  0x86   :  { %v45_v26 = vadd.f32 %v43_v18, %v31_v12  ;;  %v46_v27 = vadd.f32 %v43_v18, %v32_v13  ;;  %v47_v28 = vadd.f32 %v43_v18, %v33_v14  ;;  %v48_v29 = vadd.f32 %v43_v18, %v34_v15 }
  0x87   :  { %v49_v33 = vadd.f32 %v43_v18, %v35_v19  ;;  %v50_v34 = vadd.f32 %v43_v18, %v36_v20  ;;  %v51_v35 = vadd.f32 %v43_v18, %v37_v21  ;;  %v52_v36 = vadd.f32 %v43_v18, %v38_v22 }
  0x88   :  { %v61_v37 = vadd.f32 %v53_v16, %v45_v26  ;;  %v62_v38 = vadd.f32 %v54_v17, %v46_v27  ;;  %v63_v39 = vadd.f32 %v55_v23, %v47_v28  ;;  %v64_v40 = vadd.f32 %v56_v24, %v48_v29 }
  0x89   :  { %v65_v41 = vadd.f32 %v57_v25, %v49_v33  ;;  %v66_v42 = vadd.f32 %v58_v30, %v50_v34  ;;  %v67_v43 = vadd.f32 %v59_v31, %v51_v35  ;;  %v68_v44 = vadd.f32 %v60_v32, %v52_v36 }
  0x8a   :  { %v69_v45 = vmax.f32 %v61_v37, 0.0  ;;  %v70_v46 = vmax.f32 %v62_v38, 0.0  ;;  %v71_v47 = vmax.f32 %v63_v39, 0.0  ;;  %v72_v48 = vmax.f32 %v64_v40, 0.0 }
  0x8b   :  { %v73_v49 = vmax.f32 %v65_v41, 0.0  ;;  %v74_v50 = vmax.f32 %v66_v42, 0.0  ;;  %v75_v51 = vmax.f32 %v67_v43, 0.0  ;;  %v76_v52 = vmax.f32 %v68_v44, 0.0 }
  0x8c   :  { %77 = vst [vmem:[%s199_s4] sm:$0xff] %v69_v45  ;;  %78 = vst [vmem:[%s199_s4 + $0x8] sm:$0xff] %v70_v46 }
  0x8d   :  { %79 = vst [vmem:[%s199_s4 + $0x10] sm:$0xff] %v71_v47  ;;  %80 = vst [vmem:[%s199_s4 + $0x18] sm:$0xff] %v72_v48 }
  0x8e   :  { %81 = vst [vmem:[%s199_s4 + $0x20] sm:$0xff] %v73_v49  ;;  %82 = vst [vmem:[%s199_s4 + $0x28] sm:$0xff] %v74_v50 }
  0x8f   :  { %83 = vst [vmem:[%s199_s4 + $0x30] sm:$0xff] %v75_v51  ;;  %84 = vst [vmem:[%s199_s4 + $0x38] sm:$0xff] %v76_v52 }

// kernel: residual3d_forward.3
= control target key start
LH: loop header
LB: loop body
LE: loop exit
PB: predicated region body
PF: predicated region fallthrough
CT: control target
= control target key end

     0   :  { %s1986_s21 = smov 0   ;;  %s2411_s0 = inlined_call_operand.vmem [shape: f32[8,1024], index: 0, kind: input, shape index: {}]   ;;  %s2412_s1 = inlined_call_operand.vmem [shape: f32[8,216], index: 1, kind: input, shape index: {}]   ;;  %s2413_s2 = inlined_call_operand.vmem [shape: f32[8,1], index: 2, kind: input, shape index: {}]   ;;  %s2414_s3 = inlined_call_operand.vmem [shape: f32[8,1], index: 3, kind: input, shape index: {}]   ;;  %s2415_s4 = inlined_call_operand.vmem [shape: f32[8,1280], index: 4, kind: input, shape index: {}]   ;;  %s2416_s5 = inlined_call_operand.vmem [shape: f32[8,1024], index: 5, kind: output, shape index: {0}]   ;;  %s2417_s6 = inlined_call_operand.vmem [shape: f32[4,16,1], index: 6, kind: output, shape index: {1}]  }
   0x1 LB: > { %s1658_s2 = sadd.s32 4294967295, %s1932_s21   ;;  %p1662_p0 = scmp.ge.s32.totalorder %s1932_s21, 1  ;;  %s1932_s21 = sphi %s1986_s21, %s17_s21  }
   0x2   : > { %p192_p1 = scmp.lt.s32.totalorder %s1932_s21, 5 }
   0x4   : > { %p193_p2 = pnand %p1662_p0, %p192_p1 }
   0x5   : > { %s1663_s3 = sshll.u32 (!%p193_p2), %s1658_s2, 1  ;;  %p237_p3 = scmp.lt.s32.totalorder (!%p193_p2), %s1658_s2, 3 }
   0x6   : > { %196 = sbr.rel (%p193_p2) target bundleno = 743 (0x2e7), region = 36  ;;  %p226_p4 = scmp.lt.s32.totalorder (!%p193_p2), %s1663_s3, 7 }
   0x7   : > { %s1669_s22 = sshll.u32 (!%p193_p2), %s1658_s2, 8 }
   0x8   : > { %s243_s24 = sshra.s32 (!%p193_p2), %s1669_s22, 7 }
   0x9   : > { %s1670_s11 = sshll.u32 (!%p193_p2), %s243_s24, 3 }
   0xa   : > { %s246_s14 = scalar_lea.vmem (!%p193_p2), %s2415_s4, %s1670_s11 }
   0xb   : > { %v2012_v0 = vld [vmem:[%s246_s14] sm:$0xff] (!%p193_p2)  ;;  %v2014_v1 = vld [vmem:[%s246_s14 + $0x8] sm:$0xff] (!%p193_p2)  ;;  %v2016_v2 = vld [vmem:[%s246_s14 + $0x10] sm:$0xff] (!%p193_p2) }
   0xc   : > { %v2018_v3 = vld [vmem:[%s246_s14 + $0x18] sm:$0xff] (!%p193_p2) }
   0xd   : > { %s2425_s2 = smov (!%p237_p3, %s1658_s2), 3  ;;  %s2427_s3 = smov (!%p226_p4, %s1663_s3), 7 }
   0xe   : > { %s1721_s23 = sshll.u32 %s2425_s2, 4  ;;  %s1664_s25 = sshll.u32 %s2427_s3, 3 }
   0xf   : > { %s1997_s28 = scalar_lea.vmem %s2417_s6, %s1721_s23  ;;  %s2002_s7 = scalar_lea.vmem %s2411_s0, %s1664_s25 }
  0x10   : > { %s2007_s10 = scalar_lea.vmem %s2416_s5, %s1664_s25 }
  0x11   : > { %294 = vsyncadd [#allocation4], 512 }
  0x12   : > { %1928 = dma.done.wait [#allocation4], 512 }
  0x13   : > { %1929 = vsyncadd [#allocation4], 4294966784  ;;  %v310_v4 = vlaneseq  ;;  %v1678_v8 = vld [vmem:[%s2002_s7 + $0x4] ss:$8 sm:$0x3]  ;;  %s1934_s15 = smov 63  }
  0x14   : > { %v439_v9 = vld [vmem:[%s2002_s7] ss:$8 sm:$0x3]  ;;  %v1673_v11 = vld [vmem:[%s2002_s7 + $0x4] ss:$8 sm:$0x3] }
  0x15   : > { %v311_v5 = vshrl.u32 %v310_v4, 7  ;;  %v440_v10 = vmul.f32 %v1678_v8, %v439_v9  ;;  %v1674_v12 = vld [vmem:[%s2002_s7 + $0x2] ss:$8 sm:$0x3]  ;;  %s1935_s16 = smov 56   ;;  %s1936_s17 = smov 55  }
  0x16   : > { %v351_v13 = vmul.f32 %v1674_v12, %v1673_v11  ;;  %v1671_v14 = vld [vmem:[%s2002_s7 + $0x4] ss:$8 sm:$0x3]  ;;  %v1672_v15 = vld [vmem:[%s2002_s7 + $0x2] ss:$8 sm:$0x3] }
  0x17   : > { %v2020_v6 = vsub.s32 0, %v311_v5  ;;  %v2022_v7 = vsub.s32 1, %v311_v5  ;;  %v306_v17 = vmul.f32 %v1672_v15, %v1671_v14  ;;  %v307_v18 = vld [vmem:[%s2002_s7] ss:$8 sm:$0x3]  ;;  %s1937_s18 = smov 57  }
  0x18   : > { %v1675_v19 = vld [vmem:[%s2002_s7 + $0x4] ss:$8 sm:$0x3]  ;;  %v1676_v21 = vld [vmem:[%s2002_s7 + $0x2] ss:$8 sm:$0x3] }
  0x19   : > { %v445_v16 = vrot.slane %v440_v10, %v2020_v6  ;;  %v356_v20 = vrot.slane %v351_v13, %v2020_v6  ;;  %v308_v22 = vmul.f32 %v307_v18, %v306_v17  ;;  %v394_v23 = vmul.f32 %v1676_v21, %v1675_v19  ;;  %v1677_v25 = vld [vmem:[%s2002_s7 + $0x1] ss:$8 sm:$0x3]  ;;  %v1679_v30 = vld [vmem:[%s2002_s7 + $0x4] ss:$8 sm:$0x3] }
  0x1a   : > { %v360_v24 = vrot.slane %v351_v13, %v2022_v7  ;;  %v449_v29 = vrot.slane %v440_v10, %v2022_v7  ;;  %v1680_v32 = vld [vmem:[%s2002_s7 + $0x4] ss:$8 sm:$0x3]  ;;  %v1681_v33 = vld [vmem:[%s2002_s7 + $0x1] ss:$8 sm:$0x3]  ;;  %v486_v37 = vrot.slane %v1679_v30, %v2020_v6  ;;  %v490_v40 = vrot.slane %v1679_v30, %v2022_v7 }
  0x1b   : > { %450 = vrot.lane.b32.xlu0 %v445_v16, %s1934_s15  ;;  %361 = vrot.lane.b32.xlu1 %v356_v20, %s1935_s16  ;;  %v313_v26 = vrot.slane %v308_v22, %v2020_v6  ;;  %v317_v27 = vrot.slane %v308_v22, %v2022_v7  ;;  %v397_v28 = vmul.f32 %v1677_v25, %v394_v23  ;;  %v1682_v35 = vld [vmem:[%s2002_s7 + $0x4] ss:$8 sm:$0x3]  ;;  %v1683_v36 = vld [vmem:[%s2002_s7 + $0x3] ss:$8 sm:$0x3] }
  0x1c   : > { %v523_v38 = vmul.f32 %v1681_v33, %v1680_v32  ;;  %v565_v39 = vmul.f32 %v1683_v36, %v1682_v35  ;;  %v566_v41 = vld [vmem:[%s2002_s7] ss:$8 sm:$0x3]  ;;  %s1938_s19 = smov 64   ;;  %s1939_s20 = smov 65   ;;  %vm365_vm0 = vcmask 457728  }
  0x1d   : > { %v402_v31 = vrot.slane %v397_v28, %v2020_v6  ;;  %v406_v34 = vrot.slane %v397_v28, %v2022_v7  ;;  %v1684_v44 = vld [vmem:[%s2002_s7 + $0x4] ss:$8 sm:$0x3]  ;;  %v1685_v45 = vld [vmem:[%s2002_s7 + $0x3] ss:$8 sm:$0x3] }
  0x1e   : > { %v528_v42 = vrot.slane %v523_v38, %v2020_v6  ;;  %v567_v43 = vmul.f32 %v566_v41, %v565_v39  ;;  %v532_v46 = vrot.slane %v523_v38, %v2022_v7  ;;  %v1686_v47 = vld [vmem:[%s2002_s7 + $0x4] ss:$8 sm:$0x3]  ;;  %v1687_v48 = vld [vmem:[%s2002_s7 + $0x3] ss:$8 sm:$0x3]  ;;  %v608_v50 = vmul.f32 %v1685_v45, %v1684_v44 }
  0x1f   : > { %318 = vrot.lane.b32.xlu0 %v313_v26, %s1936_s17  ;;  %363 = vrot.lane.b32.xlu1 %v360_v24, %s1935_s16  ;;  %v649_v51 = vmul.f32 %v1687_v48, %v1686_v47  ;;  %v1688_v53 = vld [vmem:[%s2002_s7 + $0x1] ss:$8 sm:$0x3]  ;;  %s1940_s2 = smov 71   ;;  %s1941_s3 = smov 72   ;;  %vm495_vm1 = vcmask 523264  }
  0x20   : > { %v572_v49 = vrot.slane %v567_v43, %v2020_v6  ;;  %v576_v52 = vrot.slane %v567_v43, %v2022_v7  ;;  %v613_v54 = vrot.slane %v608_v50, %v2020_v6  ;;  %v617_v56 = vrot.slane %v608_v50, %v2022_v7  ;;  %v1689_v57 = vld [vmem:[%s2002_s7 + $0x2] ss:$8 sm:$0x3]  ;;  %v691_v58 = vld [vmem:[%s2002_s7] ss:$8 sm:$0x3] }
  0x21   : > { %v651_v55 = vmul.f32 %v1688_v53, %v649_v51  ;;  %v692_v60 = vmul.f32 %v1689_v57, %v691_v58  ;;  %s1942_s22 = smov 73   ;;  %v1690_v63 = vld [vmem:[%s2002_s7 + $0x2] ss:$8 sm:$0x3]  ;;  %s1943_s23 = smov 119   ;;  %vm454_vm2 = vcmask 515072  }
  0x22   : > { %v1691_v5 = vld [vmem:[%s2002_s7 + $0x2] ss:$8 sm:$0x3]  ;;  %v1692_v8 = vld [vmem:[%s2002_s7 + $0x1] ss:$8 sm:$0x3]  ;;  %v738_v9 = vrot.slane %v1690_v63, %v2020_v6  ;;  %v742_v11 = vrot.slane %v1690_v63, %v2022_v7 }
  0x23   : > { %320 = vrot.lane.b32.xlu0 %v317_v27, %s1936_s17  ;;  %452 = vrot.lane.b32.xlu1 %v449_v29, %s1934_s15  ;;  %v656_v59 = vrot.slane %v651_v55, %v2020_v6  ;;  %v660_v61 = vrot.slane %v651_v55, %v2022_v7  ;;  %v697_v62 = vrot.slane %v692_v60, %v2020_v6  ;;  %s1944_s24 = smov 120   ;;  %v817_v14 = vld [vmem:[%s2002_s7] ss:$8 sm:$0x3]  ;;  %s1945_s25 = smov 121   ;;  %vm471_vm3 = vcmask 531456  }
  0x24   : > { %v701_v4 = vrot.slane %v692_v60, %v2022_v7  ;;  %v776_v10 = vmul.f32 %v1692_v8, %v1691_v5  ;;  %v822_v15 = vrot.slane %v817_v14, %v2020_v6  ;;  %v1693_v16 = vld [vmem:[%s2002_s7 + $0x1] ss:$8 sm:$0x3]  ;;  %v826_v17 = vrot.slane %v817_v14, %v2022_v7  ;;  %v1694_v18 = vld [vmem:[%s2002_s7 + $0x3] ss:$8 sm:$0x3] }
  0x25   : > { %v902_v19 = vld [vmem:[%s2002_s7] ss:$8 sm:$0x3]  ;;  %s1946_s26 = smov 127   ;;  %v867_v20 = vrot.slane %v1693_v16, %v2020_v6  ;;  %v871_v22 = vrot.slane %v1693_v16, %v2022_v7  ;;  %s1947_s27 = smov 1   ;;  %vm322_vm4 = vcmask 449536  }
  0x26   : > { %v781_v12 = vrot.slane %v776_v10, %v2020_v6  ;;  %v785_v13 = vrot.slane %v776_v10, %v2022_v7  ;;  %v903_v21 = vmul.f32 %v1694_v18, %v902_v19  ;;  %v1695_v23 = vld [vmem:[%s2002_s7 + $0x3] ss:$8 sm:$0x3]  ;;  %v1697_v26 = vld [vmem:[%s2002_s7 + $0x1] ss:$8 sm:$0x3] }
  0x27   : > { %407 = vrot.lane.b32.xlu0 %v402_v31, %s1937_s18  ;;  %409 = vrot.lane.b32.xlu1 %v406_v34, %s1937_s18  ;;  %v1696_v25 = vld [vmem:[%s2002_s7 + $0x3] ss:$8 sm:$0x3]  ;;  %v1698_v28 = vld [vmem:[%s2002_s7 + $0x5] ss:$8 sm:$0x3]  ;;  %v947_v30 = vrot.slane %v1695_v23, %v2020_v6  ;;  %v951_v33 = vrot.slane %v1695_v23, %v2022_v7 }
  0x28   : > { %v908_v24 = vrot.slane %v903_v21, %v2020_v6  ;;  %v912_v27 = vrot.slane %v903_v21, %v2022_v7  ;;  %v1699_v29 = vld [vmem:[%s2002_s7 + $0x2] ss:$8 sm:$0x3]  ;;  %s1948_s29 = smov 7   ;;  %v983_v31 = vmul.f32 %v1697_v26, %v1696_v25  ;;  %s1949_s30 = smov 8   ;;  %vm382_vm5 = vcmask 588800  }
  0x29   : > { %v1025_v32 = vmul.f32 %v1699_v29, %v1698_v28  ;;  %v1026_v34 = vld [vmem:[%s2002_s7] ss:$8 sm:$0x3]  ;;  %v1701_v38 = vld [vmem:[%s2002_s7 + $0x2] ss:$8 sm:$0x3] }
  0x2a   : > { %v988_v35 = vrot.slane %v983_v31, %v2020_v6  ;;  %v992_v39 = vrot.slane %v983_v31, %v2022_v7  ;;  %v1703_v41 = vld [vmem:[%s2002_s7 + $0x2] ss:$8 sm:$0x3]  ;;  %s1950_s8 = smov 9   ;;  %vm411_vm6 = vcmask 465920   ;;  %vm428_vm7 = vcmask 580608  }
  0x2b   : > { %491 = vrot.lane.b32.xlu0 %v486_v37, %s1938_s19  ;;  %493 = vrot.lane.b32.xlu1 %v490_v40, %s1938_s19  ;;  %v1027_v36 = vmul.f32 %v1026_v34, %v1025_v32  ;;  %v1700_v37 = vld [vmem:[%s2002_s7 + $0x5] ss:$8 sm:$0x3]  ;;  %v1151_v51 = vld [vmem:[%s2002_s7] ss:$8 sm:$0x3] }
  0x2c   : > { %v1702_v40 = vld [vmem:[%s2002_s7 + $0x5] ss:$8 sm:$0x3]  ;;  %v1068_v43 = vmul.f32 %v1701_v38, %v1700_v37  ;;  %v1708_v58 = vld [vmem:[%s2002_s7 + $0x1] ss:$8 sm:$0x3] }
  0x2d   : > { %v1109_v44 = vmul.f32 %v1703_v41, %v1702_v40  ;;  %v1036_v45 = vrot.slane %v1027_v36, %v2022_v7  ;;  %v1705_v50 = vld [vmem:[%s2002_s7 + $0x5] ss:$8 sm:$0x3]  ;;  %v1274_v8 = vld [vmem:[%s2002_s7] ss:$8 sm:$0x3] }
  0x2e   : > { %v1073_v47 = vrot.slane %v1068_v43, %v2020_v6  ;;  %v1152_v53 = vmul.f32 %v1705_v50, %v1151_v51  ;;  %v1706_v55 = vld [vmem:[%s2002_s7 + $0x5] ss:$8 sm:$0x3]  ;;  %vm2419_vm8 = vcmask 973824   ;;  %vm339_vm9 = vcmask 596992  }
  0x2f   : > { %533 = vrot.lane.b32.xlu0 %v528_v42, %s1939_s20  ;;  %535 = vrot.lane.b32.xlu1 %v532_v46, %s1939_s20  ;;  %v1032_v42 = vrot.slane %v1027_v36, %v2020_v6  ;;  %v1704_v46 = vld [vmem:[%s2002_s7 + $0x1] ss:$8 sm:$0x3]  ;;  %v1707_v57 = vld [vmem:[%s2002_s7 + $0x5] ss:$8 sm:$0x3]  ;;  %v1200_v5 = vrot.slane %v1706_v55, %v2022_v7 }
  0x30   : > { %v1111_v48 = vmul.f32 %v1704_v46, %v1109_v44  ;;  %v1709_v60 = vld [vmem:[%s2002_s7 + $0x5] ss:$8 sm:$0x3]  ;;  %v1232_v63 = vmul.f32 %v1708_v58, %v1707_v57  ;;  %vm790_vm10 = vcmask 990208   ;;  %vm2418_vm11 = vcmask 982016  }
  0x31   : > { %v1713_v14 = vld [vmem:[%s2002_s7 + $0x5] ss:$8 sm:$0x3]  ;;  %vm831_vm12 = vcmask 1039360   ;;  %vm807_vm13 = vcmask 56320   ;;  %vm848_vm14 = vcmask 7168  }
  0x32   : > { %vm723_vm15 = vcmask 72704  }
  0x33   : > { %577 = vrot.lane.b32.xlu0 %v572_v49, %s1940_s2  ;;  %579 = vrot.lane.b32.xlu1 %v576_v52, %s1940_s2  ;;  %v1077_v49 = vrot.slane %v1068_v43, %v2022_v7  ;;  %v1116_v52 = vrot.slane %v1111_v48, %v2020_v6 }
  0x37   : > { %618 = vrot.lane.b32.xlu0 %v613_v54, %s1941_s3  ;;  %620 = vrot.lane.b32.xlu1 %v617_v56, %s1941_s3  ;;  %v1120_v54 = vrot.slane %v1111_v48, %v2022_v7  ;;  %v1157_v56 = vrot.slane %v1152_v53, %v2020_v6 }
  0x3b   : > { %661 = vrot.lane.b32.xlu0 %v656_v59, %s1942_s22  ;;  %663 = vrot.lane.b32.xlu1 %v660_v61, %s1942_s22  ;;  %v1161_v59 = vrot.slane %v1152_v53, %v2022_v7  ;;  %v1710_v61 = vld [vmem:[%s2002_s7 + $0x3] ss:$8 sm:$0x3] }
  0x3f   : > { %702 = vrot.lane.b32.xlu0 %v697_v62, %s1943_s23  ;;  %704 = vrot.lane.b32.xlu1 %v701_v4, %s1943_s23  ;;  %v1196_v62 = vrot.slane %v1706_v55, %v2020_v6  ;;  %v1273_v4 = vmul.f32 %v1710_v61, %v1709_v60 }
  0x41   : > { %v1275_v10 = vmul.f32 %v1274_v8, %v1273_v4 }
  0x43   : > { %743 = vrot.lane.b32.xlu0 %v738_v9, %s1944_s24  ;;  %745 = vrot.lane.b32.xlu1 %v742_v11, %s1944_s24  ;;  %v1237_v9 = vrot.slane %v1232_v63, %v2020_v6  ;;  %v1241_v11 = vrot.slane %v1232_v63, %v2022_v7  ;;  %v1280_v16 = vrot.slane %v1275_v10, %v2020_v6 }
  0x44   : > { %v1284_v18 = vrot.slane %v1275_v10, %v2022_v7 }
  0x47   : > { %786 = vrot.lane.b32.xlu0 %v781_v12, %s1945_s25  ;;  %788 = vrot.lane.b32.xlu1 %v785_v13, %s1945_s25  ;;  %v1711_v12 = vld [vmem:[%s2002_s7 + $0x5] ss:$8 sm:$0x3]  ;;  %v1712_v13 = vld [vmem:[%s2002_s7 + $0x3] ss:$8 sm:$0x3] }
  0x4b   : > { %827 = vrot.lane.b32.xlu0 %v822_v15, %s1946_s26  ;;  %829 = vrot.lane.b32.xlu1 %v826_v17, %s1946_s26  ;;  %v1714_v15 = vld [vmem:[%s2002_s7 + $0x3] ss:$8 sm:$0x3]  ;;  %v1316_v17 = vmul.f32 %v1712_v13, %v1711_v12 }
  0x4c   : > { %v1357_v19 = vmul.f32 %v1714_v15, %v1713_v14 }
  0x4d   : > { %v1321_v21 = vrot.slane %v1316_v17, %v2020_v6 }
  0x4f   : > { %872 = vrot.lane.b32.xlu0 %v867_v20, %s1947_s27  ;;  %874 = vrot.lane.b32.xlu1 %v871_v22, %s1947_s27  ;;  %v1715_v20 = vld [vmem:[%s2002_s7 + $0x1] ss:$8 sm:$0x3]  ;;  %v1325_v22 = vrot.slane %v1316_v17, %v2022_v7 }
  0x50   : > { %v1359_v23 = vmul.f32 %v1715_v20, %v1357_v19 }
  0x52   : > { %v1368_v25 = vrot.slane %v1359_v23, %v2022_v7 }
  0x53   : > { %913 = vrot.lane.b32.xlu0 %v908_v24, %s1948_s29  ;;  %915 = vrot.lane.b32.xlu1 %v912_v27, %s1948_s29  ;;  %v1364_v24 = vrot.slane %v1359_v23, %v2020_v6 }
  0x57   : > { %952 = vrot.lane.b32.xlu0 %v947_v30, %s1949_s30  ;;  %954 = vrot.lane.b32.xlu1 %v951_v33, %s1949_s30 }
  0x5b   : > { %993 = vrot.lane.b32.xlu0 %v988_v35, %s1950_s8  ;;  %995 = vrot.lane.b32.xlu1 %v992_v39, %s1950_s8 }
  0x5f   : > { %1037 = vrot.lane.b32.xlu0 %v1032_v42, %s1936_s17  ;;  %1039 = vrot.lane.b32.xlu1 %v1036_v45, %s1936_s17 }
  0x63   : > { %1078 = vrot.lane.b32.xlu0 %v1073_v47, %s1935_s16  ;;  %1080 = vrot.lane.b32.xlu1 %v1077_v49, %s1935_s16 }
  0x67   : > { %1121 = vrot.lane.b32.xlu0 %v1116_v52, %s1937_s18  ;;  %1123 = vrot.lane.b32.xlu1 %v1120_v54, %s1937_s18 }
  0x6b   : > { %1162 = vrot.lane.b32.xlu0 %v1157_v56, %s1934_s15  ;;  %1164 = vrot.lane.b32.xlu1 %v1161_v59, %s1934_s15 }
  0x6f   : > { %1201 = vrot.lane.b32.xlu0 %v1196_v62, %s1938_s19  ;;  %1203 = vrot.lane.b32.xlu1 %v1200_v5, %s1938_s19 }
  0x73   : > { %1242 = vrot.lane.b32.xlu0 %v1237_v9, %s1939_s20  ;;  %1244 = vrot.lane.b32.xlu1 %v1241_v11, %s1939_s20 }
  0x77   : > { %1285 = vrot.lane.b32.xlu0 %v1280_v16, %s1940_s2  ;;  %1287 = vrot.lane.b32.xlu1 %v1284_v18, %s1940_s2 }
  0x7b   : > { %1326 = vrot.lane.b32.xlu0 %v1321_v21, %s1941_s3  ;;  %1328 = vrot.lane.b32.xlu1 %v1325_v22, %s1941_s3 }
  0x7f   : > { %1369 = vrot.lane.b32.xlu0 %v1364_v24, %s1942_s22  ;;  %1371 = vrot.lane.b32.xlu1 %v1368_v25, %s1942_s22 }
  0x8d   : > { %v451_v26 = vpop.permute.xlu0 %450  ;;  %v362_v27 = vpop.permute.xlu1 %361 }
  0x8e   : > { %v370_v28 = vmul.f32 %v362_v27, %v2012_v0  ;;  %v459_v31 = vmul.f32 %v451_v26, %v2012_v0 }
  0x90   : > { %376 = vrot.lane.b32.xlu1 %v370_v28, %s1941_s3 }
  0x91   : > { %v319_v29 = vpop.permute.xlu0 %318  ;;  %v364_v30 = vpop.permute.xlu1 %363 }
  0x92   : > { %v366_v39 = vsel %vm365_vm0, %v362_v27, %v364_v30  ;;  %v372_v45 = vmul.f32 %v364_v30, %v2016_v2  ;;  %v327_v51 = vmul.f32 %v319_v29, %v2012_v0 }
  0x93   : > { %v371_v44 = vmul.f32 %v366_v39, %v2014_v1 }
  0x94   : > { %465 = vrot.lane.b32.xlu1 %v459_v31, %s1939_s20 }
  0x95   : > { %v321_v32 = vpop.permute.xlu0 %320  ;;  %v453_v33 = vpop.permute.xlu1 %452  ;;  %v1804_v54 = vpack.i.bf16 %v372_v45, %v371_v44 }
  0x96   : > { %v455_v49 = vsel %vm454_vm2, %v451_v26, %v453_v33  ;;  %v461_v53 = vmul.f32 %v453_v33, %v2016_v2  ;;  %v323_v63 = vsel %vm322_vm4, %v319_v29, %v321_v32  ;;  %v329_v12 = vmul.f32 %v321_v32, %v2016_v2 }
  0x97   : > { %v460_v52 = vmul.f32 %v455_v49, %v2014_v1  ;;  %v328_v11 = vmul.f32 %v323_v63, %v2014_v1 }
  0x99   : > { %v408_v34 = vpop.permute.xlu0 %407  ;;  %v410_v35 = vpop.permute.xlu1 %409  ;;  %v1809_v61 = vpack.i.bf16 %v461_v53, %v460_v52  ;;  %v1824_v20 = vpack.i.bf16 %v329_v12, %v328_v11 }
  0x9a   : > { %v416_v58 = vmul.f32 %v408_v34, %v2012_v0  ;;  %v412_v15 = vsel %vm411_vm6, %v408_v34, %v410_v35  ;;  %v418_v18 = vmul.f32 %v410_v35, %v2016_v2 }
  0x9b   : > { %v417_v19 = vmul.f32 %v412_v15, %v2014_v1 }
  0x9d   : > { %v492_v36 = vpop.permute.xlu0 %491  ;;  %v494_v37 = vpop.permute.xlu1 %493  ;;  %v1829_v30 = vpack.i.bf16 %v418_v18, %v417_v19 }
  0x9e   : > { %v500_v38 = vmul.f32 %v492_v36, %v2012_v0  ;;  %v502_v40 = vmul.f32 %v494_v37, %v2016_v2  ;;  %v496_v41 = vsel %vm495_vm1, %v492_v36, %v494_v37 }
  0x9f   : > { %v501_v42 = vmul.f32 %v496_v41, %v2014_v1 }
  0xa0   : > { %506 = vrot.lane.b32.xlu0 %v500_v38, %s1938_s19 }
  0xa1   : > { %v534_v43 = vpop.permute.xlu0 %533  ;;  %v1799_v47 = vpack.i.bf16 %v502_v40, %v501_v42  ;;  %v536_v48 = vpop.permute.xlu1 %535 }
  0xa2   : > { %v541_v46 = vmul.f32 %v534_v43, %v2012_v0  ;;  %v537_v56 = vsel %vm471_vm3, %v534_v43, %v536_v48  ;;  %v543_v60 = vmul.f32 %v536_v48, %v2016_v2 }
  0xa3   : > { %v542_v59 = vmul.f32 %v537_v56, %v2014_v1 }
  0xa4   : > { %1800 = vrot.lane.b32.xlu0 %v1799_v47, %s1938_s19  ;;  %547 = vrot.lane.b32.xlu1 %v541_v46, %s1934_s15 }
  0xa5   : > { %v578_v50 = vpop.permute.xlu0 %577  ;;  %v580_v55 = vpop.permute.xlu1 %579  ;;  %v1814_v13 = vpack.i.bf16 %v543_v60, %v542_v59 }
  0xa6   : > { %v585_v5 = vmul.f32 %v578_v50, %v2012_v0  ;;  %v581_v22 = vsel %vm428_vm7, %v578_v50, %v580_v55  ;;  %v587_v28 = vmul.f32 %v580_v55, %v2016_v2 }
  0xa7   : > { %v586_v29 = vmul.f32 %v581_v22, %v2014_v1 }
  0xa8   : > { %333 = vrot.lane.b32.xlu0 %v327_v51, %s1942_s22  ;;  %1805 = vrot.lane.b32.xlu1 %v1804_v54, %s1941_s3 }
  0xa9   : > { %v619_v57 = vpop.permute.xlu0 %618  ;;  %v621_v62 = vpop.permute.xlu1 %620  ;;  %v1834_v37 = vpack.i.bf16 %v587_v28, %v586_v29 }
  0xaa   : > { %v622_v4 = vsel %vm382_vm5, %v619_v57, %v621_v62  ;;  %v628_v8 = vmul.f32 %v621_v62, %v2016_v2  ;;  %v626_v24 = vmul.f32 %v619_v57, %v2012_v0 }
  0xab   : > { %v627_v9 = vmul.f32 %v622_v4, %v2014_v1 }
  0xac   : > { %422 = vrot.lane.b32.xlu0 %v416_v58, %s1940_s2  ;;  %1810 = vrot.lane.b32.xlu1 %v1809_v61, %s1939_s20 }
  0xad   : > { %v662_v10 = vpop.permute.xlu0 %661  ;;  %v664_v14 = vpop.permute.xlu1 %663  ;;  %v1819_v16 = vpack.i.bf16 %v628_v8, %v627_v9 }
  0xae   : > { %v665_v32 = vsel %vm339_vm9, %v662_v10, %v664_v14  ;;  %v671_v35 = vmul.f32 %v664_v14, %v2016_v2  ;;  %v669_v49 = vmul.f32 %v662_v10, %v2012_v0 }
  0xaf   : > { %v670_v36 = vmul.f32 %v665_v32, %v2014_v1 }
  0xb0   : > { %1815 = vrot.lane.b32.xlu1 %v1814_v13, %s1934_s15  ;;  %591 = vrot.lane.b32.xlu0 %v585_v5, %s1937_s18 }
  0xb1   : > { %v703_v17 = vpop.permute.xlu0 %702  ;;  %v705_v21 = vpop.permute.xlu1 %704  ;;  %v1839_v44 = vpack.i.bf16 %v671_v35, %v670_v36 }
  0xb2   : > { %v707_v23 = vsel %vm2419_vm8, %v703_v17, %v705_v21  ;;  %v713_v25 = vmul.f32 %v705_v21, %v2016_v2  ;;  %v711_v40 = vmul.f32 %v703_v17, %v2012_v0  ;;  %vm1451_vm8 = vcmask 719872  }
  0xb3   : > { %v712_v26 = vmul.f32 %v707_v23, %v2014_v1 }
  0xb4   : > { %1825 = vrot.lane.b32.xlu0 %v1824_v20, %s1942_s22  ;;  %1820 = vrot.lane.b32.xlu1 %v1819_v16, %s1935_s16 }
  0xb5   : > { %v744_v27 = vpop.permute.xlu0 %743  ;;  %v746_v31 = vpop.permute.xlu1 %745  ;;  %v1844_v33 = vpack.i.bf16 %v713_v25, %v712_v26 }
  0xb6   : > { %v748_v46 = vsel %vm2418_vm11, %v744_v27, %v746_v31  ;;  %v754_v50 = vmul.f32 %v746_v31, %v2016_v2  ;;  %v752_v63 = vmul.f32 %v744_v27, %v2012_v0  ;;  %vm764_vm11 = vcmask 64512  }
  0xb7   : > { %v753_v51 = vmul.f32 %v748_v46, %v2014_v1 }
  0xb8   : > { %1830 = vrot.lane.b32.xlu0 %v1829_v30, %s1940_s2  ;;  %632 = vrot.lane.b32.xlu1 %v626_v24, %s1935_s16 }
  0xb9   : > { %v787_v34 = vpop.permute.xlu0 %786  ;;  %v789_v38 = vpop.permute.xlu1 %788  ;;  %v1849_v55 = vpack.i.bf16 %v754_v50, %v753_v51 }
  0xba   : > { %v791_v39 = vsel %vm790_vm10, %v787_v34, %v789_v38  ;;  %v797_v41 = vmul.f32 %v789_v38, %v2016_v2  ;;  %v795_v53 = vmul.f32 %v787_v34, %v2012_v0 }
  0xbb   : > { %v796_v42 = vmul.f32 %v791_v39, %v2014_v1 }
  0xbc   : > { %1835 = vrot.lane.b32.xlu0 %v1834_v37, %s1937_s18  ;;  %1845 = vrot.lane.b32.xlu1 %v1844_v33, %s1950_s8 }
  0xbd   : > { %v828_v43 = vpop.permute.xlu0 %827  ;;  %v830_v45 = vpop.permute.xlu1 %829  ;;  %v1854_v47 = vpack.i.bf16 %v797_v41, %v796_v42 }
  0xbe   : > { %v832_v57 = vsel %vm831_vm12, %v828_v43, %v830_v45  ;;  %v836_v59 = vmul.f32 %v828_v43, %v2012_v0  ;;  %v838_v4 = vmul.f32 %v830_v45, %v2016_v2 }
  0xbf   : > { %v837_v5 = vmul.f32 %v832_v57, %v2014_v1 }
  0xc0   : > { %1840 = vrot.lane.b32.xlu0 %v1839_v44, %s1936_s17  ;;  %717 = vrot.lane.b32.xlu1 %v711_v40, %s1950_s8 }
  0xc1   : > { %v873_v48 = vpop.permute.xlu0 %872  ;;  %v875_v52 = vpop.permute.xlu1 %874  ;;  %v1859_v14 = vpack.i.bf16 %v838_v4, %v837_v5 }
  0xc2   : > { %v876_v9 = vsel %vm848_vm14, %v873_v48, %v875_v52  ;;  %v882_v12 = vmul.f32 %v875_v52, %v2018_v3  ;;  %v880_v25 = vmul.f32 %v873_v48, %v2014_v1 }
  0xc3   : > { %v881_v13 = vmul.f32 %v876_v9, %v2016_v2 }
  0xc4   : > { %675 = vrot.lane.b32.xlu0 %v669_v49, %s1936_s17  ;;  %1855 = vrot.lane.b32.xlu1 %v1854_v47, %s1948_s29 }
  0xc5   : > { %v914_v54 = vpop.permute.xlu0 %913  ;;  %v916_v56 = vpop.permute.xlu1 %915  ;;  %v1864_v20 = vpack.i.bf16 %v882_v12, %v881_v13 }
  0xc6   : > { %v917_v58 = vsel %vm807_vm13, %v914_v54, %v916_v56  ;;  %v923_v60 = vmul.f32 %v916_v56, %v2018_v3  ;;  %v921_v16 = vmul.f32 %v914_v54, %v2014_v1 }
  0xc7   : > { %v922_v61 = vmul.f32 %v917_v58, %v2016_v2 }
  0xc8   : > { %1850 = vrot.lane.b32.xlu0 %v1849_v55, %s1949_s30  ;;  %801 = vrot.lane.b32.xlu1 %v795_v53, %s1948_s29 }
  0xc9   : > { %v953_v62 = vpop.permute.xlu0 %952  ;;  %v955_v8 = vpop.permute.xlu1 %954  ;;  %v1869_v10 = vpack.i.bf16 %v923_v60, %v922_v61 }
  0xca   : > { %v956_v22 = vsel %vm764_vm11, %v953_v62, %v955_v8  ;;  %v962_v26 = vmul.f32 %v955_v8, %v2018_v3  ;;  %v960_v39 = vmul.f32 %v953_v62, %v2014_v1 }
  0xcb   : > { %v961_v27 = vmul.f32 %v956_v22, %v2016_v2 }
  0xcc   : > { %758 = vrot.lane.b32.xlu0 %v752_v63, %s1949_s30  ;;  %842 = vrot.lane.b32.xlu1 %v836_v59, %s1947_s27 }
  0xcd   : > { %v994_v11 = vpop.permute.xlu0 %993  ;;  %v996_v0 = vpop.permute.xlu1 %995  ;;  %v1874_v34 = vpack.i.bf16 %v962_v26, %v961_v27  ;;  %v1396_v27 = vld [vmem:[%s2412_s1 + $0x8] sm:$0xff] }
  0xce   : > { %v997_v15 = vsel %vm723_vm15, %v994_v11, %v996_v0  ;;  %v1003_v17 = vmul.f32 %v996_v0, %v2018_v3  ;;  %v1001_v30 = vmul.f32 %v994_v11, %v2014_v1  ;;  %1716 = vmatprep.mubr.msk.f32.mxu0 %vm1451_vm8, %v1396_v27  ;;  %vm2420_vm8 = vcmask 973824  }
  0xcf   : > { %v1002_v18 = vmul.f32 %v997_v15, %v2016_v2 }
  0xd0   : > { %1860 = vrot.lane.b32.xlu0 %v1859_v14, %s1947_s27  ;;  %1870 = vrot.lane.b32.xlu1 %v1869_v10, %s1945_s25 }
  0xd1   : > { %v1038_v19 = vpop.permute.xlu0 %1037  ;;  %v1040_v21 = vpop.permute.xlu1 %1039  ;;  %v1879_v23 = vpack.i.bf16 %v1003_v17, %v1002_v18 }
  0xd2   : > { %v1041_v36 = vsel %vm322_vm4, %v1038_v19, %v1040_v21  ;;  %v1047_v40 = vmul.f32 %v1040_v21, %v2018_v3  ;;  %v1045_v53 = vmul.f32 %v1038_v19, %v2014_v1 }
  0xd3   : > { %v1046_v41 = vmul.f32 %v1041_v36, %v2016_v2 }
  0xd4   : > { %1865 = vrot.lane.b32.xlu0 %v1864_v20, %s1946_s26  ;;  %927 = vrot.lane.b32.xlu1 %v921_v16, %s1945_s25 }
  0xd5   : > { %v1079_v24 = vpop.permute.xlu0 %1078  ;;  %v1081_v28 = vpop.permute.xlu1 %1080  ;;  %v1884_v48 = vpack.i.bf16 %v1047_v40, %v1046_v41 }
  0xd6   : > { %v1082_v29 = vsel %vm365_vm0, %v1079_v24, %v1081_v28  ;;  %v1088_v31 = vmul.f32 %v1081_v28, %v2018_v3  ;;  %v1086_v44 = vmul.f32 %v1079_v24, %v2014_v1 }
  0xd7   : > { %v1087_v32 = vmul.f32 %v1082_v29, %v2016_v2 }
  0xd8   : > { %886 = vrot.lane.b32.xlu0 %v880_v25, %s1946_s26  ;;  %1880 = vrot.lane.b32.xlu1 %v1879_v23, %s1943_s23 }
  0xd9   : > { %v1122_v33 = vpop.permute.xlu0 %1121  ;;  %v1124_v35 = vpop.permute.xlu1 %1123  ;;  %v1889_v37 = vpack.i.bf16 %v1088_v31, %v1087_v32 }
  0xda   : > { %v1125_v50 = vsel %vm411_vm6, %v1122_v33, %v1124_v35  ;;  %v1131_v54 = vmul.f32 %v1124_v35, %v2018_v3  ;;  %v1129_v9 = vmul.f32 %v1122_v33, %v2014_v1 }
  0xdb   : > { %v1130_v55 = vmul.f32 %v1125_v50, %v2016_v2 }
  0xdc   : > { %1875 = vrot.lane.b32.xlu0 %v1874_v34, %s1944_s24  ;;  %1007 = vrot.lane.b32.xlu1 %v1001_v30, %s1943_s23 }
  0xdd   : > { %v1163_v38 = vpop.permute.xlu0 %1162  ;;  %v1165_v42 = vpop.permute.xlu1 %1164  ;;  %v1894_v62 = vpack.i.bf16 %v1131_v54, %v1130_v55 }
  0xde   : > { %v1166_v43 = vsel %vm454_vm2, %v1163_v38, %v1165_v42  ;;  %v1172_v45 = vmul.f32 %v1165_v42, %v2018_v3  ;;  %v1170_v58 = vmul.f32 %v1163_v38, %v2014_v1 }
  0xdf   : > { %v1171_v46 = vmul.f32 %v1166_v43, %v2016_v2 }
  0xe0   : > { %966 = vrot.lane.b32.xlu0 %v960_v39, %s1944_s24  ;;  %1890 = vrot.lane.b32.xlu1 %v1889_v37, %s1941_s3 }
  0xe1   : > { %v1202_v47 = vpop.permute.xlu0 %1201  ;;  %v1204_v49 = vpop.permute.xlu1 %1203  ;;  %v1899_v51 = vpack.i.bf16 %v1172_v45, %v1171_v46 }
  0xe2   : > { %v1205_v4 = vsel %vm495_vm1, %v1202_v47, %v1204_v49  ;;  %v1211_v10 = vmul.f32 %v1204_v49, %v2018_v3  ;;  %v1209_v19 = vmul.f32 %v1202_v47, %v2014_v1 }
  0xe3   : > { %v1210_v11 = vmul.f32 %v1205_v4, %v2016_v2 }
  0xe4   : > { %1885 = vrot.lane.b32.xlu0 %v1884_v48, %s1942_s22  ;;  %1092 = vrot.lane.b32.xlu1 %v1086_v44, %s1941_s3 }
  0xe5   : > { %v1243_v52 = vpop.permute.xlu0 %1242  ;;  %v1245_v56 = vpop.permute.xlu1 %1244  ;;  %v1904_v16 = vpack.i.bf16 %v1211_v10, %v1210_v11 }
  0xe6   : > { %v1246_v57 = vsel %vm471_vm3, %v1243_v52, %v1245_v56  ;;  %v1252_v59 = vmul.f32 %v1245_v56, %v2018_v3  ;;  %v1250_v14 = vmul.f32 %v1243_v52, %v2014_v1 }
  0xe7   : > { %v1251_v60 = vmul.f32 %v1246_v57, %v2016_v2 }
  0xe8   : > { %1051 = vrot.lane.b32.xlu0 %v1045_v53, %s1942_s22  ;;  %1900 = vrot.lane.b32.xlu1 %v1899_v51, %s1939_s20 }
  0xe9   : > { %v1286_v61 = vpop.permute.xlu0 %1285  ;;  %v1288_v63 = vpop.permute.xlu1 %1287  ;;  %v1909_v5 = vpack.i.bf16 %v1252_v59, %v1251_v60 }
  0xea   : > { %v1289_v17 = vsel %vm428_vm7, %v1286_v61, %v1288_v63  ;;  %v1295_v20 = vmul.f32 %v1288_v63, %v2018_v3  ;;  %v1293_v29 = vmul.f32 %v1286_v61, %v2014_v1 }
  0xeb   : > { %v1294_v21 = vmul.f32 %v1289_v17, %v2016_v2 }
  0xec   : > { %1895 = vrot.lane.b32.xlu0 %v1894_v62, %s1940_s2  ;;  %1176 = vrot.lane.b32.xlu1 %v1170_v58, %s1939_s20 }
  0xed   : > { %v1327_v8 = vpop.permute.xlu0 %1326  ;;  %v1329_v12 = vpop.permute.xlu1 %1328  ;;  %v1914_v23 = vpack.i.bf16 %v1295_v20, %v1294_v21 }
  0xee   : > { %v1330_v13 = vsel %vm382_vm5, %v1327_v8, %v1329_v12  ;;  %v1336_v0 = vmul.f32 %v1329_v12, %v2018_v3  ;;  %v1334_v22 = vmul.f32 %v1327_v8, %v2014_v1 }
  0xef   : > { %v1335_v15 = vmul.f32 %v1330_v13, %v2016_v2 }
  0xf0   : > { %1135 = vrot.lane.b32.xlu0 %v1129_v9, %s1940_s2  ;;  %1910 = vrot.lane.b32.xlu1 %v1909_v5, %s1934_s15 }
  0xf1   : > { %v1919_v18 = vpack.i.bf16 %v1336_v0, %v1335_v15  ;;  %v1370_v24 = vpop.permute.xlu0 %1369  ;;  %v1372_v25 = vpop.permute.xlu1 %1371 }
  0xf2   : > { %v1379_v26 = vmul.f32 %v1372_v25, %v2018_v3  ;;  %v1373_v28 = vsel %vm339_vm9, %v1370_v24, %v1372_v25  ;;  %v1377_v3 = vmul.f32 %v1370_v24, %v2014_v1 }
  0xf3   : > { %v1378_v30 = vmul.f32 %v1373_v28, %v2016_v2 }
  0xf4   : > { %1905 = vrot.lane.b32.xlu0 %v1904_v16, %s1938_s19  ;;  %1256 = vrot.lane.b32.xlu1 %v1250_v14, %s1934_s15 }
  0xf8   : > { %1215 = vrot.lane.b32.xlu0 %v1209_v19, %s1938_s19  ;;  %1920 = vrot.lane.b32.xlu1 %v1919_v18, %s1935_s16 }
  0xfc   : > { %1915 = vrot.lane.b32.xlu0 %v1914_v23, %s1937_s18  ;;  %1340 = vrot.lane.b32.xlu1 %v1334_v22, %s1935_s16 }
 0x100   : > { %1299 = vrot.lane.b32.xlu0 %v1293_v29, %s1937_s18  ;;  %1387 = vrot.lane.b32.xlu1 %v1379_v26, %s1936_s17 }
 0x102   : > { %v377_v31 = vpop.permute.xlu1 %376 }
 0x104   : > { %1385 = vrot.lane.b32.xlu0 %v1378_v30, %s1936_s17 }
 0x106   : > { %v466_v32 = vpop.permute.xlu1 %465 }
 0x108   : > { %1383 = vrot.lane.b32.xlu0 %v1377_v3, %s1936_s17 }
 0x112   : > { %v507_v33 = vpop.permute.xlu0 %506 }
 0x116   : > { %v548_v34 = vpop.permute.xlu1 %547  ;;  %v1801_v35 = vpop.permute.xlu0 %1800 }
 0x117   : > { %v1803_v56 = vunpack.i.h.bf16 %v1801_v35  ;;  %v1802_v57 = vunpack.i.l.bf16 %v1801_v35 }
 0x119   : > { %v513_v0 = vsel %vm495_vm1, %v1802_v57, %v1803_v56  ;;  %v512_v22 = vsel %vm495_vm1, %v507_v33, %v1802_v57 }
 0x11a   : > { %v1806_v36 = vpop.permute.xlu1 %1805  ;;  %v334_v37 = vpop.permute.xlu0 %333 }
 0x11b   : > { %v1808_v42 = vunpack.i.h.bf16 %v1806_v36  ;;  %v1807_v43 = vunpack.i.l.bf16 %v1806_v36 }
 0x11d   : > { %v384_v50 = vsel %vm382_vm5, %v1807_v43, %v1808_v42  ;;  %v383_v51 = vsel %vm382_vm5, %v377_v31, %v1807_v43 }
 0x11e   : > { %v1811_v38 = vpop.permute.xlu1 %1810  ;;  %v423_v39 = vpop.permute.xlu0 %422 }
 0x11f   : > { %v1813_v48 = vunpack.i.h.bf16 %v1811_v38  ;;  %v1812_v49 = vunpack.i.l.bf16 %v1811_v38 }
 0x121   : > { %v473_v4 = vsel %vm471_vm3, %v1812_v49, %v1813_v48  ;;  %v472_v9 = vsel %vm471_vm3, %v466_v32, %v1812_v49 }
 0x122   : > { %v1816_v40 = vpop.permute.xlu1 %1815  ;;  %v592_v41 = vpop.permute.xlu0 %591 }
 0x123   : > { %v1818_v52 = vunpack.i.h.bf16 %v1816_v40  ;;  %v1817_v53 = vunpack.i.l.bf16 %v1816_v40 }
 0x125   : > { %v554_v10 = vsel %vm454_vm2, %v1817_v53, %v1818_v52  ;;  %v553_v18 = vsel %vm454_vm2, %v548_v34, %v1817_v53 }
 0x126   : > { %v1821_v44 = vpop.permute.xlu1 %1820  ;;  %v1826_v45 = vpop.permute.xlu0 %1825  ;;  %v1730_v19 = vpack.c.bf16 %v554_v10, %v513_v0  ;;  %v1732_v26 = vpack.c.bf16 %v553_v18, %v512_v22 }
 0x127   : > { %v1828_v46 = vunpack.i.h.bf16 %v1826_v45  ;;  %v1827_v47 = vunpack.i.l.bf16 %v1826_v45  ;;  %v1823_v15 = vunpack.i.h.bf16 %v1821_v44  ;;  %v1822_v20 = vunpack.i.l.bf16 %v1821_v44 }
 0x129   : > { %v341_v54 = vsel %vm339_vm9, %v1827_v47, %v1828_v46  ;;  %v340_v55 = vsel %vm339_vm9, %v334_v37, %v1827_v47  ;;  %v639_v30 = vsel %vm365_vm0, %v1822_v20, %v1823_v15 }
 0x12a   : > { %v633_v58 = vpop.permute.xlu1 %632  ;;  %v1831_v59 = vpop.permute.xlu0 %1830  ;;  %v1722_v60 = vpack.c.bf16 %v384_v50, %v341_v54  ;;  %v1724_v61 = vpack.c.bf16 %v383_v51, %v340_v55 }
 0x12b   : > { %v1833_v62 = vunpack.i.h.bf16 %v1831_v59  ;;  %v1832_v63 = vunpack.i.l.bf16 %v1831_v59  ;;  %v638_v33 = vsel %vm365_vm0, %v633_v58, %v1822_v20 }
 0x12c   : > { %1723 = vmatprep.subr.bf16.mxu0 %v1722_v60 }
 0x12d   : > { %1725 = vmatpush1.bf16.msra.mxu0 %v1724_v61  ;;  %v430_v5 = vsel %vm428_vm7, %v1832_v63, %v1833_v62  ;;  %v429_v8 = vsel %vm428_vm7, %v423_v39, %v1832_v63 }
 0x12e   : > { %v1846_v11 = vpop.permute.xlu1 %1845  ;;  %v1836_v12 = vpop.permute.xlu0 %1835  ;;  %v1726_v13 = vpack.c.bf16 %v473_v4, %v430_v5  ;;  %v1728_v14 = vpack.c.bf16 %v472_v9, %v429_v8 }
 0x12f   : > { %v1838_v16 = vunpack.i.h.bf16 %v1836_v12  ;;  %v1837_v17 = vunpack.i.l.bf16 %v1836_v12  ;;  %v1848_v21 = vunpack.i.h.bf16 %v1846_v11  ;;  %v1847_v27 = vunpack.i.l.bf16 %v1846_v11 }
 0x130   : > { %1727 = vmatprep.subr.bf16.mxu0 %v1726_v13 }
 0x131   : > { %1729 = vmatpush1.bf16.msra.mxu0 %v1728_v14  ;;  %v598_v23 = vsel %vm411_vm6, %v1837_v17, %v1838_v16  ;;  %v597_v31 = vsel %vm411_vm6, %v592_v41, %v1837_v17  ;;  %v725_v34 = vsel %vm723_vm15, %v1847_v27, %v1848_v21 }
 0x132   : > { %v718_v24 = vpop.permute.xlu1 %717  ;;  %v1841_v25 = vpop.permute.xlu0 %1840  ;;  %1731 = vmatprep.subr.bf16.mxu0 %v1730_v19  ;;  %v1734_v3 = vpack.c.bf16 %v639_v30, %v598_v23  ;;  %v1736_v38 = vpack.c.bf16 %v638_v33, %v597_v31 }
 0x133   : > { %v1843_v28 = vunpack.i.h.bf16 %v1841_v25  ;;  %v1842_v29 = vunpack.i.l.bf16 %v1841_v25  ;;  %v724_v43 = vsel %vm723_vm15, %v718_v24, %v1847_v27 }
 0x135   : > { %1733 = vmatpush1.bf16.msra.mxu0 %v1732_v26  ;;  %v682_v32 = vsel %vm322_vm4, %v1842_v29, %v1843_v28 }
 0x136   : > { %v1856_v35 = vpop.permute.xlu1 %1855  ;;  %v676_v36 = vpop.permute.xlu0 %675  ;;  %1735 = vmatprep.subr.bf16.mxu0 %v1734_v3  ;;  %v1738_v40 = vpack.c.bf16 %v725_v34, %v682_v32 }
 0x137   : > { %v1858_v37 = vunpack.i.h.bf16 %v1856_v35  ;;  %v681_v39 = vsel %vm322_vm4, %v676_v36, %v1842_v29  ;;  %v1857_v42 = vunpack.i.l.bf16 %v1856_v35 }
 0x138   : > { %v1740_v45 = vpack.c.bf16 %v724_v43, %v681_v39 }
 0x139   : > { %1737 = vmatpush1.bf16.msra.mxu0 %v1736_v38  ;;  %v809_v48 = vsel %vm807_vm13, %v1857_v42, %v1858_v37 }
 0x13a   : > { %v802_v41 = vpop.permute.xlu1 %801  ;;  %v1851_v44 = vpop.permute.xlu0 %1850  ;;  %1739 = vmatprep.subr.bf16.mxu0 %v1738_v40 }
 0x13b   : > { %v1853_v46 = vunpack.i.h.bf16 %v1851_v44  ;;  %v1852_v47 = vunpack.i.l.bf16 %v1851_v44  ;;  %v808_v53 = vsel %vm807_vm13, %v802_v41, %v1857_v42  ;;  %vm2422_vm13 = vmmov %vm2420_vm8 }
 0x13d   : > { %1741 = vmatpush1.bf16.msra.mxu0 %v1740_v45  ;;  %v766_v49 = vsel %vm764_vm11, %v1852_v47, %v1853_v46 }
 0x13e   : > { %v843_v50 = vpop.permute.xlu1 %842  ;;  %v759_v51 = vpop.permute.xlu0 %758  ;;  %v1742_v52 = vpack.c.bf16 %v809_v48, %v766_v49 }
 0x13f   : > { %v765_v54 = vsel %vm764_vm11, %v759_v51, %v1852_v47  ;;  %vm2421_vm11 = vcmask 982016  }
 0x140   : > { %v1744_v55 = vpack.c.bf16 %v808_v53, %v765_v54  ;;  %1743 = vmatprep.subr.bf16.mxu0 %v1742_v52 }
 0x142   : > { %v1871_v56 = vpop.permute.xlu1 %1870  ;;  %v1861_v57 = vpop.permute.xlu0 %1860  ;;  %1745 = vmatpush1.bf16.msra.mxu0 %v1744_v55 }
 0x143   : > { %v1873_v58 = vunpack.i.h.bf16 %v1871_v56  ;;  %v1863_v59 = vunpack.i.h.bf16 %v1861_v57  ;;  %v1862_v60 = vunpack.i.l.bf16 %v1861_v57  ;;  %v1872_v61 = vunpack.i.l.bf16 %v1871_v56 }
 0x145   : > { %v850_v62 = vsel %vm848_vm14, %v1862_v60, %v1863_v59  ;;  %v849_v63 = vsel %vm848_vm14, %v843_v50, %v1862_v60  ;;  %v934_v12 = vsel %vm790_vm10, %v1872_v61, %v1873_v58 }
 0x146   : > { %v928_v4 = vpop.permute.xlu1 %927  ;;  %v1866_v5 = vpop.permute.xlu0 %1865  ;;  %v1746_v8 = vpack.c.bf16 %v2016_v2, %v850_v62  ;;  %v1748_v9 = vpack.c.bf16 %v2014_v1, %v849_v63 }
 0x147   : > { %v1868_v10 = vunpack.i.h.bf16 %v1866_v5  ;;  %v1867_v11 = vunpack.i.l.bf16 %v1866_v5  ;;  %v933_v16 = vsel %vm790_vm10, %v928_v4, %v1872_v61  ;;  %vm2423_vm10 = vmmov %vm2421_vm11 }
 0x148   : > { %1747 = vmatprep.subr.bf16.mxu0 %v1746_v8 }
 0x149   : > { %1749 = vmatpush1.bf16.msra.mxu0 %v1748_v9  ;;  %v893_v13 = vsel %vm831_vm12, %v1867_v11, %v1868_v10 }
 0x14a   : > { %v1881_v14 = vpop.permute.xlu1 %1880  ;;  %v887_v0 = vpop.permute.xlu0 %886  ;;  %v1750_v15 = vpack.c.bf16 %v934_v12, %v893_v13 }
 0x14b   : > { %v1883_v17 = vunpack.i.h.bf16 %v1881_v14  ;;  %v892_v18 = vsel %vm831_vm12, %v887_v0, %v1867_v11  ;;  %v1882_v2 = vunpack.i.l.bf16 %v1881_v14 }
 0x14c   : > { %v1752_v19 = vpack.c.bf16 %v933_v16, %v892_v18  ;;  %1751 = vmatprep.subr.bf16.mxu0 %v1750_v15 }
 0x14d   : > { %v1014_v23 = vsel %vm2420_vm8, %v1882_v2, %v1883_v17 }
 0x14e   : > { %v1008_v1 = vpop.permute.xlu1 %1007  ;;  %v1876_v20 = vpop.permute.xlu0 %1875  ;;  %1753 = vmatpush1.bf16.msra.mxu0 %v1752_v19 }
 0x14f   : > { %v1878_v21 = vunpack.i.h.bf16 %v1876_v20  ;;  %v1877_v22 = vunpack.i.l.bf16 %v1876_v20  ;;  %v1013_v28 = vsel %vm2422_vm13, %v1008_v1, %v1882_v2 }
 0x151   : > { %v973_v24 = vsel %vm2421_vm11, %v1877_v22, %v1878_v21 }
 0x152   : > { %v1891_v25 = vpop.permute.xlu1 %1890  ;;  %v967_v26 = vpop.permute.xlu0 %966  ;;  %v1754_v27 = vpack.c.bf16 %v1014_v23, %v973_v24 }
 0x153   : > { %v1893_v29 = vunpack.i.h.bf16 %v1891_v25  ;;  %v972_v30 = vsel %vm2423_vm10, %v967_v26, %v1877_v22  ;;  %v1892_v31 = vunpack.i.l.bf16 %v1891_v25 }
 0x154   : > { %v1756_v3 = vpack.c.bf16 %v1013_v28, %v972_v30  ;;  %1755 = vmatprep.subr.bf16.mxu0 %v1754_v27  ;;  %v1395_v28 = vld [vmem:[%s2412_s1] sm:$0xff] }
 0x155   : > { %v1099_v36 = vsel %vm382_vm5, %v1892_v31, %v1893_v29  ;;  %v1717_v30 = vld [vmem:[%s2002_s7 + $0x6] ss:$8 sm:$0x3] }
 0x156   : > { %v1093_v32 = vpop.permute.xlu1 %1092  ;;  %v1886_v34 = vpop.permute.xlu0 %1885  ;;  %1757 = vmatpush1.bf16.msra.mxu0 %v1756_v3  ;;  %v1534_v3 = vrot.slane %v1717_v30, %v2020_v6 }
 0x157   : > { %v1888_v33 = vunpack.i.h.bf16 %v1886_v34  ;;  %v1887_v35 = vunpack.i.l.bf16 %v1886_v34  ;;  %v1098_v42 = vsel %vm382_vm5, %v1093_v32, %v1892_v31  ;;  %v1538_v31 = vrot.slane %v1717_v30, %v2022_v7 }
 0x159   : > { %v1058_v37 = vsel %vm339_vm9, %v1887_v35, %v1888_v33 }
 0x15a   : > { %v1901_v38 = vpop.permute.xlu1 %1900  ;;  %v1052_v39 = vpop.permute.xlu0 %1051  ;;  %v1758_v40 = vpack.c.bf16 %v1099_v36, %v1058_v37 }
 0x15b   : > { %v1903_v43 = vunpack.i.h.bf16 %v1901_v38  ;;  %v1057_v41 = vsel %vm339_vm9, %v1052_v39, %v1887_v35  ;;  %v1902_v45 = vunpack.i.l.bf16 %v1901_v38 }
 0x15c   : > { %v1760_v44 = vpack.c.bf16 %v1098_v42, %v1057_v41  ;;  %1759 = vmatprep.subr.bf16.mxu0 %v1758_v40 }
 0x15d   : > { %v1183_v50 = vsel %vm471_vm3, %v1902_v45, %v1903_v43 }
 0x15e   : > { %v1177_v46 = vpop.permute.xlu1 %1176  ;;  %v1896_v47 = vpop.permute.xlu0 %1895  ;;  %1761 = vmatpush1.bf16.msra.mxu0 %v1760_v44 }
 0x15f   : > { %v1898_v48 = vunpack.i.h.bf16 %v1896_v47  ;;  %v1897_v49 = vunpack.i.l.bf16 %v1896_v47  ;;  %v1182_v55 = vsel %vm471_vm3, %v1177_v46, %v1902_v45 }
 0x161   : > { %v1142_v51 = vsel %vm428_vm7, %v1897_v49, %v1898_v48 }
 0x162   : > { %v1911_v52 = vpop.permute.xlu1 %1910  ;;  %v1136_v53 = vpop.permute.xlu0 %1135  ;;  %v1762_v54 = vpack.c.bf16 %v1183_v50, %v1142_v51 }
 0x163   : > { %v1913_v56 = vunpack.i.h.bf16 %v1911_v52  ;;  %v1141_v57 = vsel %vm428_vm7, %v1136_v53, %v1897_v49  ;;  %v1912_v59 = vunpack.i.l.bf16 %v1911_v52 }
 0x164   : > { %v1764_v58 = vpack.c.bf16 %v1182_v55, %v1141_v57  ;;  %1763 = vmatprep.subr.bf16.mxu0 %v1762_v54 }
 0x165   : > { %v1263_v4 = vsel %vm454_vm2, %v1912_v59, %v1913_v56 }
 0x166   : > { %v1257_v60 = vpop.permute.xlu1 %1256  ;;  %v1906_v61 = vpop.permute.xlu0 %1905  ;;  %1765 = vmatpush1.bf16.msra.mxu0 %v1764_v58 }
 0x167   : > { %v1908_v62 = vunpack.i.h.bf16 %v1906_v61  ;;  %v1907_v63 = vunpack.i.l.bf16 %v1906_v61  ;;  %v1262_v11 = vsel %vm454_vm2, %v1257_v60, %v1912_v59 }
 0x169   : > { %v1222_v5 = vsel %vm495_vm1, %v1907_v63, %v1908_v62 }
 0x16a   : > { %v1921_v8 = vpop.permute.xlu1 %1920  ;;  %v1216_v9 = vpop.permute.xlu0 %1215  ;;  %v1766_v10 = vpack.c.bf16 %v1263_v4, %v1222_v5 }
 0x16b   : > { %v1923_v12 = vunpack.i.h.bf16 %v1921_v8  ;;  %v1221_v13 = vsel %vm495_vm1, %v1216_v9, %v1907_v63  ;;  %v1922_v0 = vunpack.i.l.bf16 %v1921_v8 }
 0x16c   : > { %v1768_v14 = vpack.c.bf16 %v1262_v11, %v1221_v13  ;;  %1767 = vmatprep.subr.bf16.mxu0 %v1766_v10 }
 0x16d   : > { %v1347_v18 = vsel %vm365_vm0, %v1922_v0, %v1923_v12 }
 0x16e   : > { %v1916_v15 = vpop.permute.xlu0 %1915  ;;  %1769 = vmatpush1.bf16.msra.mxu0 %v1768_v14  ;;  %v1341_v19 = vpop.permute.xlu1 %1340 }
 0x16f   : > { %v1918_v16 = vunpack.i.h.bf16 %v1916_v15  ;;  %v1917_v17 = vunpack.i.l.bf16 %v1916_v15  ;;  %v1346_v21 = vsel %vm365_vm0, %v1341_v19, %v1922_v0 }
 0x171   : > { %v1306_v2 = vsel %vm411_vm6, %v1917_v17, %v1918_v16 }
 0x172   : > { %v1300_v1 = vpop.permute.xlu0 %1299  ;;  %v1770_v20 = vpack.c.bf16 %v1347_v18, %v1306_v2  ;;  %v1388_v24 = vpop.permute.xlu1 %1387 }
 0x173   : > { %v1305_v22 = vsel %vm411_vm6, %v1300_v1, %v1917_v17 }
 0x174   : > { %v1772_v23 = vpack.c.bf16 %v1346_v21, %v1305_v22  ;;  %1771 = vmatprep.subr.bf16.mxu0 %v1770_v20 }
 0x176   : > { %v1386_v25 = vpop.permute.xlu0 %1385  ;;  %1773 = vmatpush1.bf16.msra.mxu0 %v1772_v23 }
 0x177   : > { %v1390_v26 = vsel %vm322_vm4, %v1386_v25, %v1388_v24 }
 0x178   : > { %1507 = vmatprep.subr.mxu0 %v1390_v26 }
 0x17a   : > { %v1384_v27 = vpop.permute.xlu0 %1383 }
 0x17b   : > { %v1389_v29 = vsel %vm322_vm4, %v1384_v27, %v1386_v25 }
 0x17c   : > { %1508 = vmatpush1.msra.mxu0 %v1389_v29 }
 0x17d   : > { %1520 = vmatmul.mubr.f32.vlgmr.msra.gmra.mrb[0].mxu0 %v1395_v28 }
 0x250   : > { %v1521_v32 = vpop.f32.mrb[0].mxu0 }
 0x251   : > { %1526 = vst [vmem:[%s2007_s10] sm:$0xff] %v1521_v32  ;;  %v1541_v34 = vmul.f32 %v1534_v3, %v1521_v32  ;;  %v1523_v33 = vpop.f32.mrb[1].mxu0 }
 0x252   : > { %1527 = vst [vmem:[%s2007_s10 + $0x8] sm:$0xff] %v1523_v33  ;;  %v1542_v35 = vmul.f32 %v1538_v31, %v1523_v33 }
 0x253   : > { %v1546_v36 = vmul.f32 %v1541_v34, %v1521_v32 }
 0x254   : > { %v1543_v37 = vadd.f32 %v1542_v35, %v1541_v34  ;;  %v1547_v38 = vmul.f32 %v1542_v35, %v1523_v33 }
 0x256   : > { %v1548_v39 = vadd.f32 %v1547_v38, %v1546_v36  ;;  %1544 = vadd.xlane.f32.xlu1 %v1543_v37 }
 0x258   : > { %1549 = vadd.xlane.f32.xlu0 %v1548_v39 }
 0x2e3   : > { %v1545_v40 = vpop.xlane.xlu1 %1544 }
 0x2e4   : > { %1551 = vst.msk [vmem:[%s1997_s28] sm:$0xff] %vm848_vm14, %v1545_v40 }
 0x2e5   : > { %v1550_v42 = vpop.xlane.xlu0 %1549 }
 0x2e6   : > { %1552 = vst.msk [vmem:[%s1997_s28 + $0x8] sm:$0xff] %vm848_vm14, %v1550_v42 }
 0x2e7 PF: > { %s17_s21 = sadd.s32 1, %s1932_s21  }
 0x2e8   : > { %p14_p5 = scmp.ge.s32.totalorder %s17_s21, 6  }
 0x2ea   :  { %16 = sbr.rel (!%p14_p5) target bundleno = 1 (0x1), region = 127 }
 0x2f1   :  { %1591 = vsyncmov [#allocation4] }
 0x2f4   :  { %s1592_s7 = vpop.sfrf %1591 }
 0x2f5   :  { %p1720_p6 = scmp.ne.s32.totalorder %s1592_s7, 0 }
 0x2f7   :  { %1596 = shalt.err (%p1720_p6)  }

// kernel: residual3d_forward.4
= control target key start
LH: loop header
LB: loop body
LE: loop exit
PB: predicated region body
PF: predicated region fallthrough
CT: control target
= control target key end

     0   :  { %s2021_s21 = smov 0   ;;  %s2476_s0 = inlined_call_operand.vmem [shape: f32[8,1024], index: 0, kind: input, shape index: {}]   ;;  %s2477_s1 = inlined_call_operand.vmem [shape: f32[8,216], index: 1, kind: input, shape index: {}]   ;;  %s2478_s2 = inlined_call_operand.vmem [shape: f32[8,1], index: 2, kind: input, shape index: {}]   ;;  %s2479_s3 = inlined_call_operand.vmem [shape: f32[8,1], index: 3, kind: input, shape index: {}]   ;;  %s2480_s4 = inlined_call_operand.vmem [shape: f32[8,1280], index: 4, kind: input, shape index: {}]   ;;  %s2481_s5 = inlined_call_operand.vmem [shape: f32[8,1024], index: 5, kind: output, shape index: {0}]   ;;  %s2482_s6 = inlined_call_operand.vmem [shape: f32[4,16,1], index: 6, kind: output, shape index: {1}]  }
   0x1 LB: > { %s1690_s22 = sadd.s32 4294967295, %s1966_s21   ;;  %p1694_p0 = scmp.ge.s32.totalorder %s1966_s21, 1  ;;  %s1966_s21 = sphi %s2021_s21, %s17_s21  }
   0x2   : > { %p192_p1 = scmp.lt.s32.totalorder %s1966_s21, 5 }
   0x4   : > { %p193_p2 = pnand %p1694_p0, %p192_p1 }
   0x5   : > { %s1695_s23 = sshll.u32 (!%p193_p2), %s1690_s22, 1  ;;  %p237_p3 = scmp.lt.s32.totalorder (!%p193_p2), %s1690_s22, 3 }
   0x6   : > { %196 = sbr.rel (%p193_p2) target bundleno = 744 (0x2e8), region = 36  ;;  %p226_p4 = scmp.lt.s32.totalorder (!%p193_p2), %s1695_s23, 7 }
   0x7   : > { %s1701_s24 = sshll.u32 (!%p193_p2), %s1690_s22, 8 }
   0x8   : > { %s243_s26 = sshra.s32 (!%p193_p2), %s1701_s24, 7 }
   0x9   : > { %s1702_s13 = sshll.u32 (!%p193_p2), %s243_s26, 3 }
   0xa   : > { %s246_s16 = scalar_lea.vmem (!%p193_p2), %s2480_s4, %s1702_s13 }
   0xb   : > { %v2047_v0 = vld [vmem:[%s246_s16] sm:$0xff] (!%p193_p2)  ;;  %v2049_v1 = vld [vmem:[%s246_s16 + $0x8] sm:$0xff] (!%p193_p2)  ;;  %v2051_v2 = vld [vmem:[%s246_s16 + $0x10] sm:$0xff] (!%p193_p2) }
   0xc   : > { %v2053_v3 = vld [vmem:[%s246_s16 + $0x18] sm:$0xff] (!%p193_p2) }
   0xd   : > { %s2490_s22 = smov (!%p237_p3, %s1690_s22), 3  ;;  %s2492_s23 = smov (!%p226_p4, %s1695_s23), 7 }
   0xe   : > { %s1753_s25 = sshll.u32 %s2490_s22, 4  ;;  %s1696_s27 = sshll.u32 %s2492_s23, 3 }
   0xf   : > { %s2032_s30 = scalar_lea.vmem %s2482_s6, %s1753_s25  ;;  %s2037_s9 = scalar_lea.vmem %s2476_s0, %s1696_s27 }
  0x10   : > { %s2042_s12 = scalar_lea.vmem %s2481_s5, %s1696_s27 }
  0x11   : > { %294 = vsyncadd [#allocation5], 512 }
  0x12   : > { %1962 = dma.done.wait [#allocation5], 512 }
  0x13   : > { %1963 = vsyncadd [#allocation5], 4294966784  ;;  %v342_v4 = vlaneseq  ;;  %v1968_v5 = vmov 0   ;;  %v303_v8 = vld [vmem:[%s2478_s2] sm:$0xff]  ;;  %s1969_s22 = smov 56   ;;  %s1970_s23 = smov 55  }
  0x14   : > { %1832 = vset.pattern.permute.xlu0 %v1968_v5  ;;  %v1705_v9 = vld [vmem:[%s2037_s9 + $0x4] ss:$8 sm:$0x3]  ;;  %v1706_v12 = vld [vmem:[%s2037_s9 + $0x2] ss:$8 sm:$0x3] }
  0x15   : > { %v343_v6 = vshrl.u32 %v342_v4, 7  ;;  %v313_v10 = vld [vmem:[%s2479_s3] sm:$0xff]  ;;  %306 = vperm.xlu0 %1832, %v303_v8   ;;  %v383_v14 = vmul.f32 %v1706_v12, %v1705_v9  ;;  %s1971_s24 = smov 57   ;;  %s1972_s25 = smov 63   ;;  %vm354_vm0 = vcmask 449536   ;;  %vm397_vm1 = vcmask 457728  }
  0x16   : > { %v1703_v13 = vld [vmem:[%s2037_s9 + $0x4] ss:$8 sm:$0x3]  ;;  %v1704_v15 = vld [vmem:[%s2037_s9 + $0x2] ss:$8 sm:$0x3] }
  0x17   : > { %v2055_v7 = vsub.s32 1, %v343_v6  ;;  %v2064_v11 = vsub.s32 0, %v343_v6  ;;  %v339_v16 = vld [vmem:[%s2037_s9] ss:$8 sm:$0x3]  ;;  %v338_v17 = vmul.f32 %v1704_v15, %v1703_v13  ;;  %s1973_s26 = smov 64  }
  0x18   : > { %v1707_v18 = vld [vmem:[%s2037_s9 + $0x4] ss:$8 sm:$0x3]  ;;  %v1708_v19 = vld [vmem:[%s2037_s9 + $0x2] ss:$8 sm:$0x3] }
  0x19   : > { %v392_v20 = vrot.slane %v383_v14, %v2055_v7  ;;  %v426_v21 = vmul.f32 %v1708_v19, %v1707_v18  ;;  %v1709_v22 = vld [vmem:[%s2037_s9 + $0x1] ss:$8 sm:$0x3]  ;;  %316 = vperm.xlu0 %1832, %v313_v10   ;;  %v340_v23 = vmul.f32 %v339_v16, %v338_v17  ;;  %v388_v24 = vrot.slane %v383_v14, %v2064_v11  ;;  %v1710_v27 = vld [vmem:[%s2037_s9 + $0x4] ss:$8 sm:$0x3] }
  0x1a   : > { %v471_v28 = vld [vmem:[%s2037_s9] ss:$8 sm:$0x3]  ;;  %v1711_v34 = vld [vmem:[%s2037_s9 + $0x4] ss:$8 sm:$0x3] }
  0x1b   : > { %395 = vrot.lane.b32.xlu1 %v392_v20, %s1969_s22  ;;  %v345_v25 = vrot.slane %v340_v23, %v2064_v11  ;;  %v429_v26 = vmul.f32 %v1709_v22, %v426_v21  ;;  %v349_v30 = vrot.slane %v340_v23, %v2055_v7  ;;  %v472_v31 = vmul.f32 %v1710_v27, %v471_v28  ;;  %v1712_v35 = vld [vmem:[%s2037_s9 + $0x4] ss:$8 sm:$0x3]  ;;  %v1713_v36 = vld [vmem:[%s2037_s9 + $0x1] ss:$8 sm:$0x3] }
  0x1c   : > { %v1714_v37 = vld [vmem:[%s2037_s9 + $0x4] ss:$8 sm:$0x3]  ;;  %v1715_v38 = vld [vmem:[%s2037_s9 + $0x3] ss:$8 sm:$0x3]  ;;  %v518_v39 = vrot.slane %v1711_v34, %v2064_v11  ;;  %v555_v41 = vmul.f32 %v1713_v36, %v1712_v35  ;;  %v522_v45 = vrot.slane %v1711_v34, %v2055_v7 }
  0x1d   : > { %393 = vrot.lane.b32.xlu0 %v388_v24, %s1969_s22  ;;  %v434_v29 = vrot.slane %v429_v26, %v2064_v11  ;;  %v477_v32 = vrot.slane %v472_v31, %v2064_v11  ;;  %v438_v33 = vrot.slane %v429_v26, %v2055_v7  ;;  %v481_v40 = vrot.slane %v472_v31, %v2055_v7  ;;  %v598_v43 = vld [vmem:[%s2037_s9] ss:$8 sm:$0x3]  ;;  %v1716_v47 = vld [vmem:[%s2037_s9 + $0x4] ss:$8 sm:$0x3] }
  0x1e   : > { %v597_v42 = vmul.f32 %v1715_v38, %v1714_v37  ;;  %v560_v44 = vrot.slane %v555_v41, %v2064_v11  ;;  %v1717_v48 = vld [vmem:[%s2037_s9 + $0x3] ss:$8 sm:$0x3]  ;;  %v1718_v49 = vld [vmem:[%s2037_s9 + $0x4] ss:$8 sm:$0x3]  ;;  %v564_v52 = vrot.slane %v555_v41, %v2055_v7 }
  0x1f   : > { %350 = vrot.lane.b32.xlu1 %v345_v25, %s1970_s23  ;;  %v1719_v50 = vld [vmem:[%s2037_s9 + $0x3] ss:$8 sm:$0x3]  ;;  %s1974_s27 = smov 65   ;;  %v640_v53 = vmul.f32 %v1717_v48, %v1716_v47  ;;  %s1975_s28 = smov 71   ;;  %vm443_vm2 = vcmask 465920  }
  0x20   : > { %v599_v46 = vmul.f32 %v598_v43, %v597_v42  ;;  %v681_v54 = vmul.f32 %v1719_v50, %v1718_v49  ;;  %v1720_v55 = vld [vmem:[%s2037_s9 + $0x1] ss:$8 sm:$0x3]  ;;  %v1721_v59 = vld [vmem:[%s2037_s9 + $0x2] ss:$8 sm:$0x3] }
  0x21   : > { %439 = vrot.lane.b32.xlu0 %v434_v29, %s1971_s24  ;;  %v645_v56 = vrot.slane %v640_v53, %v2064_v11  ;;  %v723_v60 = vld [vmem:[%s2037_s9] ss:$8 sm:$0x3]  ;;  %s1976_s29 = smov 72   ;;  %v649_v62 = vrot.slane %v640_v53, %v2055_v7  ;;  %s1977_s7 = smov 73   ;;  %vm486_vm3 = vcmask 515072  }
  0x22   : > { %v604_v51 = vrot.slane %v599_v46, %v2064_v11  ;;  %v608_v57 = vrot.slane %v599_v46, %v2055_v7  ;;  %v683_v58 = vmul.f32 %v1720_v55, %v681_v54  ;;  %v724_v63 = vmul.f32 %v1721_v59, %v723_v60  ;;  %v1722_v6 = vld [vmem:[%s2037_s9 + $0x2] ss:$8 sm:$0x3]  ;;  %v1724_v9 = vld [vmem:[%s2037_s9 + $0x1] ss:$8 sm:$0x3] }
  0x23   : > { %352 = vrot.lane.b32.xlu1 %v349_v30, %s1970_s23  ;;  %v1723_v8 = vld [vmem:[%s2037_s9 + $0x2] ss:$8 sm:$0x3]  ;;  %s1978_s8 = smov 119   ;;  %v770_v10 = vrot.slane %v1722_v6, %v2064_v11  ;;  %s1979_s10 = smov 120   ;;  %v774_v15 = vrot.slane %v1722_v6, %v2055_v7  ;;  %vm527_vm4 = vcmask 523264  }
  0x24   : > { %v688_v61 = vrot.slane %v683_v58, %v2064_v11  ;;  %v729_v4 = vrot.slane %v724_v63, %v2064_v11  ;;  %v692_v5 = vrot.slane %v683_v58, %v2055_v7  ;;  %v733_v12 = vrot.slane %v724_v63, %v2055_v7  ;;  %v849_v16 = vld [vmem:[%s2037_s9] ss:$8 sm:$0x3]  ;;  %s1980_s11 = smov 121   ;;  %s1981_s13 = smov 127  }
  0x25   : > { %482 = vrot.lane.b32.xlu0 %v477_v32, %s1972_s25  ;;  %v808_v13 = vmul.f32 %v1724_v9, %v1723_v8  ;;  %v854_v17 = vrot.slane %v849_v16, %v2064_v11  ;;  %v1725_v19 = vld [vmem:[%s2037_s9 + $0x1] ss:$8 sm:$0x3]  ;;  %v1726_v20 = vld [vmem:[%s2037_s9 + $0x3] ss:$8 sm:$0x3]  ;;  %v858_v23 = vrot.slane %v849_v16, %v2055_v7 }
  0x26   : > { %v934_v21 = vld [vmem:[%s2037_s9] ss:$8 sm:$0x3]  ;;  %v899_v22 = vrot.slane %v1725_v19, %v2064_v11  ;;  %s1982_s14 = smov 1   ;;  %v903_v26 = vrot.slane %v1725_v19, %v2055_v7  ;;  %s1983_s15 = smov 7   ;;  %vm503_vm5 = vcmask 531456  }
  0x27   : > { %441 = vrot.lane.b32.xlu1 %v438_v33, %s1971_s24  ;;  %v813_v14 = vrot.slane %v808_v13, %v2064_v11  ;;  %v817_v18 = vrot.slane %v808_v13, %v2055_v7  ;;  %v935_v24 = vmul.f32 %v1726_v20, %v934_v21  ;;  %v1727_v27 = vld [vmem:[%s2037_s9 + $0x3] ss:$8 sm:$0x3]  ;;  %v1729_v29 = vld [vmem:[%s2037_s9 + $0x1] ss:$8 sm:$0x3] }
  0x28   : > { %v1728_v28 = vld [vmem:[%s2037_s9 + $0x3] ss:$8 sm:$0x3]  ;;  %v1730_v30 = vld [vmem:[%s2037_s9 + $0x5] ss:$8 sm:$0x3]  ;;  %v979_v32 = vrot.slane %v1727_v27, %v2064_v11  ;;  %v983_v38 = vrot.slane %v1727_v27, %v2055_v7 }
  0x29   : > { %523 = vrot.lane.b32.xlu0 %v518_v39, %s1973_s26  ;;  %v940_v25 = vrot.slane %v935_v24, %v2064_v11  ;;  %v1731_v31 = vld [vmem:[%s2037_s9 + $0x2] ss:$8 sm:$0x3]  ;;  %v944_v33 = vrot.slane %v935_v24, %v2055_v7  ;;  %v1015_v34 = vmul.f32 %v1729_v29, %v1728_v28  ;;  %v1058_v36 = vld [vmem:[%s2037_s9] ss:$8 sm:$0x3] }
  0x2a   : > { %v1057_v35 = vmul.f32 %v1731_v31, %v1730_v30  ;;  %s1984_s16 = smov 8   ;;  %v1733_v41 = vld [vmem:[%s2037_s9 + $0x2] ss:$8 sm:$0x3]  ;;  %s1985_s17 = smov 9   ;;  %vm460_vm6 = vcmask 580608  }
  0x2b   : > { %484 = vrot.lane.b32.xlu1 %v481_v40, %s1972_s25  ;;  %v1020_v37 = vrot.slane %v1015_v34, %v2064_v11  ;;  %v1732_v40 = vld [vmem:[%s2037_s9 + $0x5] ss:$8 sm:$0x3]  ;;  %v1735_v43 = vld [vmem:[%s2037_s9 + $0x2] ss:$8 sm:$0x3] }
  0x2c   : > { %v1059_v39 = vmul.f32 %v1058_v36, %v1057_v35  ;;  %v1734_v42 = vld [vmem:[%s2037_s9 + $0x5] ss:$8 sm:$0x3]  ;;  %v1100_v46 = vmul.f32 %v1733_v41, %v1732_v40  ;;  %v1736_v48 = vld [vmem:[%s2037_s9 + $0x1] ss:$8 sm:$0x3] }
  0x2d   : > { %565 = vrot.lane.b32.xlu0 %v560_v44, %s1974_s27  ;;  %v1141_v47 = vmul.f32 %v1735_v43, %v1734_v42  ;;  %v1183_v53 = vld [vmem:[%s2037_s9] ss:$8 sm:$0x3]  ;;  %v1738_v59 = vld [vmem:[%s2037_s9 + $0x5] ss:$8 sm:$0x3] }
  0x2e   : > { %v1064_v44 = vrot.slane %v1059_v39, %v2064_v11  ;;  %v1105_v49 = vrot.slane %v1100_v46, %v2064_v11  ;;  %v1068_v50 = vrot.slane %v1059_v39, %v2055_v7  ;;  %v1109_v55 = vrot.slane %v1100_v46, %v2055_v7  ;;  %v1739_v60 = vld [vmem:[%s2037_s9 + $0x5] ss:$8 sm:$0x3]  ;;  %v1742_v63 = vld [vmem:[%s2037_s9 + $0x3] ss:$8 sm:$0x3] }
  0x2f   : > { %525 = vrot.lane.b32.xlu1 %v522_v45, %s1973_s26  ;;  %v1024_v45 = vrot.slane %v1015_v34, %v2055_v7  ;;  %v1306_v9 = vld [vmem:[%s2037_s9] ss:$8 sm:$0x3]  ;;  %v1745_v16 = vld [vmem:[%s2037_s9 + $0x5] ss:$8 sm:$0x3] }
  0x30   : > { %vm414_vm7 = vcmask 588800   ;;  %vm371_vm8 = vcmask 596992   ;;  %vm2483_vm9 = vcmask 973824   ;;  %vm2484_vm10 = vcmask 982016  }
  0x31   : > { %609 = vrot.lane.b32.xlu0 %v604_v51, %s1975_s28  ;;  %v1143_v51 = vmul.f32 %v1736_v48, %v1141_v47  ;;  %vm822_vm11 = vcmask 990208   ;;  %vm863_vm12 = vcmask 1039360   ;;  %vm880_vm13 = vcmask 7168  }
  0x32   : > { %vm839_vm14 = vcmask 56320   ;;  %vm796_vm15 = vcmask 64512  }
  0x33   : > { %567 = vrot.lane.b32.xlu1 %v564_v52, %s1974_s27  ;;  %v1737_v52 = vld [vmem:[%s2037_s9 + $0x5] ss:$8 sm:$0x3]  ;;  %v1148_v54 = vrot.slane %v1143_v51, %v2064_v11  ;;  %v1152_v58 = vrot.slane %v1143_v51, %v2055_v7 }
  0x35   : > { %650 = vrot.lane.b32.xlu0 %v645_v56, %s1976_s29  ;;  %v1184_v56 = vmul.f32 %v1737_v52, %v1183_v53 }
  0x37   : > { %611 = vrot.lane.b32.xlu1 %v608_v57, %s1975_s28  ;;  %v1189_v57 = vrot.slane %v1184_v56, %v2064_v11 }
  0x39   : > { %693 = vrot.lane.b32.xlu0 %v688_v61, %s1977_s7  ;;  %v1740_v61 = vld [vmem:[%s2037_s9 + $0x1] ss:$8 sm:$0x3] }
  0x3a   : > { %v1264_v6 = vmul.f32 %v1740_v61, %v1739_v60 }
  0x3b   : > { %652 = vrot.lane.b32.xlu1 %v649_v62, %s1976_s29  ;;  %v1741_v62 = vld [vmem:[%s2037_s9 + $0x5] ss:$8 sm:$0x3] }
  0x3c   : > { %v1305_v8 = vmul.f32 %v1742_v63, %v1741_v62  ;;  %v1273_v19 = vrot.slane %v1264_v6, %v2055_v7 }
  0x3d   : > { %734 = vrot.lane.b32.xlu0 %v729_v4, %s1978_s8  ;;  %v1228_v4 = vrot.slane %v1738_v59, %v2064_v11 }
  0x3e   : > { %v1307_v13 = vmul.f32 %v1306_v9, %v1305_v8 }
  0x3f   : > { %695 = vrot.lane.b32.xlu1 %v692_v5, %s1977_s7  ;;  %v1193_v5 = vrot.slane %v1184_v56, %v2055_v7 }
  0x40   : > { %v1316_v24 = vrot.slane %v1307_v13, %v2055_v7 }
  0x41   : > { %775 = vrot.lane.b32.xlu0 %v770_v10, %s1979_s10  ;;  %v1269_v10 = vrot.slane %v1264_v6, %v2064_v11 }
  0x43   : > { %736 = vrot.lane.b32.xlu1 %v733_v12, %s1978_s8  ;;  %v1232_v12 = vrot.slane %v1738_v59, %v2055_v7 }
  0x45   : > { %818 = vrot.lane.b32.xlu0 %v813_v14, %s1980_s11  ;;  %v1743_v14 = vld [vmem:[%s2037_s9 + $0x5] ss:$8 sm:$0x3] }
  0x47   : > { %777 = vrot.lane.b32.xlu1 %v774_v15, %s1979_s10  ;;  %v1744_v15 = vld [vmem:[%s2037_s9 + $0x3] ss:$8 sm:$0x3] }
  0x48   : > { %v1348_v20 = vmul.f32 %v1744_v15, %v1743_v14 }
  0x49   : > { %859 = vrot.lane.b32.xlu0 %v854_v17, %s1981_s13  ;;  %v1746_v17 = vld [vmem:[%s2037_s9 + $0x3] ss:$8 sm:$0x3] }
  0x4a   : > { %v1389_v21 = vmul.f32 %v1746_v17, %v1745_v16  ;;  %v1357_v27 = vrot.slane %v1348_v20, %v2055_v7 }
  0x4b   : > { %820 = vrot.lane.b32.xlu1 %v817_v18, %s1980_s11  ;;  %v1312_v18 = vrot.slane %v1307_v13, %v2064_v11 }
  0x4d   : > { %904 = vrot.lane.b32.xlu0 %v899_v22, %s1982_s14  ;;  %v1747_v22 = vld [vmem:[%s2037_s9 + $0x1] ss:$8 sm:$0x3] }
  0x4f   : > { %861 = vrot.lane.b32.xlu1 %v858_v23, %s1981_s13  ;;  %v1353_v23 = vrot.slane %v1348_v20, %v2064_v11 }
  0x51   : > { %945 = vrot.lane.b32.xlu0 %v940_v25, %s1983_s15  ;;  %v1391_v25 = vmul.f32 %v1747_v22, %v1389_v21 }
  0x53   : > { %906 = vrot.lane.b32.xlu1 %v903_v26, %s1982_s14  ;;  %v1396_v26 = vrot.slane %v1391_v25, %v2064_v11  ;;  %v1400_v28 = vrot.slane %v1391_v25, %v2055_v7 }
  0x55   : > { %984 = vrot.lane.b32.xlu0 %v979_v32, %s1984_s16 }
  0x57   : > { %947 = vrot.lane.b32.xlu1 %v944_v33, %s1983_s15 }
  0x59   : > { %1025 = vrot.lane.b32.xlu0 %v1020_v37, %s1985_s17 }
  0x5b   : > { %986 = vrot.lane.b32.xlu1 %v983_v38, %s1984_s16 }
  0x5d   : > { %1069 = vrot.lane.b32.xlu0 %v1064_v44, %s1970_s23 }
  0x5f   : > { %1027 = vrot.lane.b32.xlu1 %v1024_v45, %s1985_s17 }
  0x61   : > { %1110 = vrot.lane.b32.xlu0 %v1105_v49, %s1969_s22 }
  0x63   : > { %1071 = vrot.lane.b32.xlu1 %v1068_v50, %s1970_s23 }
  0x65   : > { %1153 = vrot.lane.b32.xlu0 %v1148_v54, %s1971_s24 }
  0x67   : > { %1112 = vrot.lane.b32.xlu1 %v1109_v55, %s1969_s22 }
  0x69   : > { %1194 = vrot.lane.b32.xlu0 %v1189_v57, %s1972_s25 }
  0x6b   : > { %1155 = vrot.lane.b32.xlu1 %v1152_v58, %s1971_s24 }
  0x6d   : > { %1233 = vrot.lane.b32.xlu0 %v1228_v4, %s1973_s26 }
  0x6f   : > { %1196 = vrot.lane.b32.xlu1 %v1193_v5, %s1972_s25 }
  0x71   : > { %1274 = vrot.lane.b32.xlu0 %v1269_v10, %s1974_s27 }
  0x73   : > { %1235 = vrot.lane.b32.xlu1 %v1232_v12, %s1973_s26 }
  0x75   : > { %1317 = vrot.lane.b32.xlu0 %v1312_v18, %s1975_s28 }
  0x77   : > { %1276 = vrot.lane.b32.xlu1 %v1273_v19, %s1974_s27 }
  0x79   : > { %1358 = vrot.lane.b32.xlu0 %v1353_v23, %s1976_s29 }
  0x7b   : > { %1319 = vrot.lane.b32.xlu1 %v1316_v24, %s1975_s28 }
  0x7d   : > { %1401 = vrot.lane.b32.xlu0 %v1396_v26, %s1977_s7 }
  0x7f   : > { %1360 = vrot.lane.b32.xlu1 %v1357_v27, %s1976_s29 }
  0x83   : > { %1403 = vrot.lane.b32.xlu1 %v1400_v28, %s1977_s7 }
  0x8d   : > { %v396_v29 = vpop.permute.xlu1 %395 }
  0x91   : > { %v351_v30 = vpop.permute.xlu1 %350 }
  0x94   : > { %v2223_v32 = vpop.permute.xlu0 %306 }
  0x95   : > { %v353_v31 = vpop.permute.xlu1 %352  ;;  %v310_v33 = vmul.f32 %v2223_v32, %v2049_v1  ;;  %v311_v34 = vmul.f32 %v2223_v32, %v2051_v2  ;;  %v309_v39 = vmul.f32 %v2223_v32, %v2047_v0 }
  0x96   : > { %v355_v1 = vsel %vm354_vm0, %v351_v30, %v353_v31 }
  0x98   : > { %v2229_v36 = vpop.permute.xlu0 %316 }
  0x99   : > { %v442_v35 = vpop.permute.xlu1 %441  ;;  %v320_v37 = vadd.f32 %v2229_v36, %v310_v33  ;;  %v321_v38 = vadd.f32 %v2229_v36, %v311_v34  ;;  %v319_v2 = vadd.f32 %v2229_v36, %v309_v39 }
  0x9b   : > { %v2235_v40 = vmax.f32 %v320_v37, 0.0  ;;  %v2237_v41 = vmax.f32 %v321_v38, 0.0  ;;  %v2246_v48 = vmax.f32 %v319_v2, 0.0 }
  0x9c   : > { %v394_v43 = vpop.permute.xlu0 %393 }
  0x9d   : > { %v485_v42 = vpop.permute.xlu1 %484  ;;  %v398_v44 = vsel %vm397_vm1, %v394_v43, %v396_v29  ;;  %v360_v45 = vmul.f32 %v355_v1, %v2235_v40  ;;  %v361_v0 = vmul.f32 %v353_v31, %v2237_v41  ;;  %v404_v47 = vmul.f32 %v396_v29, %v2237_v41 }
  0x9e   : > { %v403_v46 = vmul.f32 %v398_v44, %v2235_v40  ;;  %v402_v54 = vmul.f32 %v394_v43, %v2246_v48  ;;  %v359_v58 = vmul.f32 %v351_v30, %v2246_v48  ;;  %v493_v60 = vmul.f32 %v485_v42, %v2237_v41 }
  0x9f   : > { %v1833_v51 = vpack.i.bf16 %v361_v0, %v360_v45  ;;  %v450_v62 = vmul.f32 %v442_v35, %v2237_v41 }
  0xa0   : > { %v440_v50 = vpop.permute.xlu0 %439  ;;  %v1838_v52 = vpack.i.bf16 %v404_v47, %v403_v46 }
  0xa1   : > { %v526_v49 = vpop.permute.xlu1 %525  ;;  %v444_v53 = vsel %vm443_vm2, %v440_v50, %v442_v35  ;;  %1834 = vrot.lane.b32.xlu0 %v1833_v51, %s1977_s7  ;;  %v448_v9 = vmul.f32 %v440_v50, %v2246_v48 }
  0xa2   : > { %1839 = vrot.lane.b32.xlu1 %v1838_v52, %s1976_s29  ;;  %v449_v55 = vmul.f32 %v444_v53, %v2235_v40  ;;  %v534_v16 = vmul.f32 %v526_v49, %v2237_v41 }
  0xa4   : > { %v483_v57 = vpop.permute.xlu0 %482  ;;  %v1843_v5 = vpack.i.bf16 %v450_v62, %v449_v55 }
  0xa5   : > { %v568_v56 = vpop.permute.xlu1 %567  ;;  %v487_v59 = vsel %vm486_vm3, %v483_v57, %v485_v42  ;;  %365 = vrot.lane.b32.xlu0 %v359_v58, %s1977_s7  ;;  %v491_v10 = vmul.f32 %v483_v57, %v2246_v48 }
  0xa6   : > { %v492_v61 = vmul.f32 %v487_v59, %v2235_v40  ;;  %408 = vrot.lane.b32.xlu1 %v402_v54, %s1976_s29  ;;  %v575_v17 = vmul.f32 %v568_v56, %v2237_v41 }
  0xa8   : > { %v524_v4 = vpop.permute.xlu0 %523  ;;  %v1848_v6 = vpack.i.bf16 %v493_v60, %v492_v61 }
  0xa9   : > { %v612_v63 = vpop.permute.xlu1 %611  ;;  %v528_v8 = vsel %vm527_vm4, %v524_v4, %v526_v49  ;;  %1844 = vrot.lane.b32.xlu0 %v1843_v5, %s1975_s28  ;;  %v532_v24 = vmul.f32 %v524_v4, %v2246_v48 }
  0xaa   : > { %1849 = vrot.lane.b32.xlu1 %v1848_v6, %s1974_s27  ;;  %v533_v12 = vmul.f32 %v528_v8, %v2235_v40  ;;  %v619_v30 = vmul.f32 %v612_v63, %v2237_v41 }
  0xac   : > { %v566_v14 = vpop.permute.xlu0 %565  ;;  %v1853_v21 = vpack.i.bf16 %v534_v16, %v533_v12 }
  0xad   : > { %v653_v13 = vpop.permute.xlu1 %652  ;;  %v569_v15 = vsel %vm503_vm5, %v566_v14, %v568_v56  ;;  %454 = vrot.lane.b32.xlu0 %v448_v9, %s1975_s28  ;;  %v573_v25 = vmul.f32 %v566_v14, %v2246_v48  ;;  %v312_v9 = vmul.f32 %v2223_v32, %v2053_v3 }
  0xae   : > { %v574_v18 = vmul.f32 %v569_v15, %v2235_v40  ;;  %497 = vrot.lane.b32.xlu1 %v491_v10, %s1974_s27  ;;  %v660_v31 = vmul.f32 %v653_v13, %v2237_v41 }
  0xaf   : > { %v322_v10 = vadd.f32 %v2229_v36, %v312_v9 }
  0xb0   : > { %v610_v20 = vpop.permute.xlu0 %609  ;;  %v1858_v22 = vpack.i.bf16 %v575_v17, %v574_v18 }
  0xb1   : > { %v696_v19 = vpop.permute.xlu1 %695  ;;  %v613_v23 = vsel %vm460_vm6, %v610_v20, %v612_v63  ;;  %1854 = vrot.lane.b32.xlu0 %v1853_v21, %s1973_s26  ;;  %v617_v1 = vmul.f32 %v610_v20, %v2246_v48  ;;  %v2321_v3 = vmax.f32 %v322_v10, 0.0 }
  0xb2   : > { %1859 = vrot.lane.b32.xlu1 %v1858_v22, %s1972_s25  ;;  %v618_v26 = vmul.f32 %v613_v23, %v2235_v40  ;;  %v703_v46 = vmul.f32 %v696_v19, %v2237_v41 }
  0xb4   : > { %v651_v28 = vpop.permute.xlu0 %650  ;;  %v1863_v37 = vpack.i.bf16 %v619_v30, %v618_v26 }
  0xb5   : > { %v737_v27 = vpop.permute.xlu1 %736  ;;  %v654_v29 = vsel %vm414_vm7, %v651_v28, %v653_v13  ;;  %538 = vrot.lane.b32.xlu0 %v532_v24, %s1973_s26  ;;  %v658_v2 = vmul.f32 %v651_v28, %v2246_v48 }
  0xb6   : > { %v659_v33 = vmul.f32 %v654_v29, %v2235_v40  ;;  %579 = vrot.lane.b32.xlu1 %v573_v25, %s1972_s25  ;;  %v745_v0 = vmul.f32 %v737_v27, %v2237_v41 }
  0xb8   : > { %v694_v35 = vpop.permute.xlu0 %693  ;;  %v1868_v38 = vpack.i.bf16 %v660_v31, %v659_v33 }
  0xb9   : > { %v778_v34 = vpop.permute.xlu1 %777  ;;  %v697_v39 = vsel %vm371_vm8, %v694_v35, %v696_v19  ;;  %1864 = vrot.lane.b32.xlu0 %v1863_v37, %s1971_s24  ;;  %v701_v54 = vmul.f32 %v694_v35, %v2246_v48 }
  0xba   : > { %1869 = vrot.lane.b32.xlu1 %v1868_v38, %s1969_s22  ;;  %v702_v42 = vmul.f32 %v697_v39, %v2235_v40  ;;  %v786_v60 = vmul.f32 %v778_v34, %v2237_v41 }
  0xbc   : > { %v735_v44 = vpop.permute.xlu0 %734  ;;  %v1873_v51 = vpack.i.bf16 %v703_v46, %v702_v42 }
  0xbd   : > { %v821_v43 = vpop.permute.xlu1 %820  ;;  %v739_v45 = vsel %vm2483_vm9, %v735_v44, %v737_v27  ;;  %623 = vrot.lane.b32.xlu0 %v617_v1, %s1971_s24  ;;  %v743_v55 = vmul.f32 %v735_v44, %v2246_v48  ;;  %vm755_vm9 = vcmask 72704  }
  0xbe   : > { %v744_v47 = vmul.f32 %v739_v45, %v2235_v40  ;;  %664 = vrot.lane.b32.xlu1 %v658_v2, %s1969_s22  ;;  %v829_v61 = vmul.f32 %v821_v43, %v2237_v41 }
  0xc0   : > { %v776_v50 = vpop.permute.xlu0 %775  ;;  %v1878_v52 = vpack.i.bf16 %v745_v0, %v744_v47 }
  0xc1   : > { %v862_v49 = vpop.permute.xlu1 %861  ;;  %v780_v53 = vsel %vm2484_vm10, %v776_v50, %v778_v34  ;;  %1874 = vrot.lane.b32.xlu0 %v1873_v51, %s1970_s23  ;;  %v784_v12 = vmul.f32 %v776_v50, %v2246_v48  ;;  %vm1483_vm10 = vcmask 719872  }
  0xc2   : > { %1879 = vrot.lane.b32.xlu1 %v1878_v52, %s1985_s17  ;;  %v785_v56 = vmul.f32 %v780_v53, %v2235_v40  ;;  %v870_v18 = vmul.f32 %v862_v49, %v2237_v41 }
  0xc4   : > { %v819_v58 = vpop.permute.xlu0 %818  ;;  %v1883_v5 = vpack.i.bf16 %v786_v60, %v785_v56 }
  0xc5   : > { %v907_v57 = vpop.permute.xlu1 %906  ;;  %v823_v59 = vsel %vm822_vm11, %v819_v58, %v821_v43  ;;  %707 = vrot.lane.b32.xlu0 %v701_v54, %s1970_s23  ;;  %v827_v13 = vmul.f32 %v819_v58, %v2246_v48 }
  0xc6   : > { %v828_v62 = vmul.f32 %v823_v59, %v2235_v40  ;;  %749 = vrot.lane.b32.xlu1 %v743_v55, %s1985_s17  ;;  %v914_v23 = vmul.f32 %v907_v57, %v2321_v3 }
  0xc8   : > { %v860_v4 = vpop.permute.xlu0 %859  ;;  %v1888_v6 = vpack.i.bf16 %v829_v61, %v828_v62 }
  0xc9   : > { %v948_v63 = vpop.permute.xlu1 %947  ;;  %v864_v8 = vsel %vm863_vm12, %v860_v4, %v862_v49  ;;  %1884 = vrot.lane.b32.xlu0 %v1883_v5, %s1984_s16  ;;  %v868_v32 = vmul.f32 %v860_v4, %v2246_v48 }
  0xca   : > { %1889 = vrot.lane.b32.xlu1 %v1888_v6, %s1983_s15  ;;  %v869_v14 = vmul.f32 %v864_v8, %v2235_v40  ;;  %v955_v24 = vmul.f32 %v948_v63, %v2321_v3 }
  0xcc   : > { %v905_v16 = vpop.permute.xlu0 %904  ;;  %v1893_v21 = vpack.i.bf16 %v870_v18, %v869_v14 }
  0xcd   : > { %v987_v15 = vpop.permute.xlu1 %986  ;;  %v908_v17 = vsel %vm880_vm13, %v905_v16, %v907_v57  ;;  %790 = vrot.lane.b32.xlu0 %v784_v12, %s1984_s16  ;;  %v912_v30 = vmul.f32 %v905_v16, %v2235_v40 }
  0xce   : > { %833 = vrot.lane.b32.xlu1 %v827_v13, %s1983_s15  ;;  %v913_v36 = vmul.f32 %v908_v17, %v2237_v41  ;;  %v994_v38 = vmul.f32 %v987_v15, %v2321_v3 }
  0xd0   : > { %v946_v20 = vpop.permute.xlu0 %945  ;;  %v1898_v27 = vpack.i.bf16 %v914_v23, %v913_v36 }
  0xd1   : > { %v1028_v19 = vpop.permute.xlu1 %1027  ;;  %v949_v22 = vsel %vm839_vm14, %v946_v20, %v948_v63  ;;  %1894 = vrot.lane.b32.xlu0 %v1893_v21, %s1982_s14  ;;  %v953_v31 = vmul.f32 %v946_v20, %v2235_v40 }
  0xd2   : > { %v954_v25 = vmul.f32 %v949_v22, %v2237_v41  ;;  %874 = vrot.lane.b32.xlu1 %v868_v32, %s1982_s14  ;;  %v1035_v39 = vmul.f32 %v1028_v19, %v2321_v3 }
  0xd4   : > { %v985_v48 = vpop.permute.xlu0 %984  ;;  %v1903_v28 = vpack.i.bf16 %v955_v24, %v954_v25 }
  0xd5   : > { %v1072_v26 = vpop.permute.xlu1 %1071  ;;  %v988_v29 = vsel %vm796_vm15, %v985_v48, %v987_v15  ;;  %1899 = vrot.lane.b32.xlu0 %v1898_v27, %s1981_s13  ;;  %v992_v46 = vmul.f32 %v985_v48, %v2235_v40 }
  0xd6   : > { %1904 = vrot.lane.b32.xlu1 %v1903_v28, %s1980_s11  ;;  %v993_v33 = vmul.f32 %v988_v29, %v2237_v41  ;;  %v1079_v52 = vmul.f32 %v1072_v26, %v2321_v3 }
  0xd8   : > { %v1026_v35 = vpop.permute.xlu0 %1025  ;;  %v1908_v43 = vpack.i.bf16 %v994_v38, %v993_v33 }
  0xd9   : > { %v1113_v34 = vpop.permute.xlu1 %1112  ;;  %v1029_v37 = vsel %vm755_vm9, %v1026_v35, %v1028_v19  ;;  %918 = vrot.lane.b32.xlu0 %v912_v30, %s1981_s13  ;;  %v1033_v0 = vmul.f32 %v1026_v35, %v2235_v40 }
  0xda   : > { %v1034_v1 = vmul.f32 %v1029_v37, %v2237_v41  ;;  %959 = vrot.lane.b32.xlu1 %v953_v31, %s1980_s11  ;;  %v1120_v53 = vmul.f32 %v1113_v34, %v2321_v3 }
  0xdc   : > { %v1070_v42 = vpop.permute.xlu0 %1069  ;;  %v1913_v44 = vpack.i.bf16 %v1035_v39, %v1034_v1  ;;  %v1428_v39 = vld [vmem:[%s2477_s1 + $0x8] sm:$0xff] }
  0xdd   : > { %v1156_v2 = vpop.permute.xlu1 %1155  ;;  %v1073_v45 = vsel %vm354_vm0, %v1070_v42, %v1072_v26  ;;  %1909 = vrot.lane.b32.xlu0 %v1908_v43, %s1979_s10  ;;  %v1077_v60 = vmul.f32 %v1070_v42, %v2235_v40  ;;  %1748 = vmatprep.mubr.msk.f32.mxu0 %vm1483_vm10, %v1428_v39  ;;  %vm2486_vm10 = vcmask 973824  }
  0xde   : > { %1914 = vrot.lane.b32.xlu1 %v1913_v44, %s1978_s8  ;;  %v1078_v47 = vmul.f32 %v1073_v45, %v2237_v41  ;;  %v1163_v5 = vmul.f32 %v1156_v2, %v2321_v3 }
  0xe0   : > { %v1111_v50 = vpop.permute.xlu0 %1110  ;;  %v1918_v56 = vpack.i.bf16 %v1079_v52, %v1078_v47 }
  0xe1   : > { %v1197_v49 = vpop.permute.xlu1 %1196  ;;  %v1114_v51 = vsel %vm397_vm1, %v1111_v50, %v1113_v34  ;;  %998 = vrot.lane.b32.xlu0 %v992_v46, %s1979_s10  ;;  %v1118_v61 = vmul.f32 %v1111_v50, %v2235_v40 }
  0xe2   : > { %v1119_v54 = vmul.f32 %v1114_v51, %v2237_v41  ;;  %1039 = vrot.lane.b32.xlu1 %v1033_v0, %s1978_s8  ;;  %v1204_v6 = vmul.f32 %v1197_v49, %v2321_v3 }
  0xe4   : > { %v1154_v55 = vpop.permute.xlu0 %1153  ;;  %v1923_v57 = vpack.i.bf16 %v1120_v53, %v1119_v54 }
  0xe5   : > { %v1236_v58 = vpop.permute.xlu1 %1235  ;;  %v1157_v59 = vsel %vm443_vm2, %v1154_v55, %v1156_v2  ;;  %1919 = vrot.lane.b32.xlu0 %v1918_v56, %s1977_s7  ;;  %v1161_v15 = vmul.f32 %v1154_v55, %v2235_v40 }
  0xe6   : > { %1924 = vrot.lane.b32.xlu1 %v1923_v57, %s1976_s29  ;;  %v1162_v62 = vmul.f32 %v1157_v59, %v2237_v41  ;;  %v1243_v19 = vmul.f32 %v1236_v58, %v2321_v3 }
  0xe8   : > { %v1195_v63 = vpop.permute.xlu0 %1194  ;;  %v1928_v12 = vpack.i.bf16 %v1163_v5, %v1162_v62 }
  0xe9   : > { %v1198_v4 = vsel %vm486_vm3, %v1195_v63, %v1197_v49  ;;  %1083 = vrot.lane.b32.xlu0 %v1077_v60, %s1977_s7  ;;  %v1277_v9 = vpop.permute.xlu1 %1276  ;;  %v1202_v16 = vmul.f32 %v1195_v63, %v2235_v40 }
  0xea   : > { %v1203_v8 = vmul.f32 %v1198_v4, %v2237_v41  ;;  %1124 = vrot.lane.b32.xlu1 %v1118_v61, %s1976_s29  ;;  %v1284_v20 = vmul.f32 %v1277_v9, %v2321_v3 }
  0xec   : > { %v1234_v10 = vpop.permute.xlu0 %1233  ;;  %v1933_v13 = vpack.i.bf16 %v1204_v6, %v1203_v8 }
  0xed   : > { %v1237_v14 = vsel %vm527_vm4, %v1234_v10, %v1236_v58  ;;  %1929 = vrot.lane.b32.xlu0 %v1928_v12, %s1975_s28  ;;  %v1320_v32 = vpop.permute.xlu1 %1319  ;;  %v1241_v48 = vmul.f32 %v1234_v10, %v2235_v40 }
  0xee   : > { %1934 = vrot.lane.b32.xlu1 %v1933_v13, %s1974_s27  ;;  %v1242_v17 = vmul.f32 %v1237_v14, %v2237_v41  ;;  %v1327_v31 = vmul.f32 %v1320_v32, %v2321_v3 }
  0xf0   : > { %v1275_v18 = vpop.permute.xlu0 %1274  ;;  %v1938_v23 = vpack.i.bf16 %v1243_v19, %v1242_v17 }
  0xf1   : > { %v1278_v36 = vsel %vm503_vm5, %v1275_v18, %v1277_v9  ;;  %1167 = vrot.lane.b32.xlu0 %v1161_v15, %s1975_s28  ;;  %v1361_v26 = vpop.permute.xlu1 %1360  ;;  %v1282_v27 = vmul.f32 %v1275_v18, %v2235_v40 }
  0xf2   : > { %v1283_v21 = vmul.f32 %v1278_v36, %v2237_v41  ;;  %1208 = vrot.lane.b32.xlu1 %v1202_v16, %s1974_s27  ;;  %v1368_v33 = vmul.f32 %v1361_v26, %v2321_v3 }
  0xf4   : > { %v1318_v22 = vpop.permute.xlu0 %1317  ;;  %v1943_v24 = vpack.i.bf16 %v1284_v20, %v1283_v21 }
  0xf5   : > { %v1321_v25 = vsel %vm460_vm6, %v1318_v22, %v1320_v32  ;;  %1939 = vrot.lane.b32.xlu0 %v1938_v23, %s1973_s26  ;;  %v1404_v1 = vpop.permute.xlu1 %1403  ;;  %v1325_v2 = vmul.f32 %v1318_v22, %v2235_v40 }
  0xf6   : > { %1944 = vrot.lane.b32.xlu1 %v1943_v24, %s1972_s25  ;;  %v1326_v28 = vmul.f32 %v1321_v25, %v2237_v41  ;;  %v1411_v44 = vmul.f32 %v1404_v1, %v2321_v3 }
  0xf8   : > { %v1359_v29 = vpop.permute.xlu0 %1358  ;;  %v1948_v35 = vpack.i.bf16 %v1327_v31, %v1326_v28 }
  0xf9   : > { %v1362_v30 = vsel %vm414_vm7, %v1359_v29, %v1361_v26  ;;  %1247 = vrot.lane.b32.xlu0 %v1241_v48, %s1973_s26  ;;  %v1366_v42 = vmul.f32 %v1359_v29, %v2235_v40 }
  0xfa   : > { %v1367_v34 = vmul.f32 %v1362_v30, %v2237_v41  ;;  %1288 = vrot.lane.b32.xlu1 %v1282_v27, %s1972_s25 }
  0xfc   : > { %v1953_v37 = vpack.i.bf16 %v1368_v33, %v1367_v34  ;;  %v1402_v38 = vpop.permute.xlu0 %1401 }
  0xfd   : > { %1949 = vrot.lane.b32.xlu0 %v1948_v35, %s1971_s24  ;;  %v1405_v43 = vsel %vm371_vm8, %v1402_v38, %v1404_v1  ;;  %v1409_v46 = vmul.f32 %v1402_v38, %v2235_v40 }
  0xfe   : > { %1954 = vrot.lane.b32.xlu1 %v1953_v37, %s1969_s22  ;;  %v1410_v45 = vmul.f32 %v1405_v43, %v2237_v41 }
 0x101   : > { %1331 = vrot.lane.b32.xlu0 %v1325_v2, %s1971_s24 }
 0x102   : > { %1372 = vrot.lane.b32.xlu1 %v1366_v42, %s1969_s22 }
 0x105   : > { %1417 = vrot.lane.b32.xlu0 %v1410_v45, %s1970_s23 }
 0x106   : > { %1419 = vrot.lane.b32.xlu1 %v1411_v44, %s1970_s23 }
 0x109   : > { %1415 = vrot.lane.b32.xlu0 %v1409_v46, %s1970_s23 }
 0x113   : > { %v1835_v0 = vpop.permute.xlu0 %1834 }
 0x114   : > { %v1840_v47 = vpop.permute.xlu1 %1839  ;;  %v1837_v49 = vunpack.i.h.bf16 %v1835_v0  ;;  %v1836_v50 = vunpack.i.l.bf16 %v1835_v0 }
 0x115   : > { %v1842_v51 = vunpack.i.h.bf16 %v1840_v47  ;;  %v1841_v52 = vunpack.i.l.bf16 %v1840_v47 }
 0x116   : > { %v373_v53 = vsel %vm371_vm8, %v1836_v50, %v1837_v49 }
 0x117   : > { %v416_v3 = vsel %vm414_vm7, %v1841_v52, %v1842_v51  ;;  %v366_v54 = vpop.permute.xlu0 %365 }
 0x118   : > { %v409_v55 = vpop.permute.xlu1 %408  ;;  %v1754_v56 = vpack.c.bf16 %v416_v3, %v373_v53  ;;  %v372_v57 = vsel %vm371_vm8, %v366_v54, %v1836_v50 }
 0x119   : > { %v415_v58 = vsel %vm414_vm7, %v409_v55, %v1841_v52 }
 0x11a   : > { %1755 = vmatprep.subr.bf16.mxu0 %v1754_v56  ;;  %v1756_v59 = vpack.c.bf16 %v415_v58, %v372_v57 }
 0x11b   : > { %v1845_v60 = vpop.permute.xlu0 %1844 }
 0x11c   : > { %v1850_v61 = vpop.permute.xlu1 %1849  ;;  %1757 = vmatpush1.bf16.msra.mxu0 %v1756_v59  ;;  %v1847_v62 = vunpack.i.h.bf16 %v1845_v60  ;;  %v1846_v63 = vunpack.i.l.bf16 %v1845_v60 }
 0x11d   : > { %v1852_v4 = vunpack.i.h.bf16 %v1850_v61  ;;  %v1851_v5 = vunpack.i.l.bf16 %v1850_v61 }
 0x11e   : > { %v462_v6 = vsel %vm460_vm6, %v1846_v63, %v1847_v62 }
 0x11f   : > { %v505_v8 = vsel %vm503_vm5, %v1851_v5, %v1852_v4  ;;  %v455_v9 = vpop.permute.xlu0 %454 }
 0x120   : > { %v498_v10 = vpop.permute.xlu1 %497  ;;  %v1758_v12 = vpack.c.bf16 %v505_v8, %v462_v6  ;;  %v461_v13 = vsel %vm460_vm6, %v455_v9, %v1846_v63 }
 0x121   : > { %v504_v14 = vsel %vm503_vm5, %v498_v10, %v1851_v5 }
 0x122   : > { %v1760_v15 = vpack.c.bf16 %v504_v14, %v461_v13  ;;  %1759 = vmatprep.subr.bf16.mxu0 %v1758_v12 }
 0x123   : > { %v1855_v16 = vpop.permute.xlu0 %1854 }
 0x124   : > { %v1860_v17 = vpop.permute.xlu1 %1859  ;;  %1761 = vmatpush1.bf16.msra.mxu0 %v1760_v15  ;;  %v1857_v18 = vunpack.i.h.bf16 %v1855_v16  ;;  %v1856_v32 = vunpack.i.l.bf16 %v1855_v16 }
 0x125   : > { %v1862_v36 = vunpack.i.h.bf16 %v1860_v17  ;;  %v1861_v19 = vunpack.i.l.bf16 %v1860_v17 }
 0x126   : > { %v545_v20 = vsel %vm527_vm4, %v1856_v32, %v1857_v18 }
 0x127   : > { %v586_v21 = vsel %vm486_vm3, %v1861_v19, %v1862_v36  ;;  %v539_v22 = vpop.permute.xlu0 %538 }
 0x128   : > { %v580_v23 = vpop.permute.xlu1 %579  ;;  %v1762_v24 = vpack.c.bf16 %v586_v21, %v545_v20  ;;  %v544_v25 = vsel %vm527_vm4, %v539_v22, %v1856_v32 }
 0x129   : > { %v585_v26 = vsel %vm486_vm3, %v580_v23, %v1861_v19 }
 0x12a   : > { %v1764_v48 = vpack.c.bf16 %v585_v26, %v544_v25  ;;  %1763 = vmatprep.subr.bf16.mxu0 %v1762_v24 }
 0x12b   : > { %v1865_v27 = vpop.permute.xlu0 %1864 }
 0x12c   : > { %v1870_v28 = vpop.permute.xlu1 %1869  ;;  %1765 = vmatpush1.bf16.msra.mxu0 %v1764_v48  ;;  %v1867_v29 = vunpack.i.h.bf16 %v1865_v27  ;;  %v1866_v30 = vunpack.i.l.bf16 %v1865_v27 }
 0x12d   : > { %v1872_v31 = vunpack.i.h.bf16 %v1870_v28  ;;  %v1871_v33 = vunpack.i.l.bf16 %v1870_v28 }
 0x12e   : > { %v630_v34 = vsel %vm443_vm2, %v1866_v30, %v1867_v29 }
 0x12f   : > { %v671_v35 = vsel %vm397_vm1, %v1871_v33, %v1872_v31  ;;  %v624_v37 = vpop.permute.xlu0 %623 }
 0x130   : > { %v665_v38 = vpop.permute.xlu1 %664  ;;  %v1766_v39 = vpack.c.bf16 %v671_v35, %v630_v34  ;;  %v629_v1 = vsel %vm443_vm2, %v624_v37, %v1866_v30 }
 0x131   : > { %v670_v2 = vsel %vm397_vm1, %v665_v38, %v1871_v33 }
 0x132   : > { %v1768_v42 = vpack.c.bf16 %v670_v2, %v629_v1  ;;  %1767 = vmatprep.subr.bf16.mxu0 %v1766_v39 }
 0x133   : > { %v1875_v43 = vpop.permute.xlu0 %1874 }
 0x134   : > { %v1880_v44 = vpop.permute.xlu1 %1879  ;;  %1769 = vmatpush1.bf16.msra.mxu0 %v1768_v42  ;;  %v1877_v45 = vunpack.i.h.bf16 %v1875_v43  ;;  %v1876_v46 = vunpack.i.l.bf16 %v1875_v43 }
 0x135   : > { %v1882_v0 = vunpack.i.h.bf16 %v1880_v44  ;;  %v1881_v47 = vunpack.i.l.bf16 %v1880_v44 }
 0x136   : > { %v714_v49 = vsel %vm354_vm0, %v1876_v46, %v1877_v45 }
 0x137   : > { %v757_v50 = vsel %vm755_vm9, %v1881_v47, %v1882_v0  ;;  %v708_v51 = vpop.permute.xlu0 %707 }
 0x138   : > { %v750_v52 = vpop.permute.xlu1 %749  ;;  %v1770_v53 = vpack.c.bf16 %v757_v50, %v714_v49  ;;  %v713_v3 = vsel %vm354_vm0, %v708_v51, %v1876_v46 }
 0x139   : > { %v756_v54 = vsel %vm755_vm9, %v750_v52, %v1881_v47  ;;  %vm2485_vm9 = vcmask 982016  }
 0x13a   : > { %v1772_v55 = vpack.c.bf16 %v756_v54, %v713_v3  ;;  %1771 = vmatprep.subr.bf16.mxu0 %v1770_v53 }
 0x13b   : > { %v1885_v56 = vpop.permute.xlu0 %1884 }
 0x13c   : > { %v1890_v57 = vpop.permute.xlu1 %1889  ;;  %1773 = vmatpush1.bf16.msra.mxu0 %v1772_v55  ;;  %v1887_v58 = vunpack.i.h.bf16 %v1885_v56  ;;  %v1886_v59 = vunpack.i.l.bf16 %v1885_v56 }
 0x13d   : > { %v1892_v60 = vunpack.i.h.bf16 %v1890_v57  ;;  %v1891_v61 = vunpack.i.l.bf16 %v1890_v57 }
 0x13e   : > { %v798_v62 = vsel %vm796_vm15, %v1886_v59, %v1887_v58 }
 0x13f   : > { %v841_v63 = vsel %vm839_vm14, %v1891_v61, %v1892_v60  ;;  %v791_v4 = vpop.permute.xlu0 %790 }
 0x140   : > { %v834_v5 = vpop.permute.xlu1 %833  ;;  %v1774_v6 = vpack.c.bf16 %v841_v63, %v798_v62  ;;  %v797_v8 = vsel %vm796_vm15, %v791_v4, %v1886_v59 }
 0x141   : > { %v840_v9 = vsel %vm839_vm14, %v834_v5, %v1891_v61  ;;  %vm2487_vm14 = vmmov %vm2485_vm9 }
 0x142   : > { %v1776_v10 = vpack.c.bf16 %v840_v9, %v797_v8  ;;  %1775 = vmatprep.subr.bf16.mxu0 %v1774_v6 }
 0x143   : > { %v1895_v12 = vpop.permute.xlu0 %1894 }
 0x144   : > { %v875_v13 = vpop.permute.xlu1 %874  ;;  %1777 = vmatpush1.bf16.msra.mxu0 %v1776_v10  ;;  %v1897_v14 = vunpack.i.h.bf16 %v1895_v12  ;;  %v1896_v15 = vunpack.i.l.bf16 %v1895_v12 }
 0x146   : > { %v881_v16 = vsel %vm880_vm13, %v875_v13, %v1896_v15  ;;  %v882_v17 = vsel %vm880_vm13, %v1896_v15, %v1897_v14 }
 0x147   : > { %v1780_v18 = vpack.c.bf16 %v2235_v40, %v881_v16  ;;  %v1900_v32 = vpop.permute.xlu0 %1899  ;;  %v1778_v19 = vpack.c.bf16 %v2237_v41, %v882_v17 }
 0x148   : > { %v1905_v36 = vpop.permute.xlu1 %1904  ;;  %v1902_v20 = vunpack.i.h.bf16 %v1900_v32  ;;  %v1901_v21 = vunpack.i.l.bf16 %v1900_v32 }
 0x149   : > { %v1907_v22 = vunpack.i.h.bf16 %v1905_v36  ;;  %v1906_v23 = vunpack.i.l.bf16 %v1905_v36  ;;  %1779 = vmatprep.subr.bf16.mxu0 %v1778_v19 }
 0x14a   : > { %1781 = vmatpush1.bf16.msra.mxu0 %v1780_v18  ;;  %v925_v24 = vsel %vm863_vm12, %v1901_v21, %v1902_v20 }
 0x14b   : > { %v966_v25 = vsel %vm822_vm11, %v1906_v23, %v1907_v22  ;;  %v919_v26 = vpop.permute.xlu0 %918 }
 0x14c   : > { %v960_v48 = vpop.permute.xlu1 %959  ;;  %v1782_v27 = vpack.c.bf16 %v966_v25, %v925_v24  ;;  %v924_v28 = vsel %vm863_vm12, %v919_v26, %v1901_v21  ;;  %vm2488_vm12 = vmmov %vm2486_vm10 }
 0x14d   : > { %v965_v40 = vsel %vm822_vm11, %v960_v48, %v1906_v23 }
 0x14e   : > { %v1784_v29 = vpack.c.bf16 %v965_v40, %v924_v28  ;;  %1783 = vmatprep.subr.bf16.mxu0 %v1782_v27 }
 0x14f   : > { %v1910_v41 = vpop.permute.xlu0 %1909 }
 0x150   : > { %v1915_v30 = vpop.permute.xlu1 %1914  ;;  %1785 = vmatpush1.bf16.msra.mxu0 %v1784_v29  ;;  %v1912_v31 = vunpack.i.h.bf16 %v1910_v41  ;;  %v1911_v33 = vunpack.i.l.bf16 %v1910_v41 }
 0x151   : > { %v1917_v34 = vunpack.i.h.bf16 %v1915_v30  ;;  %v1916_v35 = vunpack.i.l.bf16 %v1915_v30 }
 0x152   : > { %v1005_v37 = vsel %vm2485_vm9, %v1911_v33, %v1912_v31 }
 0x153   : > { %v1046_v38 = vsel %vm2486_vm10, %v1916_v35, %v1917_v34  ;;  %v999_v39 = vpop.permute.xlu0 %998 }
 0x154   : > { %v1040_v1 = vpop.permute.xlu1 %1039  ;;  %v1786_v2 = vpack.c.bf16 %v1046_v38, %v1005_v37  ;;  %v1004_v42 = vsel %vm2487_vm14, %v999_v39, %v1911_v33 }
 0x155   : > { %v1045_v43 = vsel %vm2488_vm12, %v1040_v1, %v1916_v35 }
 0x156   : > { %v1788_v44 = vpack.c.bf16 %v1045_v43, %v1004_v42  ;;  %1787 = vmatprep.subr.bf16.mxu0 %v1786_v2  ;;  %v1427_v43 = vld [vmem:[%s2477_s1] sm:$0xff] }
 0x157   : > { %v1920_v45 = vpop.permute.xlu0 %1919 }
 0x158   : > { %v1925_v46 = vpop.permute.xlu1 %1924  ;;  %1789 = vmatpush1.bf16.msra.mxu0 %v1788_v44  ;;  %v1922_v0 = vunpack.i.h.bf16 %v1920_v45  ;;  %v1921_v47 = vunpack.i.l.bf16 %v1920_v45  ;;  %v1749_v45 = vld [vmem:[%s2037_s9 + $0x6] ss:$8 sm:$0x3] }
 0x159   : > { %v1927_v49 = vunpack.i.h.bf16 %v1925_v46  ;;  %v1926_v50 = vunpack.i.l.bf16 %v1925_v46  ;;  %v1566_v46 = vrot.slane %v1749_v45, %v2064_v11 }
 0x15a   : > { %v1090_v51 = vsel %vm371_vm8, %v1921_v47, %v1922_v0  ;;  %v1570_v0 = vrot.slane %v1749_v45, %v2055_v7 }
 0x15b   : > { %v1131_v52 = vsel %vm414_vm7, %v1926_v50, %v1927_v49  ;;  %v1084_v53 = vpop.permute.xlu0 %1083 }
 0x15c   : > { %v1125_v3 = vpop.permute.xlu1 %1124  ;;  %v1790_v54 = vpack.c.bf16 %v1131_v52, %v1090_v51  ;;  %v1089_v55 = vsel %vm371_vm8, %v1084_v53, %v1921_v47 }
 0x15d   : > { %v1130_v56 = vsel %vm414_vm7, %v1125_v3, %v1926_v50 }
 0x15e   : > { %v1792_v57 = vpack.c.bf16 %v1130_v56, %v1089_v55  ;;  %1791 = vmatprep.subr.bf16.mxu0 %v1790_v54 }
 0x15f   : > { %v1930_v58 = vpop.permute.xlu0 %1929 }
 0x160   : > { %v1935_v59 = vpop.permute.xlu1 %1934  ;;  %1793 = vmatpush1.bf16.msra.mxu0 %v1792_v57  ;;  %v1932_v60 = vunpack.i.h.bf16 %v1930_v58  ;;  %v1931_v61 = vunpack.i.l.bf16 %v1930_v58 }
 0x161   : > { %v1937_v62 = vunpack.i.h.bf16 %v1935_v59  ;;  %v1936_v63 = vunpack.i.l.bf16 %v1935_v59 }
 0x162   : > { %v1174_v4 = vsel %vm460_vm6, %v1931_v61, %v1932_v60 }
 0x163   : > { %v1215_v5 = vsel %vm503_vm5, %v1936_v63, %v1937_v62  ;;  %v1168_v6 = vpop.permute.xlu0 %1167 }
 0x164   : > { %v1209_v8 = vpop.permute.xlu1 %1208  ;;  %v1794_v9 = vpack.c.bf16 %v1215_v5, %v1174_v4  ;;  %v1173_v10 = vsel %vm460_vm6, %v1168_v6, %v1931_v61 }
 0x165   : > { %v1214_v12 = vsel %vm503_vm5, %v1209_v8, %v1936_v63 }
 0x166   : > { %v1796_v13 = vpack.c.bf16 %v1214_v12, %v1173_v10  ;;  %1795 = vmatprep.subr.bf16.mxu0 %v1794_v9 }
 0x167   : > { %v1940_v14 = vpop.permute.xlu0 %1939 }
 0x168   : > { %v1945_v15 = vpop.permute.xlu1 %1944  ;;  %1797 = vmatpush1.bf16.msra.mxu0 %v1796_v13  ;;  %v1942_v16 = vunpack.i.h.bf16 %v1940_v14  ;;  %v1941_v17 = vunpack.i.l.bf16 %v1940_v14 }
 0x169   : > { %v1947_v18 = vunpack.i.h.bf16 %v1945_v15  ;;  %v1946_v32 = vunpack.i.l.bf16 %v1945_v15 }
 0x16a   : > { %v1254_v36 = vsel %vm527_vm4, %v1941_v17, %v1942_v16 }
 0x16b   : > { %v1295_v19 = vsel %vm486_vm3, %v1946_v32, %v1947_v18  ;;  %v1248_v20 = vpop.permute.xlu0 %1247 }
 0x16c   : > { %v1289_v21 = vpop.permute.xlu1 %1288  ;;  %v1798_v22 = vpack.c.bf16 %v1295_v19, %v1254_v36  ;;  %v1253_v23 = vsel %vm527_vm4, %v1248_v20, %v1941_v17 }
 0x16d   : > { %v1294_v24 = vsel %vm486_vm3, %v1289_v21, %v1946_v32 }
 0x16e   : > { %v1800_v25 = vpack.c.bf16 %v1294_v24, %v1253_v23  ;;  %1799 = vmatprep.subr.bf16.mxu0 %v1798_v22 }
 0x16f   : > { %v1950_v26 = vpop.permute.xlu0 %1949 }
 0x170   : > { %v1955_v48 = vpop.permute.xlu1 %1954  ;;  %1801 = vmatpush1.bf16.msra.mxu0 %v1800_v25  ;;  %v1952_v27 = vunpack.i.h.bf16 %v1950_v26  ;;  %v1951_v28 = vunpack.i.l.bf16 %v1950_v26 }
 0x171   : > { %v1957_v40 = vunpack.i.h.bf16 %v1955_v48  ;;  %v1956_v29 = vunpack.i.l.bf16 %v1955_v48 }
 0x172   : > { %v1338_v41 = vsel %vm443_vm2, %v1951_v28, %v1952_v27 }
 0x173   : > { %v1379_v30 = vsel %vm397_vm1, %v1956_v29, %v1957_v40  ;;  %v1332_v31 = vpop.permute.xlu0 %1331 }
 0x174   : > { %v1373_v33 = vpop.permute.xlu1 %1372  ;;  %v1802_v34 = vpack.c.bf16 %v1379_v30, %v1338_v41  ;;  %v1337_v35 = vsel %vm443_vm2, %v1332_v31, %v1951_v28 }
 0x175   : > { %v1378_v37 = vsel %vm397_vm1, %v1373_v33, %v1956_v29 }
 0x176   : > { %v1804_v38 = vpack.c.bf16 %v1378_v37, %v1337_v35  ;;  %1803 = vmatprep.subr.bf16.mxu0 %v1802_v34 }
 0x177   : > { %v1418_v39 = vpop.permute.xlu0 %1417 }
 0x178   : > { %v1420_v1 = vpop.permute.xlu1 %1419  ;;  %1805 = vmatpush1.bf16.msra.mxu0 %v1804_v38 }
 0x179   : > { %v1422_v2 = vsel %vm354_vm0, %v1418_v39, %v1420_v1 }
 0x17a   : > { %1539 = vmatprep.subr.mxu0 %v1422_v2 }
 0x17b   : > { %v1416_v42 = vpop.permute.xlu0 %1415 }
 0x17c   : > { %v1421_v44 = vsel %vm354_vm0, %v1416_v42, %v1418_v39 }
 0x17d   : > { %1540 = vmatpush1.msra.mxu0 %v1421_v44 }
 0x17e   : > { %1552 = vmatmul.mubr.f32.vlgmr.msra.gmra.mrb[0].mxu0 %v1427_v43 }
 0x251   : > { %v1553_v47 = vpop.f32.mrb[0].mxu0 }
 0x252   : > { %1558 = vst [vmem:[%s2042_s12] sm:$0xff] %v1553_v47  ;;  %v1573_v49 = vmul.f32 %v1566_v46, %v1553_v47  ;;  %v1555_v50 = vpop.f32.mrb[1].mxu0 }
 0x253   : > { %1559 = vst [vmem:[%s2042_s12 + $0x8] sm:$0xff] %v1555_v50  ;;  %v1574_v51 = vmul.f32 %v1570_v0, %v1555_v50 }
 0x254   : > { %v1578_v52 = vmul.f32 %v1573_v49, %v1553_v47 }
 0x255   : > { %v1575_v53 = vadd.f32 %v1574_v51, %v1573_v49  ;;  %v1579_v3 = vmul.f32 %v1574_v51, %v1555_v50 }
 0x257   : > { %v1580_v54 = vadd.f32 %v1579_v3, %v1578_v52  ;;  %1576 = vadd.xlane.f32.xlu1 %v1575_v53 }
 0x259   : > { %1581 = vadd.xlane.f32.xlu0 %v1580_v54 }
 0x2e4   : > { %v1577_v55 = vpop.xlane.xlu1 %1576 }
 0x2e5   : > { %1583 = vst.msk [vmem:[%s2032_s30] sm:$0xff] %vm880_vm13, %v1577_v55 }
 0x2e6   : > { %v1582_v56 = vpop.xlane.xlu0 %1581 }
 0x2e7   : > { %1584 = vst.msk [vmem:[%s2032_s30 + $0x8] sm:$0xff] %vm880_vm13, %v1582_v56 }
 0x2e8 PF: > { %s17_s21 = sadd.s32 1, %s1966_s21  }
 0x2e9   : > { %p14_p5 = scmp.ge.s32.totalorder %s17_s21, 6  }
 0x2eb   :  { %16 = sbr.rel (!%p14_p5) target bundleno = 1 (0x1), region = 127 }
 0x2f2   :  { %1623 = vsyncmov [#allocation5] }
 0x2f5   :  { %s1624_s9 = vpop.sfrf %1623 }
 0x2f6   :  { %p1752_p6 = scmp.ne.s32.totalorder %s1624_s9, 0 }
 0x2f8   :  { %1628 = shalt.err (%p1752_p6)  }

</bundles_post_ra>
